<compile_context>
chip_gen: v6e
topology: v6e:2x2x1
jax: 0.10.0
libtpu: 0.0.40
codegen_flags: <defaults>
</compile_context>

<pallas_src>
import numpy as np
import jax
import jax.numpy as jnp
from jax.experimental import pallas as pl
from jax.experimental.pallas import tpu as pltpu


# ---------------------------------------------------------------------------
# Static sizes (28x28 PolyMNIST geometry)
# ---------------------------------------------------------------------------
CPAD = 128            # padded channel / lane width (10 -> 128, 20 -> 128)
K1P = 128             # padded conv1 im2col depth (3*4*4 = 48 -> 128)
HW1 = 14 * 14         # conv1 output spatial positions (14x14)
P2 = 64               # conv2 output spatial positions, padded 49 -> 64 (sublane aligned)
KFC = P2 * CPAD       # fc1 contraction depth after channel/spatial padding (8192)
NCLS = 10


def _round_up(n, m):
    return ((n + m - 1) // m) * m


# ---------------------------------------------------------------------------
# Pallas kernels
# ---------------------------------------------------------------------------

def _conv_stack_kernel(p1_ref, w1_ref, b1_ref, s_ref, w2_ref, b2_ref, o_ref):
    """conv1 + ReLU + conv2 + ReLU for ONE batch element, all in VMEM.

    p1_ref : (1, 196, 128) bf16   im2col patches of the input image (K padded)
    w1_ref : (128, 128)   bf16    conv1 weight, (K, Cout) layout, zero padded
    b1_ref : (1, 128)     f32     conv1 bias (padded lanes = 0)
    s_ref  : (1024, 196)  bf16    constant 0/1 gather matrix: conv2 im2col
    w2_ref : (2048, 128)  bf16    conv2 weight stacked by kernel position
    b2_ref : (1, 128)     f32     conv2 bias (padded lanes = 0)
    o_ref  : (1, 64, 128) bf16    conv2 activation, channels-last, padded
    """
    # conv1 as matmul: (196, 128) @ (128, 128) -> f32
    h1 = jnp.dot(p1_ref[0], w1_ref[...], preferred_element_type=jnp.float32)
    h1 = jnp.maximum(h1 + b1_ref[...], 0.0)          # padded channels stay 0
    h1b = h1.astype(jnp.bfloat16)

    # conv2 im2col as a constant gather matmul on the MXU:
    # g[t*64 + r, c] = h1(padded) at kernel offset t, output position r.
    g = jnp.dot(s_ref[...], h1b, preferred_element_type=jnp.float32)
    gb = g.astype(jnp.bfloat16)

    # conv2 = sum over the 16 kernel positions of (64,128) @ (128,128)
    acc = jnp.zeros((P2, CPAD), jnp.float32)
    for t in range(16):
        acc = acc + jnp.dot(gb[t * P2:(t + 1) * P2, :],
                            w2_ref[t * CPAD:(t + 1) * CPAD, :],
                            preferred_element_type=jnp.float32)
    h2 = jnp.maximum(acc + b2_ref[...], 0.0)
    o_ref[0] = h2.astype(o_ref.dtype)


def _fc_head_kernel(x_ref, w3_ref, b3_ref, w4_ref, b4_ref, o_ref):
    """Linear(980,128)+ReLU, Linear(128,10), log_softmax — fused, lane-dense.

    x_ref  : (tile_m, 8192) bf16   flattened conv2 activations (padded layout)
    w3_ref : (8192, 128)    bf16   fc1 weight (flatten permutation folded in)
    b3_ref : (1, 128)       f32
    w4_ref : (128, 128)     bf16   fc2 weight, columns >= 10 zero
    b4_ref : (1, 128)       f32    fc2 bias, columns >= 10 set to -1e30 (mask)
    o_ref  : (tile_m, 128)  f32    log-probabilities (only first 10 lanes valid)
    """
    h3 = jnp.dot(x_ref[...], w3_ref[...], preferred_element_type=jnp.float32)
    h3 = jnp.maximum(h3 + b3_ref[...], 0.0)
    logits = jnp.dot(h3.astype(jnp.bfloat16), w4_ref[...],
                     preferred_element_type=jnp.float32)
    logits = logits + b4_ref[...]                    # padded lanes -> -1e30
    m = jnp.max(logits, axis=-1, keepdims=True)
    z = logits - m
    lse = jnp.log(jnp.sum(jnp.exp(z), axis=-1, keepdims=True))
    o_ref[...] = z - lse


# ---------------------------------------------------------------------------
# pallas_call wrappers
# ---------------------------------------------------------------------------

def conv_stack(patches1, prep):
    """patches1: (B, 196, 128) bf16 -> conv2 activations (B, 64, 128) bf16."""
    B = patches1.shape[0]
    flops = 2 * B * (HW1 * K1P * CPAD + 16 * P2 * HW1 * CPAD + 16 * P2 * CPAD * CPAD)
    bytes_accessed = (B * HW1 * K1P * 2 + K1P * CPAD * 2 + CPAD * 4
                      + 16 * P2 * HW1 * 2 + 16 * CPAD * CPAD * 2 + CPAD * 4
                      + B * P2 * CPAD * 2)
    return pl.pallas_call(
        _conv_stack_kernel,
        out_shape=jax.ShapeDtypeStruct((B, P2, CPAD), jnp.bfloat16),
        grid=(B,),
        in_specs=[
            pl.BlockSpec((1, HW1, K1P), lambda b: (b, 0, 0)),
            pl.BlockSpec((K1P, CPAD), lambda b: (0, 0)),
            pl.BlockSpec((1, CPAD), lambda b: (0, 0)),
            pl.BlockSpec((16 * P2, HW1), lambda b: (0, 0)),
            pl.BlockSpec((16 * CPAD, CPAD), lambda b: (0, 0)),
            pl.BlockSpec((1, CPAD), lambda b: (0, 0)),
        ],
        out_specs=pl.BlockSpec((1, P2, CPAD), lambda b: (b, 0, 0)),
        compiler_params=pltpu.CompilerParams(
            dimension_semantics=("parallel",),
            vmem_limit_bytes=32 * 1024 * 1024),
        cost_estimate=pl.CostEstimate(flops=flops, transcendentals=0,
                                      bytes_accessed=bytes_accessed),
    )(patches1, prep["w1"], prep["b1"], prep["s2"], prep["w2"], prep["b2"])


def fc_head(flat, prep):
    """flat: (B, 8192) bf16 -> log-probabilities (B, 10) f32."""
    B = flat.shape[0]
    tile_m = min(128, _round_up(B, 8))
    m_pad = _round_up(B, tile_m)
    if m_pad != B:
        flat = jnp.pad(flat, ((0, m_pad - B), (0, 0)))
    flops = 2 * m_pad * (KFC * CPAD + CPAD * CPAD)
    bytes_accessed = (m_pad * KFC * 2 + KFC * CPAD * 2 + CPAD * CPAD * 2
                      + 2 * CPAD * 4 + m_pad * CPAD * 4)
    out = pl.pallas_call(
        _fc_head_kernel,
        out_shape=jax.ShapeDtypeStruct((m_pad, CPAD), jnp.float32),
        grid=(m_pad // tile_m,),
        in_specs=[
            pl.BlockSpec((tile_m, KFC), lambda i: (i, 0)),
            pl.BlockSpec((KFC, CPAD), lambda i: (0, 0)),
            pl.BlockSpec((1, CPAD), lambda i: (0, 0)),
            pl.BlockSpec((CPAD, CPAD), lambda i: (0, 0)),
            pl.BlockSpec((1, CPAD), lambda i: (0, 0)),
        ],
        out_specs=pl.BlockSpec((tile_m, CPAD), lambda i: (i, 0)),
        compiler_params=pltpu.CompilerParams(
            dimension_semantics=("parallel",),
            vmem_limit_bytes=32 * 1024 * 1024),
        cost_estimate=pl.CostEstimate(flops=flops, transcendentals=m_pad * CPAD,
                                      bytes_accessed=bytes_accessed),
    )(flat, prep["w3"], prep["b3"], prep["w4"], prep["b4"])
    return out[:B, :NCLS]


# ---------------------------------------------------------------------------
# Glue: im2col for conv1 (pure JAX reshuffle of the raw input, no heavy compute)
# ---------------------------------------------------------------------------

def im2col_nchw(x, k, s, p):
    """x: (B, C, H, W) -> (B, Ho*Wo, C*k*k), columns in PyTorch (C, kh, kw) order."""
    xp = jnp.pad(x, ((0, 0), (0, 0), (p, p), (p, p)))
    B, C, Hp, Wp = xp.shape
    Ho = (Hp - k) // s + 1
    Wo = (Wp - k) // s + 1
    idx_h = (jnp.arange(Ho) * s)[:, None] + jnp.arange(k)[None, :]   # (Ho, k)
    idx_w = (jnp.arange(Wo) * s)[:, None] + jnp.arange(k)[None, :]   # (Wo, k)
    patches = xp[:, :, idx_h[:, None, :, None], idx_w[None, :, None, :]]  # (B,C,Ho,Wo,k,k)
    patches = jnp.transpose(patches, (0, 2, 3, 1, 4, 5))                  # (B,Ho,Wo,C,k,k)
    return patches.reshape(B, Ho * Wo, C * k * k)


# ---------------------------------------------------------------------------
# Parameters: raw (PyTorch layout) + one-time preparation for the kernels
# ---------------------------------------------------------------------------

def init_params(key):
    ks = jax.random.split(key, 8)
    return {
        "w1": jax.random.normal(ks[0], (10, 3, 4, 4), jnp.float32) * 0.1,
        "b1": jax.random.normal(ks[1], (10,), jnp.float32) * 0.1,
        "w2": jax.random.normal(ks[2], (20, 10, 4, 4), jnp.float32) * 0.1,
        "b2": jax.random.normal(ks[3], (20,), jnp.float32) * 0.1,
        "w3": jax.random.normal(ks[4], (128, 980), jnp.float32) * 0.05,
        "b3": jax.random.normal(ks[5], (128,), jnp.float32) * 0.05,
        "w4": jax.random.normal(ks[6], (10, 128), jnp.float32) * 0.05,
        "b4": jax.random.normal(ks[7], (10,), jnp.float32) * 0.05,
    }


def _build_conv2_gather():
    """0/1 matrix S (16*64, 196): S[t*64 + (ho*7+wo), hi*14+wi] selects the
    padded conv1 activation feeding conv2 output (ho,wo) at kernel offset t."""
    s = np.zeros((16 * P2, HW1), np.float32)
    for kh in range(4):
        for kw in range(4):
            t = kh * 4 + kw
            for ho in range(7):
                for wo in range(7):
                    hi, wi = 2 * ho + kh - 1, 2 * wo + kw - 1
                    if 0 <= hi < 14 and 0 <= wi < 14:
                        s[t * P2 + ho * 7 + wo, hi * 14 + wi] = 1.0
    return jnp.asarray(s, jnp.bfloat16)


def prepare_params(params):
    """One-time reshape / transpose / pad / cast of all weights (off the hot path)."""
    # conv1: (10,3,4,4) -> (48,10) -> zero-pad to (128,128), bf16
    w1 = params["w1"].reshape(10, 48).T
    w1p = jnp.zeros((K1P, CPAD), jnp.float32).at[:48, :10].set(w1).astype(jnp.bfloat16)
    b1p = jnp.zeros((1, CPAD), jnp.float32).at[0, :10].set(params["b1"])

    # conv2: (20,10,4,4) -> stacked by kernel position t=kh*4+kw -> (16*128,128)
    w2t = jnp.transpose(params["w2"], (2, 3, 1, 0)).reshape(16, 10, 20)
    w2p = jnp.zeros((16, CPAD, CPAD), jnp.float32).at[:, :10, :20].set(w2t)
    w2p = w2p.reshape(16 * CPAD, CPAD).astype(jnp.bfloat16)
    b2p = jnp.zeros((1, CPAD), jnp.float32).at[0, :20].set(params["b2"])

    # fc1: fold PyTorch NCHW flatten (k = c*49 + r) into the weight layout used
    # by the channels-last, padded conv2 output (row index r*128 + c).
    w3t = jnp.transpose(params["w3"].reshape(128, 20, 49), (2, 1, 0))   # (r, c, j)
    w3p = jnp.zeros((P2, CPAD, CPAD), jnp.float32).at[:49, :20, :].set(w3t)
    w3p = w3p.reshape(KFC, CPAD).astype(jnp.bfloat16)
    b3p = params["b3"].reshape(1, CPAD)

    # fc2: (10,128) -> (128,128) zero-padded columns; padded bias = -1e30 so the
    # in-kernel log_softmax ignores the padded lanes.
    w4p = jnp.zeros((CPAD, CPAD), jnp.float32).at[:, :10].set(params["w4"].T)
    w4p = w4p.astype(jnp.bfloat16)
    b4p = jnp.full((1, CPAD), -1e30, jnp.float32).at[0, :10].set(params["b4"])

    return {"w1": w1p, "b1": b1p, "s2": _build_conv2_gather(),
            "w2": w2p, "b2": b2p, "w3": w3p, "b3": b3p, "w4": w4p, "b4": b4p}


# ---------------------------------------------------------------------------
# Forward pass (2 fused Pallas kernels)
# ---------------------------------------------------------------------------

def clf_img_forward(prep, x):
    """x: (B, 3, 28, 28) NCHW float32 -> log-probabilities (B, 10) float32."""
    B = x.shape[0]
    p1 = im2col_nchw(x, k=4, s=2, p=1)                                  # (B,196,48)
    p1 = jnp.pad(p1, ((0, 0), (0, 0), (0, K1P - p1.shape[-1]))).astype(jnp.bfloat16)
    h2 = conv_stack(p1, prep)                                           # (B,64,128) bf16
    flat = h2.reshape(B, KFC)                                           # free reshape
    return fc_head(flat, prep)                                          # (B,10)


# ---------------------------------------------------------------------------
# Pure-JAX reference (PyTorch layout/order), used as a correctness oracle
# ---------------------------------------------------------------------------

def reference_forward(params, x):
    B = x.shape[0]
    p1 = im2col_nchw(x, 4, 2, 1).reshape(B * 196, 48)
    h1 = jnp.maximum(p1 @ params["w1"].reshape(10, 48).T + params["b1"], 0.0)
    h1 = h1.reshape(B, 14, 14, 10).transpose(0, 3, 1, 2)
    p2 = im2col_nchw(h1, 4, 2, 1).reshape(B * 49, 160)
    h2 = jnp.maximum(p2 @ params["w2"].reshape(20, 160).T + params["b2"], 0.0)
    h2 = h2.reshape(B, 7, 7, 20).transpose(0, 3, 1, 2)
    flat = h2.reshape(B, 980)
    h3 = jnp.maximum(flat @ params["w3"].T + params["b3"], 0.0)
    logits = h3 @ params["w4"].T + params["b4"]
    return jax.nn.log_softmax(logits, axis=-1)


# ---------------------------------------------------------------------------
# Main
# ---------------------------------------------------------------------------

if __name__ == "__main__":
    key = jax.random.PRNGKey(0)
    k_param, k_x = jax.random.split(key)

    params = init_params(k_param)
    prep = prepare_params(params)                   # one-time weight preparation

    # PolyMNIST images: batch=2, 3x28x28 (28x28 is required so Flatten -> 980).
    x = jax.random.normal(k_x, (2, 3, 28, 28), jnp.float32)

    fwd = jax.jit(clf_img_forward)
    logp = fwd(prep, x)
    jax.block_until_ready(logp)

    assert logp.shape == (2, NCLS)
    # log_softmax rows must sum (in prob space) to ~1
    row_sums = jnp.exp(logp).sum(axis=-1)
    assert bool(jnp.allclose(row_sums, 1.0, atol=1e-3))
    # match the PyTorch-ordered pure-JAX reference (bf16 MXU tolerance)
    ref = reference_forward(params, x)
    assert bool(jnp.allclose(logp, ref, atol=0.25)), "mismatch vs reference"

    print("KERNEL_OK")
</pallas_src>

<mosaic_0001>
module attributes {stable_mosaic.version = 11 : i64} {
  func.func @_conv_stack_kernel(%arg0: i32, %arg1: memref<1x196x128xbf16, #tpu.memory_space<vmem>>, %arg2: memref<128x128xbf16, #tpu.memory_space<vmem>>, %arg3: memref<1x128xf32, #tpu.memory_space<vmem>>, %arg4: memref<1024x196xbf16, #tpu.memory_space<vmem>>, %arg5: memref<2048x128xbf16, #tpu.memory_space<vmem>>, %arg6: memref<1x128xf32, #tpu.memory_space<vmem>>, %arg7: memref<1x64x128xbf16, #tpu.memory_space<vmem>>) attributes {dimension_semantics = [#tpu.dimension_semantics<parallel>], iteration_bounds = array<i64: 2>, scalar_prefetch = 0 : i64, scratch_operands = 0 : i64, tpu.core_type = #tpu.core_type<tc>, window_params = [{transform_indices = @transform_0, window_bounds = array<i64: 1, 196, 128>}, {pipeline_mode = #tpu.pipeline_mode<synchronous>, transform_indices = @transform_1, window_bounds = array<i64: 128, 128>}, {pipeline_mode = #tpu.pipeline_mode<synchronous>, transform_indices = @transform_2, window_bounds = array<i64: 1, 128>}, {pipeline_mode = #tpu.pipeline_mode<synchronous>, transform_indices = @transform_3, window_bounds = array<i64: 1024, 196>}, {pipeline_mode = #tpu.pipeline_mode<synchronous>, transform_indices = @transform_4, window_bounds = array<i64: 2048, 128>}, {pipeline_mode = #tpu.pipeline_mode<synchronous>, transform_indices = @transform_5, window_bounds = array<i64: 1, 128>}, {transform_indices = @transform_6, window_bounds = array<i64: 1, 64, 128>}]} {
    %c0 = arith.constant 0 : index
    %c0_0 = arith.constant 0 : index
    %c0_1 = arith.constant 0 : index
    %0 = vector.load %arg1[%c0, %c0_0, %c0_1] : memref<1x196x128xbf16, #tpu.memory_space<vmem>>, vector<1x196x128xbf16>
    %1 = vector.shape_cast %0 : vector<1x196x128xbf16> to vector<196x128xbf16>
    %c0_2 = arith.constant 0 : index
    %c0_3 = arith.constant 0 : index
    %2 = vector.load %arg2[%c0_2, %c0_3] : memref<128x128xbf16, #tpu.memory_space<vmem>>, vector<128x128xbf16>
    %cst = arith.constant dense<0.000000e+00> : vector<196x128xf32>
    %3 = tpu.matmul %1, %2, %cst {dimension_numbers = #tpu.dot_dimension_numbers<[1], [0], [0], [1], [0, 0, 1, 1], [], []>} : vector<196x128xbf16>, vector<128x128xbf16>, vector<196x128xf32> -> vector<196x128xf32>
    %c0_4 = arith.constant 0 : index
    %c0_5 = arith.constant 0 : index
    %4 = vector.load %arg3[%c0_4, %c0_5] : memref<1x128xf32, #tpu.memory_space<vmem>>, vector<1x128xf32>
    %5 = vector.broadcast %4 : vector<1x128xf32> to vector<196x128xf32>
    %6 = arith.addf %3, %5 : vector<196x128xf32>
    %cst_6 = arith.constant 0.000000e+00 : f32
    %7 = vector.broadcast %cst_6 : f32 to vector<196x128xf32>
    %8 = arith.maximumf %6, %7 : vector<196x128xf32>
    %9 = arith.truncf %8 : vector<196x128xf32> to vector<196x128xbf16>
    %c0_7 = arith.constant 0 : index
    %c0_8 = arith.constant 0 : index
    %10 = vector.load %arg4[%c0_7, %c0_8] : memref<1024x196xbf16, #tpu.memory_space<vmem>>, vector<1024x196xbf16>
    %cst_9 = arith.constant dense<0.000000e+00> : vector<1024x128xf32>
    %11 = tpu.matmul %10, %9, %cst_9 {dimension_numbers = #tpu.dot_dimension_numbers<[1], [0], [0], [1], [0, 0, 1, 1], [], []>} : vector<1024x196xbf16>, vector<196x128xbf16>, vector<1024x128xf32> -> vector<1024x128xf32>
    %12 = arith.truncf %11 : vector<1024x128xf32> to vector<1024x128xbf16>
    %cst_10 = arith.constant 0.000000e+00 : f32
    %13 = vector.broadcast %cst_10 : f32 to vector<64x128xf32>
    %14 = vector.extract_strided_slice %12 {offsets = [0, 0], sizes = [64, 128], strides = [1, 1]} : vector<1024x128xbf16> to vector<64x128xbf16>
    %c0_11 = arith.constant 0 : index
    %c0_12 = arith.constant 0 : index
    %15 = vector.load %arg5[%c0_11, %c0_12] : memref<2048x128xbf16, #tpu.memory_space<vmem>>, vector<128x128xbf16>
    %cst_13 = arith.constant dense<0.000000e+00> : vector<64x128xf32>
    %16 = tpu.matmul %14, %15, %cst_13 {dimension_numbers = #tpu.dot_dimension_numbers<[1], [0], [0], [1], [0, 0, 1, 1], [], []>} : vector<64x128xbf16>, vector<128x128xbf16>, vector<64x128xf32> -> vector<64x128xf32>
    %17 = arith.addf %13, %16 : vector<64x128xf32>
    %18 = vector.extract_strided_slice %12 {offsets = [64, 0], sizes = [64, 128], strides = [1, 1]} : vector<1024x128xbf16> to vector<64x128xbf16>
    %c128 = arith.constant 128 : index
    %c0_14 = arith.constant 0 : index
    %19 = vector.load %arg5[%c128, %c0_14] : memref<2048x128xbf16, #tpu.memory_space<vmem>>, vector<128x128xbf16>
    %cst_15 = arith.constant dense<0.000000e+00> : vector<64x128xf32>
    %20 = tpu.matmul %18, %19, %cst_15 {dimension_numbers = #tpu.dot_dimension_numbers<[1], [0], [0], [1], [0, 0, 1, 1], [], []>} : vector<64x128xbf16>, vector<128x128xbf16>, vector<64x128xf32> -> vector<64x128xf32>
    %21 = arith.addf %17, %20 : vector<64x128xf32>
    %22 = vector.extract_strided_slice %12 {offsets = [128, 0], sizes = [64, 128], strides = [1, 1]} : vector<1024x128xbf16> to vector<64x128xbf16>
    %c256 = arith.constant 256 : index
    %c0_16 = arith.constant 0 : index
    %23 = vector.load %arg5[%c256, %c0_16] : memref<2048x128xbf16, #tpu.memory_space<vmem>>, vector<128x128xbf16>
    %cst_17 = arith.constant dense<0.000000e+00> : vector<64x128xf32>
    %24 = tpu.matmul %22, %23, %cst_17 {dimension_numbers = #tpu.dot_dimension_numbers<[1], [0], [0], [1], [0, 0, 1, 1], [], []>} : vector<64x128xbf16>, vector<128x128xbf16>, vector<64x128xf32> -> vector<64x128xf32>
    %25 = arith.addf %21, %24 : vector<64x128xf32>
    %26 = vector.extract_strided_slice %12 {offsets = [192, 0], sizes = [64, 128], strides = [1, 1]} : vector<1024x128xbf16> to vector<64x128xbf16>
    %c384 = arith.constant 384 : index
    %c0_18 = arith.constant 0 : index
    %27 = vector.load %arg5[%c384, %c0_18] : memref<2048x128xbf16, #tpu.memory_space<vmem>>, vector<128x128xbf16>
    %cst_19 = arith.constant dense<0.000000e+00> : vector<64x128xf32>
    %28 = tpu.matmul %26, %27, %cst_19 {dimension_numbers = #tpu.dot_dimension_numbers<[1], [0], [0], [1], [0, 0, 1, 1], [], []>} : vector<64x128xbf16>, vector<128x128xbf16>, vector<64x128xf32> -> vector<64x128xf32>
    %29 = arith.addf %25, %28 : vector<64x128xf32>
    %30 = vector.extract_strided_slice %12 {offsets = [256, 0], sizes = [64, 128], strides = [1, 1]} : vector<1024x128xbf16> to vector<64x128xbf16>
    %c512 = arith.constant 512 : index
    %c0_20 = arith.constant 0 : index
    %31 = vector.load %arg5[%c512, %c0_20] : memref<2048x128xbf16, #tpu.memory_space<vmem>>, vector<128x128xbf16>
    %cst_21 = arith.constant dense<0.000000e+00> : vector<64x128xf32>
    %32 = tpu.matmul %30, %31, %cst_21 {dimension_numbers = #tpu.dot_dimension_numbers<[1], [0], [0], [1], [0, 0, 1, 1], [], []>} : vector<64x128xbf16>, vector<128x128xbf16>, vector<64x128xf32> -> vector<64x128xf32>
    %33 = arith.addf %29, %32 : vector<64x128xf32>
    %34 = vector.extract_strided_slice %12 {offsets = [320, 0], sizes = [64, 128], strides = [1, 1]} : vector<1024x128xbf16> to vector<64x128xbf16>
    %c640 = arith.constant 640 : index
    %c0_22 = arith.constant 0 : index
    %35 = vector.load %arg5[%c640, %c0_22] : memref<2048x128xbf16, #tpu.memory_space<vmem>>, vector<128x128xbf16>
    %cst_23 = arith.constant dense<0.000000e+00> : vector<64x128xf32>
    %36 = tpu.matmul %34, %35, %cst_23 {dimension_numbers = #tpu.dot_dimension_numbers<[1], [0], [0], [1], [0, 0, 1, 1], [], []>} : vector<64x128xbf16>, vector<128x128xbf16>, vector<64x128xf32> -> vector<64x128xf32>
    %37 = arith.addf %33, %36 : vector<64x128xf32>
    %38 = vector.extract_strided_slice %12 {offsets = [384, 0], sizes = [64, 128], strides = [1, 1]} : vector<1024x128xbf16> to vector<64x128xbf16>
    %c768 = arith.constant 768 : index
    %c0_24 = arith.constant 0 : index
    %39 = vector.load %arg5[%c768, %c0_24] : memref<2048x128xbf16, #tpu.memory_space<vmem>>, vector<128x128xbf16>
    %cst_25 = arith.constant dense<0.000000e+00> : vector<64x128xf32>
    %40 = tpu.matmul %38, %39, %cst_25 {dimension_numbers = #tpu.dot_dimension_numbers<[1], [0], [0], [1], [0, 0, 1, 1], [], []>} : vector<64x128xbf16>, vector<128x128xbf16>, vector<64x128xf32> -> vector<64x128xf32>
    %41 = arith.addf %37, %40 : vector<64x128xf32>
    %42 = vector.extract_strided_slice %12 {offsets = [448, 0], sizes = [64, 128], strides = [1, 1]} : vector<1024x128xbf16> to vector<64x128xbf16>
    %c896 = arith.constant 896 : index
    %c0_26 = arith.constant 0 : index
    %43 = vector.load %arg5[%c896, %c0_26] : memref<2048x128xbf16, #tpu.memory_space<vmem>>, vector<128x128xbf16>
    %cst_27 = arith.constant dense<0.000000e+00> : vector<64x128xf32>
    %44 = tpu.matmul %42, %43, %cst_27 {dimension_numbers = #tpu.dot_dimension_numbers<[1], [0], [0], [1], [0, 0, 1, 1], [], []>} : vector<64x128xbf16>, vector<128x128xbf16>, vector<64x128xf32> -> vector<64x128xf32>
    %45 = arith.addf %41, %44 : vector<64x128xf32>
    %46 = vector.extract_strided_slice %12 {offsets = [512, 0], sizes = [64, 128], strides = [1, 1]} : vector<1024x128xbf16> to vector<64x128xbf16>
    %c1024 = arith.constant 1024 : index
    %c0_28 = arith.constant 0 : index
    %47 = vector.load %arg5[%c1024, %c0_28] : memref<2048x128xbf16, #tpu.memory_space<vmem>>, vector<128x128xbf16>
    %cst_29 = arith.constant dense<0.000000e+00> : vector<64x128xf32>
    %48 = tpu.matmul %46, %47, %cst_29 {dimension_numbers = #tpu.dot_dimension_numbers<[1], [0], [0], [1], [0, 0, 1, 1], [], []>} : vector<64x128xbf16>, vector<128x128xbf16>, vector<64x128xf32> -> vector<64x128xf32>
    %49 = arith.addf %45, %48 : vector<64x128xf32>
    %50 = vector.extract_strided_slice %12 {offsets = [576, 0], sizes = [64, 128], strides = [1, 1]} : vector<1024x128xbf16> to vector<64x128xbf16>
    %c1152 = arith.constant 1152 : index
    %c0_30 = arith.constant 0 : index
    %51 = vector.load %arg5[%c1152, %c0_30] : memref<2048x128xbf16, #tpu.memory_space<vmem>>, vector<128x128xbf16>
    %cst_31 = arith.constant dense<0.000000e+00> : vector<64x128xf32>
    %52 = tpu.matmul %50, %51, %cst_31 {dimension_numbers = #tpu.dot_dimension_numbers<[1], [0], [0], [1], [0, 0, 1, 1], [], []>} : vector<64x128xbf16>, vector<128x128xbf16>, vector<64x128xf32> -> vector<64x128xf32>
    %53 = arith.addf %49, %52 : vector<64x128xf32>
    %54 = vector.extract_strided_slice %12 {offsets = [640, 0], sizes = [64, 128], strides = [1, 1]} : vector<1024x128xbf16> to vector<64x128xbf16>
    %c1280 = arith.constant 1280 : index
    %c0_32 = arith.constant 0 : index
    %55 = vector.load %arg5[%c1280, %c0_32] : memref<2048x128xbf16, #tpu.memory_space<vmem>>, vector<128x128xbf16>
    %cst_33 = arith.constant dense<0.000000e+00> : vector<64x128xf32>
    %56 = tpu.matmul %54, %55, %cst_33 {dimension_numbers = #tpu.dot_dimension_numbers<[1], [0], [0], [1], [0, 0, 1, 1], [], []>} : vector<64x128xbf16>, vector<128x128xbf16>, vector<64x128xf32> -> vector<64x128xf32>
    %57 = arith.addf %53, %56 : vector<64x128xf32>
    %58 = vector.extract_strided_slice %12 {offsets = [704, 0], sizes = [64, 128], strides = [1, 1]} : vector<1024x128xbf16> to vector<64x128xbf16>
    %c1408 = arith.constant 1408 : index
    %c0_34 = arith.constant 0 : index
    %59 = vector.load %arg5[%c1408, %c0_34] : memref<2048x128xbf16, #tpu.memory_space<vmem>>, vector<128x128xbf16>
    %cst_35 = arith.constant dense<0.000000e+00> : vector<64x128xf32>
    %60 = tpu.matmul %58, %59, %cst_35 {dimension_numbers = #tpu.dot_dimension_numbers<[1], [0], [0], [1], [0, 0, 1, 1], [], []>} : vector<64x128xbf16>, vector<128x128xbf16>, vector<64x128xf32> -> vector<64x128xf32>
    %61 = arith.addf %57, %60 : vector<64x128xf32>
    %62 = vector.extract_strided_slice %12 {offsets = [768, 0], sizes = [64, 128], strides = [1, 1]} : vector<1024x128xbf16> to vector<64x128xbf16>
    %c1536 = arith.constant 1536 : index
    %c0_36 = arith.constant 0 : index
    %63 = vector.load %arg5[%c1536, %c0_36] : memref<2048x128xbf16, #tpu.memory_space<vmem>>, vector<128x128xbf16>
    %cst_37 = arith.constant dense<0.000000e+00> : vector<64x128xf32>
    %64 = tpu.matmul %62, %63, %cst_37 {dimension_numbers = #tpu.dot_dimension_numbers<[1], [0], [0], [1], [0, 0, 1, 1], [], []>} : vector<64x128xbf16>, vector<128x128xbf16>, vector<64x128xf32> -> vector<64x128xf32>
    %65 = arith.addf %61, %64 : vector<64x128xf32>
    %66 = vector.extract_strided_slice %12 {offsets = [832, 0], sizes = [64, 128], strides = [1, 1]} : vector<1024x128xbf16> to vector<64x128xbf16>
    %c1664 = arith.constant 1664 : index
    %c0_38 = arith.constant 0 : index
    %67 = vector.load %arg5[%c1664, %c0_38] : memref<2048x128xbf16, #tpu.memory_space<vmem>>, vector<128x128xbf16>
    %cst_39 = arith.constant dense<0.000000e+00> : vector<64x128xf32>
    %68 = tpu.matmul %66, %67, %cst_39 {dimension_numbers = #tpu.dot_dimension_numbers<[1], [0], [0], [1], [0, 0, 1, 1], [], []>} : vector<64x128xbf16>, vector<128x128xbf16>, vector<64x128xf32> -> vector<64x128xf32>
    %69 = arith.addf %65, %68 : vector<64x128xf32>
    %70 = vector.extract_strided_slice %12 {offsets = [896, 0], sizes = [64, 128], strides = [1, 1]} : vector<1024x128xbf16> to vector<64x128xbf16>
    %c1792 = arith.constant 1792 : index
    %c0_40 = arith.constant 0 : index
    %71 = vector.load %arg5[%c1792, %c0_40] : memref<2048x128xbf16, #tpu.memory_space<vmem>>, vector<128x128xbf16>
    %cst_41 = arith.constant dense<0.000000e+00> : vector<64x128xf32>
    %72 = tpu.matmul %70, %71, %cst_41 {dimension_numbers = #tpu.dot_dimension_numbers<[1], [0], [0], [1], [0, 0, 1, 1], [], []>} : vector<64x128xbf16>, vector<128x128xbf16>, vector<64x128xf32> -> vector<64x128xf32>
    %73 = arith.addf %69, %72 : vector<64x128xf32>
    %74 = vector.extract_strided_slice %12 {offsets = [960, 0], sizes = [64, 128], strides = [1, 1]} : vector<1024x128xbf16> to vector<64x128xbf16>
    %c1920 = arith.constant 1920 : index
    %c0_42 = arith.constant 0 : index
    %75 = vector.load %arg5[%c1920, %c0_42] : memref<2048x128xbf16, #tpu.memory_space<vmem>>, vector<128x128xbf16>
    %cst_43 = arith.constant dense<0.000000e+00> : vector<64x128xf32>
    %76 = tpu.matmul %74, %75, %cst_43 {dimension_numbers = #tpu.dot_dimension_numbers<[1], [0], [0], [1], [0, 0, 1, 1], [], []>} : vector<64x128xbf16>, vector<128x128xbf16>, vector<64x128xf32> -> vector<64x128xf32>
    %77 = arith.addf %73, %76 : vector<64x128xf32>
    %c0_44 = arith.constant 0 : index
    %c0_45 = arith.constant 0 : index
    %78 = vector.load %arg6[%c0_44, %c0_45] : memref<1x128xf32, #tpu.memory_space<vmem>>, vector<1x128xf32>
    %79 = vector.broadcast %78 : vector<1x128xf32> to vector<64x128xf32>
    %80 = arith.addf %77, %79 : vector<64x128xf32>
    %cst_46 = arith.constant 0.000000e+00 : f32
    %81 = vector.broadcast %cst_46 : f32 to vector<64x128xf32>
    %82 = arith.maximumf %80, %81 : vector<64x128xf32>
    %83 = arith.truncf %82 : vector<64x128xf32> to vector<64x128xbf16>
    %c0_47 = arith.constant 0 : index
    %c0_48 = arith.constant 0 : index
    %c0_49 = arith.constant 0 : index
    %84 = vector.load %arg7[%c0_47, %c0_48, %c0_49] : memref<1x64x128xbf16, #tpu.memory_space<vmem>>, vector<1x64x128xbf16>
    %85 = vector.shape_cast %84 : vector<1x64x128xbf16> to vector<64x128xbf16>
    %86 = vector.shape_cast %83 : vector<64x128xbf16> to vector<1x64x128xbf16>
    tpu.vector_store %arg7[%c0_47, %c0_48, %c0_49], %86 {strides = array<i32>} : memref<1x64x128xbf16, #tpu.memory_space<vmem>>, vector<1x64x128xbf16>,
    return
  }
  func.func @transform_0(%arg0: i32) -> (i32, i32, i32) {
    %c0_i32 = arith.constant 0 : i32
    %c0_i32_0 = arith.constant 0 : i32
    %c0_i32_1 = arith.constant 0 : i32
    return %arg0, %c0_i32, %c0_i32_0 : i32, i32, i32
  }
  func.func @transform_1(%arg0: i32) -> (i32, i32) {
    %c0_i32 = arith.constant 0 : i32
    %c0_i32_0 = arith.constant 0 : i32
    %c0_i32_1 = arith.constant 0 : i32
    return %c0_i32, %c0_i32_0 : i32, i32
  }
  func.func @transform_2(%arg0: i32) -> (i32, i32) {
    %c0_i32 = arith.constant 0 : i32
    %c0_i32_0 = arith.constant 0 : i32
    %c0_i32_1 = arith.constant 0 : i32
    return %c0_i32, %c0_i32_0 : i32, i32
  }
  func.func @transform_3(%arg0: i32) -> (i32, i32) {
    %c0_i32 = arith.constant 0 : i32
    %c0_i32_0 = arith.constant 0 : i32
    %c0_i32_1 = arith.constant 0 : i32
    return %c0_i32, %c0_i32_0 : i32, i32
  }
  func.func @transform_4(%arg0: i32) -> (i32, i32) {
    %c0_i32 = arith.constant 0 : i32
    %c0_i32_0 = arith.constant 0 : i32
    %c0_i32_1 = arith.constant 0 : i32
    return %c0_i32, %c0_i32_0 : i32, i32
  }
  func.func @transform_5(%arg0: i32) -> (i32, i32) {
    %c0_i32 = arith.constant 0 : i32
    %c0_i32_0 = arith.constant 0 : i32
    %c0_i32_1 = arith.constant 0 : i32
    return %c0_i32, %c0_i32_0 : i32, i32
  }
  func.func @transform_6(%arg0: i32) -> (i32, i32, i32) {
    %c0_i32 = arith.constant 0 : i32
    %c0_i32_0 = arith.constant 0 : i32
    %c0_i32_1 = arith.constant 0 : i32
    return %arg0, %c0_i32, %c0_i32_0 : i32, i32, i32
  }
}

module attributes {stable_mosaic.version = 11 : i64} {
  func.func @_fc_head_kernel(%arg0: i32, %arg1: memref<8x8192xbf16, #tpu.memory_space<vmem>>, %arg2: memref<8192x128xbf16, #tpu.memory_space<vmem>>, %arg3: memref<1x128xf32, #tpu.memory_space<vmem>>, %arg4: memref<128x128xbf16, #tpu.memory_space<vmem>>, %arg5: memref<1x128xf32, #tpu.memory_space<vmem>>, %arg6: memref<8x128xf32, #tpu.memory_space<vmem>>) attributes {dimension_semantics = [#tpu.dimension_semantics<parallel>], iteration_bounds = array<i64: 1>, scalar_prefetch = 0 : i64, scratch_operands = 0 : i64, tpu.core_type = #tpu.core_type<tc>, window_params = [{transform_indices = @transform_0, window_bounds = array<i64: 8, 8192>}, {pipeline_mode = #tpu.pipeline_mode<synchronous>, transform_indices = @transform_1, window_bounds = array<i64: 8192, 128>}, {pipeline_mode = #tpu.pipeline_mode<synchronous>, transform_indices = @transform_2, window_bounds = array<i64: 1, 128>}, {pipeline_mode = #tpu.pipeline_mode<synchronous>, transform_indices = @transform_3, window_bounds = array<i64: 128, 128>}, {pipeline_mode = #tpu.pipeline_mode<synchronous>, transform_indices = @transform_4, window_bounds = array<i64: 1, 128>}, {transform_indices = @transform_5, window_bounds = array<i64: 8, 128>}]} {
    %c0 = arith.constant 0 : index
    %c0_0 = arith.constant 0 : index
    %0 = vector.load %arg1[%c0, %c0_0] : memref<8x8192xbf16, #tpu.memory_space<vmem>>, vector<8x8192xbf16>
    %c0_1 = arith.constant 0 : index
    %c0_2 = arith.constant 0 : index
    %1 = vector.load %arg2[%c0_1, %c0_2] : memref<8192x128xbf16, #tpu.memory_space<vmem>>, vector<8192x128xbf16>
    %cst = arith.constant dense<0.000000e+00> : vector<8x128xf32>
    %2 = tpu.matmul %0, %1, %cst {dimension_numbers = #tpu.dot_dimension_numbers<[1], [0], [0], [1], [0, 0, 1, 1], [], []>} : vector<8x8192xbf16>, vector<8192x128xbf16>, vector<8x128xf32> -> vector<8x128xf32>
    %c0_3 = arith.constant 0 : index
    %c0_4 = arith.constant 0 : index
    %3 = vector.load %arg3[%c0_3, %c0_4] : memref<1x128xf32, #tpu.memory_space<vmem>>, vector<1x128xf32>
    %4 = vector.broadcast %3 : vector<1x128xf32> to vector<8x128xf32>
    %5 = arith.addf %2, %4 : vector<8x128xf32>
    %cst_5 = arith.constant 0.000000e+00 : f32
    %6 = vector.broadcast %cst_5 : f32 to vector<8x128xf32>
    %7 = arith.maximumf %5, %6 : vector<8x128xf32>
    %8 = arith.truncf %7 : vector<8x128xf32> to vector<8x128xbf16>
    %c0_6 = arith.constant 0 : index
    %c0_7 = arith.constant 0 : index
    %9 = vector.load %arg4[%c0_6, %c0_7] : memref<128x128xbf16, #tpu.memory_space<vmem>>, vector<128x128xbf16>
    %cst_8 = arith.constant dense<0.000000e+00> : vector<8x128xf32>
    %10 = tpu.matmul %8, %9, %cst_8 {dimension_numbers = #tpu.dot_dimension_numbers<[1], [0], [0], [1], [0, 0, 1, 1], [], []>} : vector<8x128xbf16>, vector<128x128xbf16>, vector<8x128xf32> -> vector<8x128xf32>
    %c0_9 = arith.constant 0 : index
    %c0_10 = arith.constant 0 : index
    %11 = vector.load %arg5[%c0_9, %c0_10] : memref<1x128xf32, #tpu.memory_space<vmem>>, vector<1x128xf32>
    %12 = vector.broadcast %11 : vector<1x128xf32> to vector<8x128xf32>
    %13 = arith.addf %10, %12 : vector<8x128xf32>
    %cst_11 = arith.constant dense<0xFF800000> : vector<8xf32>
    %14 = vector.multi_reduction <maximumf>, %13, %cst_11 [1] : vector<8x128xf32> to vector<8xf32>
    %15 = vector.shape_cast %14 : vector<8xf32> to vector<8x1xf32>
    %16 = vector.broadcast %15 : vector<8x1xf32> to vector<8x128xf32>
    %17 = arith.subf %13, %16 : vector<8x128xf32>
    %18 = math.exp %17 : vector<8x128xf32>
    %cst_12 = arith.constant dense<0.000000e+00> : vector<8xf32>
    %19 = vector.multi_reduction <add>, %18, %cst_12 [1] : vector<8x128xf32> to vector<8xf32>
    %20 = vector.shape_cast %19 : vector<8xf32> to vector<8x1xf32>
    %21 = math.log %20 : vector<8x1xf32>
    %22 = vector.broadcast %21 : vector<8x1xf32> to vector<8x128xf32>
    %23 = arith.subf %17, %22 : vector<8x128xf32>
    %c0_13 = arith.constant 0 : index
    %c0_14 = arith.constant 0 : index
    %24 = vector.load %arg6[%c0_13, %c0_14] : memref<8x128xf32, #tpu.memory_space<vmem>>, vector<8x128xf32>
    tpu.vector_store %arg6[%c0_13, %c0_14], %23 {strides = array<i32>} : memref<8x128xf32, #tpu.memory_space<vmem>>, vector<8x128xf32>,
    return
  }
  func.func @transform_0(%arg0: i32) -> (i32, i32) {
    %c0_i32 = arith.constant 0 : i32
    %c0_i32_0 = arith.constant 0 : i32
    return %arg0, %c0_i32 : i32, i32
  }
  func.func @transform_1(%arg0: i32) -> (i32, i32) {
    %c0_i32 = arith.constant 0 : i32
    %c0_i32_0 = arith.constant 0 : i32
    %c0_i32_1 = arith.constant 0 : i32
    return %c0_i32, %c0_i32_0 : i32, i32
  }
  func.func @transform_2(%arg0: i32) -> (i32, i32) {
    %c0_i32 = arith.constant 0 : i32
    %c0_i32_0 = arith.constant 0 : i32
    %c0_i32_1 = arith.constant 0 : i32
    return %c0_i32, %c0_i32_0 : i32, i32
  }
  func.func @transform_3(%arg0: i32) -> (i32, i32) {
    %c0_i32 = arith.constant 0 : i32
    %c0_i32_0 = arith.constant 0 : i32
    %c0_i32_1 = arith.constant 0 : i32
    return %c0_i32, %c0_i32_0 : i32, i32
  }
  func.func @transform_4(%arg0: i32) -> (i32, i32) {
    %c0_i32 = arith.constant 0 : i32
    %c0_i32_0 = arith.constant 0 : i32
    %c0_i32_1 = arith.constant 0 : i32
    return %c0_i32, %c0_i32_0 : i32, i32
  }
  func.func @transform_5(%arg0: i32) -> (i32, i32) {
    %c0_i32 = arith.constant 0 : i32
    %c0_i32_0 = arith.constant 0 : i32
    return %arg0, %c0_i32 : i32, i32
  }
}

</mosaic_0001>

<bundles_post_ra>
// kernel: clf_img_forward.2
= control target key start
LH: loop header
LB: loop body
LE: loop exit
PB: predicated region body
PF: predicated region fallthrough
CT: control target
= control target key end

     0   :  { %s5860_s21 = smov 0   ;;  %s7193_s0 = inlined_call_operand.vmem [shape: bf16[2,196,128], index: 0, kind: input, shape index: {}]   ;;  %s7194_s1 = inlined_call_operand.vmem [shape: bf16[128,128], index: 1, kind: input, shape index: {}]   ;;  %s7195_s2 = inlined_call_operand.vmem [shape: f32[1,128], index: 2, kind: input, shape index: {}]   ;;  %s7196_s3 = inlined_call_operand.vmem [shape: bf16[1024,196], index: 3, kind: input, shape index: {}]   ;;  %s7197_s4 = inlined_call_operand.vmem [shape: bf16[2048,128], index: 4, kind: input, shape index: {}]   ;;  %s7198_s5 = inlined_call_operand.vmem [shape: f32[1,128], index: 5, kind: input, shape index: {}]   ;;  %s7199_s6 = inlined_call_operand.vmem [shape: bf16[2,64,128], index: 6, kind: output, shape index: {}]  }
   0x1 LB: > { %s4403_s22 = sadd.s32 4294967295, %s5820_s21   ;;  %p4407_p0 = scmp.ge.s32.totalorder %s5820_s21, 1  ;;  %s5820_s21 = sphi %s5860_s21, %s16_s21  }
   0x2   : > { %p212_p1 = scmp.lt.s32.totalorder %s5820_s21, 3 }
   0x4   : > { %p213_p2 = pnand %p4407_p0, %p212_p1 }
   0x5   : > { %p242_p3 = scmp.lt.s32.totalorder (!%p213_p2), %s4403_s22, 1 }
   0x6   : > { %216 = sbr.rel (%p213_p2) target bundleno = 1271 (0x4f7), region = 44 }
   0xb   : > { %v5473_v0 = vld [vmem:[%s7194_s1 + $0x38] sm:$0xff]   ;;  %v5822_v1 = vmov 0.0   ;;  %v5474_v2 = vld [vmem:[%s7194_s1 + $0x30] sm:$0xff]   ;;  %vm5823_vm0 = vmmov 0   ;;  %s7201_s22 = smov (!%p242_p3, %s4403_s22), 1  ;;  %v5475_v3 = vld [vmem:[%s7194_s1 + $0x28] sm:$0xff]  }
   0xc   : > { %5009 = vmatprep.subr.bf16.mxu0 %v5822_v1  ;;  %5025 = vmatprep.mubr.msk.bf16.mxu0 %vm5823_vm0, %v5822_v1  ;;  %s5461_s29 = smul.u32 100, %s7201_s22  ;;  %v5476_v4 = vld [vmem:[%s7194_s1 + $0x20] sm:$0xff]   ;;  %v5477_v5 = vld [vmem:[%s7194_s1 + $0x18] sm:$0xff]   ;;  %v5478_v6 = vld [vmem:[%s7194_s1 + $0x10] sm:$0xff]   ;;  %v5824_v22 = vmov 0   ;;  %vm1303_vm1 = vcmask 556032  }
   0xd   : > { %5010 = vmatpush3.bf16.msra.mxu0 %v5473_v0  ;;  %v5479_v7 = vld [vmem:[%s7194_s1 + $0x8] sm:$0xff]   ;;  %v5480_v8 = vld [vmem:[%s7194_s1] sm:$0xff]   ;;  %1500 = vmatprep.subr.bf16.mxu1 %v5824_v22  ;;  %vm1496_vm2 = vcmask 1041408   ;;  %s4764_s7 = sshll.u32 %s7201_s22, 5 }
   0xe   : > { %5011 = vmatprep.subr.bf16.mxu0 %v5822_v1  ;;  %s5888_s8 = scalar_lea.vmem %s7193_s0, %s5461_s29  ;;  %v5496_v23 = vld [vmem:[%s7196_s3 + $0x4] ss:$8 sps:$4 sm:$0xff]   ;;  %v5955_v24 = vld [vmem:[%s7195_s2] ss:$0 sm:$0xff]  ;;  %s7177_s10 = scalar_lea.vmem %s7199_s6, %s4764_s7 }
   0xf   : > { %v5481_v9 = vld [vmem:[%s5888_s8] sm:$0xff]   ;;  %v5482_v10 = vld [vmem:[%s5888_s8 + $0x8] sm:$0xff]   ;;  %v5483_v11 = vld [vmem:[%s5888_s8 + $0x10] sm:$0xff]   ;;  %4561 = vmatprep.mubr.msk.bf16.mxu1 %vm1303_vm1, %v5496_v23 }
  0x10   : > { %v5484_v12 = vld [vmem:[%s5888_s8 + $0x18] sm:$0xff]   ;;  %v5485_v13 = vld [vmem:[%s5888_s8 + $0x20] sm:$0xff]   ;;  %v5486_v14 = vld [vmem:[%s5888_s8 + $0x28] sm:$0xff]  }
  0x11   : > { %5012 = vmatpush3.bf16.msra.mxu0 %v5474_v2  ;;  %v5487_v15 = vld [vmem:[%s5888_s8 + $0x30] sm:$0xff]   ;;  %v5488_v16 = vld [vmem:[%s5888_s8 + $0x38] sm:$0xff]   ;;  %v5489_v17 = vld [vmem:[%s5888_s8 + $0x40] sm:$0xff]  }
  0x12   : > { %5013 = vmatprep.subr.bf16.mxu0 %v5822_v1  ;;  %v5490_v18 = vld [vmem:[%s5888_s8 + $0x48] sm:$0xff]   ;;  %v5491_v19 = vld [vmem:[%s5888_s8 + $0x50] sm:$0xff]   ;;  %v5492_v20 = vld [vmem:[%s5888_s8 + $0x58] sm:$0xff]  }
  0x13   : > { %v5493_v21 = vld [vmem:[%s5888_s8 + $0x60] ss:$0 sps:$4 sm:$0x33]  }
  0x15   : > { %5014 = vmatpush3.bf16.msra.mxu0 %v5475_v3 }
  0x16   : > { %5015 = vmatprep.subr.bf16.mxu0 %v5822_v1 }
  0x19   : > { %5016 = vmatpush3.bf16.msra.mxu0 %v5476_v4 }
  0x1a   : > { %5017 = vmatprep.subr.bf16.mxu0 %v5822_v1 }
  0x1d   : > { %5018 = vmatpush3.bf16.msra.mxu0 %v5477_v5 }
  0x1e   : > { %5019 = vmatprep.subr.bf16.mxu0 %v5822_v1 }
  0x21   : > { %5020 = vmatpush3.bf16.msra.mxu0 %v5478_v6 }
  0x22   : > { %5021 = vmatprep.subr.bf16.mxu0 %v5822_v1 }
  0x25   : > { %5022 = vmatpush3.bf16.msra.mxu0 %v5479_v7 }
  0x26   : > { %5023 = vmatprep.subr.bf16.mxu0 %v5822_v1 }
  0x29   : > { %5024 = vmatpush3.bf16.msra.mxu0 %v5480_v8 }
  0x2c   : > { %5026 = vmatmul.mubr.bf16.vlgmr.msra.gmra.mxu0 %v5481_v9 }
  0x2d   : > { %5029 = vmatprep.mubr.msk.bf16.mxu0 %vm5823_vm0, %v5822_v1 }
  0x34   : > { %5030 = vmatmul.mubr.bf16.gmra.mxu0 %v5482_v10 }
  0x35   : > { %5033 = vmatprep.mubr.msk.bf16.mxu0 %vm5823_vm0, %v5822_v1 }
  0x3c   : > { %5034 = vmatmul.mubr.bf16.gmra.mxu0 %v5483_v11 }
  0x3d   : > { %5037 = vmatprep.mubr.msk.bf16.mxu0 %vm5823_vm0, %v5822_v1 }
  0x44   : > { %5038 = vmatmul.mubr.bf16.gmra.mxu0 %v5484_v12 }
  0x45   : > { %5041 = vmatprep.mubr.msk.bf16.mxu0 %vm5823_vm0, %v5822_v1 }
  0x4c   : > { %5042 = vmatmul.mubr.bf16.gmra.mxu0 %v5485_v13 }
  0x4d   : > { %5045 = vmatprep.mubr.msk.bf16.mxu0 %vm5823_vm0, %v5822_v1 }
  0x54   : > { %5046 = vmatmul.mubr.bf16.gmra.mxu0 %v5486_v14 }
  0x55   : > { %5049 = vmatprep.mubr.msk.bf16.mxu0 %vm5823_vm0, %v5822_v1 }
  0x5c   : > { %5050 = vmatmul.mubr.bf16.gmra.mxu0 %v5487_v15 }
  0x5d   : > { %5053 = vmatprep.mubr.msk.bf16.mxu0 %vm5823_vm0, %v5822_v1 }
  0x64   : > { %5054 = vmatmul.mubr.bf16.gmra.mxu0 %v5488_v16 }
  0x65   : > { %5057 = vmatprep.mubr.msk.bf16.mxu0 %vm5823_vm0, %v5822_v1 }
  0x6c   : > { %5058 = vmatmul.mubr.bf16.gmra.mxu0 %v5489_v17 }
  0x6d   : > { %5061 = vmatprep.mubr.msk.bf16.mxu0 %vm5823_vm0, %v5822_v1 }
  0x74   : > { %5062 = vmatmul.mubr.bf16.gmra.mxu0 %v5490_v18 }
  0x75   : > { %5065 = vmatprep.mubr.msk.bf16.mxu0 %vm5823_vm0, %v5822_v1 }
  0x7c   : > { %5066 = vmatmul.mubr.bf16.gmra.mxu0 %v5491_v19 }
  0x7d   : > { %5069 = vmatprep.mubr.msk.bf16.mxu0 %vm5823_vm0, %v5822_v1 }
  0x84   : > { %5070 = vmatmul.mubr.bf16.gmra.mxu0 %v5492_v20 }
  0x85   : > { %5073 = vmatprep.mubr.msk.bf16.mxu0 %vm5823_vm0, %v5822_v1 }
  0x8c   : > { %5074 = vmatmul.mubr.bf16.gmra.mxu0 %v5493_v21 }
  0xec   : > { %v459_v25 = vpop.f32.mrf.mxu0 }
  0xed   : > { %v460_v27 = vadd.f32 %v5955_v24, %v459_v25 }
  0xee   : > { %v5027_v26 = vpop.f32.mrf.mxu0 }
  0xef   : > { %v561_v31 = vmax.f32 %v460_v27, 0.0 }
  0xf0   : > { %v462_v28 = vpop.f32.mrf.mxu0 }
  0xf1   : > { %v463_v29 = vadd.f32 %v5955_v24, %v462_v28 }
  0xf2   : > { %v5028_v30 = vpop.f32.mrf.mxu0 }
  0xf3   : > { %v562_v32 = vmax.f32 %v463_v29, 0.0 }
  0xf4   : > { %v467_v33 = vpop.f32.mrf.mxu0 }
  0xf5   : > { %v5959_v34 = vpack.c.bf16 %v562_v32, %v561_v31  ;;  %v468_v36 = vadd.f32 %v5955_v24, %v467_v33 }
  0xf6   : > { %v5031_v35 = vpop.f32.mrf.mxu0 }
  0xf7   : > { %v563_v40 = vmax.f32 %v468_v36, 0.0 }
  0xf8   : > { %v470_v37 = vpop.f32.mrf.mxu0 }
  0xf9   : > { %v471_v38 = vadd.f32 %v5955_v24, %v470_v37 }
  0xfa   : > { %v5032_v39 = vpop.f32.mrf.mxu0 }
  0xfb   : > { %v564_v41 = vmax.f32 %v471_v38, 0.0 }
  0xfc   : > { %v5963_v42 = vpop.f32.mrf.mxu0 }
  0xfd   : > { %v5965_v43 = vpack.c.bf16 %v564_v41, %v563_v40  ;;  %v476_v38 = vadd.f32 %v5955_v24, %v5963_v42 }
  0xfe   : > { %v5035_v44 = vpop.f32.mrf.mxu0 }
 0x100   : > { %v478_v45 = vpop.f32.mrf.mxu0 }
 0x101   : > { %v479_v33 = vadd.f32 %v5955_v24, %v478_v45 }
 0x102   : > { %v5036_v46 = vpop.f32.mrf.mxu0 }
 0x103   : > { %v566_v41 = vmax.f32 %v479_v33, 0.0  ;;  %v5567_v33 = vld [vmem:[%s7197_s4 + $0x60] sm:$0xff]  }
 0x104   : > { %v483_v47 = vpop.f32.mrf.mxu0 }
 0x105   : > { %v484_v30 = vadd.f32 %v5955_v24, %v483_v47  ;;  %v565_v47 = vmax.f32 %v476_v38, 0.0  ;;  %v5521_v38 = vld [vmem:[%s7196_s3 + $0x94] ss:$8 sps:$4 sm:$0xff]  }
 0x106   : > { %v5039_v48 = vpop.f32.mrf.mxu0 }
 0x107   : > { %v567_v39 = vmax.f32 %v484_v30, 0.0  ;;  %v588_v45 = vpack.c.bf16 %v566_v41, %v565_v47  ;;  %v5514_v30 = vld [vmem:[%s7196_s3 + $0x60] ss:$8 sps:$4 sm:$0xff]   ;;  %v5524_v41 = vld [vmem:[%s7196_s3 + $0xa4] ss:$8 sps:$4 sm:$0xff]   ;;  %v5581_v47 = vld [vmem:[%s7197_s4 + $0x50] sm:$0xff]  }
 0x108   : > { %v486_v49 = vpop.f32.mrf.mxu0 }
 0x109   : > { %v487_v26 = vadd.f32 %v5955_v24, %v486_v49 }
 0x10a   : > { %v5040_v50 = vpop.f32.mrf.mxu0 }
 0x10b   : > { %v568_v35 = vmax.f32 %v487_v26, 0.0  ;;  %v5509_v26 = vld [vmem:[%s7196_s3 + $0x54] ss:$8 sps:$4 sm:$0xff]  }
 0x10c   : > { %v491_v51 = vpop.f32.mrf.mxu0 }
 0x10d   : > { %v492_v21 = vadd.f32 %v5955_v24, %v491_v51  ;;  %v589_v44 = vpack.c.bf16 %v568_v35, %v567_v39  ;;  %v5517_v35 = vld [vmem:[%s7196_s3 + $0x70] ss:$8 sps:$4 sm:$0xff]  }
 0x10e   : > { %v5043_v52 = vpop.f32.mrf.mxu0  ;;  %v5574_v39 = vld [vmem:[%s7197_s4 + $0x58] sm:$0xff]  }
 0x10f   : > { %v569_v31 = vmax.f32 %v492_v21, 0.0  ;;  %v5506_v21 = vld [vmem:[%s7196_s3 + $0x44] ss:$8 sps:$4 sm:$0xff]  }
 0x110   : > { %v494_v53 = vpop.f32.mrf.mxu0 }
 0x111   : > { %v495_v17 = vadd.f32 %v5955_v24, %v494_v53 }
 0x112   : > { %v5044_v54 = vpop.f32.mrf.mxu0 }
 0x113   : > { %v570_v27 = vmax.f32 %v495_v17, 0.0  ;;  %v5550_v17 = vld [vmem:[%s7197_s4 + $0x78] sm:$0xff]  }
 0x114   : > { %v499_v55 = vpop.f32.mrf.mxu0  ;;  %5077 = vmatprep.subr.bf16.mxu0 %v5550_v17 }
 0x115   : > { %v500_v14 = vadd.f32 %v5955_v24, %v499_v55  ;;  %v590_v36 = vpack.c.bf16 %v570_v27, %v569_v31  ;;  %5078 = vmatpush3.bf16.msra.mxu0 %v5550_v17  ;;  %v5511_v27 = vld [vmem:[%s7196_s3 + $0x50] ss:$8 sps:$4 sm:$0xff]   ;;  %v5515_v31 = vld [vmem:[%s7196_s3 + $0x74] ss:$8 sps:$4 sm:$0xff]  }
 0x116   : > { %v5047_v56 = vpop.f32.mrf.mxu0 }
 0x117   : > { %v571_v23 = vmax.f32 %v500_v14, 0.0 }
 0x118   : > { %v502_v57 = vpop.f32.mrf.mxu0 }
 0x119   : > { %v503_v10 = vadd.f32 %v5955_v24, %v502_v57 }
 0x11a   : > { %v5048_v58 = vpop.f32.mrf.mxu0 }
 0x11b   : > { %v572_v18 = vmax.f32 %v503_v10, 0.0 }
 0x11c   : > { %v507_v59 = vpop.f32.mrf.mxu0 }
 0x11d   : > { %v508_v6 = vadd.f32 %v5955_v24, %v507_v59  ;;  %v591_v28 = vpack.c.bf16 %v572_v18, %v571_v23  ;;  %v5502_v18 = vld [vmem:[%s7196_s3 + $0x20] ss:$8 sps:$4 sm:$0xff]   ;;  %v5555_v23 = vld [vmem:[%s7197_s4 + $0x70] sm:$0xff]  }
 0x11e   : > { %v5051_v60 = vpop.f32.mrf.mxu0  ;;  %5079 = vmatprep.subr.bf16.mxu0 %v5555_v23 }
 0x11f   : > { %v573_v15 = vmax.f32 %v508_v6, 0.0  ;;  %5080 = vmatpush3.bf16.msra.mxu0 %v5555_v23  ;;  %v5582_v23 = vld [vmem:[%s7196_s3 + $0x1b4] ss:$8 sps:$4 sm:$0xff]  }
 0x120   : > { %v510_v61 = vpop.f32.mrf.mxu0 }
 0x121   : > { %v511_v3 = vadd.f32 %v5955_v24, %v510_v61 }
 0x122   : > { %v5052_v62 = vpop.f32.mrf.mxu0 }
 0x123   : > { %v574_v11 = vmax.f32 %v511_v3, 0.0 }
 0x124   : > { %v515_v63 = vpop.f32.mrf.mxu0 }
 0x125   : > { %v516_v1 = vadd.f32 %v5955_v24, %v515_v63  ;;  %v592_v19 = vpack.c.bf16 %v574_v11, %v573_v15 }
 0x126   : > { %v5055_v0 = vpop.f32.mrf.mxu0 }
 0x127   : > { %v575_v7 = vmax.f32 %v516_v1, 0.0 }
 0x128   : > { %v518_v2 = vpop.f32.mrf.mxu0 }
 0x129   : > { %v519_v4 = vadd.f32 %v5955_v24, %v518_v2 }
 0x12a   : > { %v5056_v5 = vpop.f32.mrf.mxu0 }
 0x12b   : > { %v576_v8 = vmax.f32 %v519_v4, 0.0 }
 0x12c   : > { %v5971_v9 = vpop.f32.mrf.mxu0 }
 0x12d   : > { %v593_v12 = vpack.c.bf16 %v576_v8, %v575_v7  ;;  %v524_v10 = vadd.f32 %v5955_v24, %v5971_v9  ;;  %v5499_v9 = vld [vmem:[%s7196_s3 + $0x10] ss:$8 sps:$4 sm:$0xff]  }
 0x12e   : > { %v5059_v13 = vpop.f32.mrf.mxu0 }
 0x12f   : > { %1501 = vmatpush1.bf16.msra.mxu1 %v593_v12  ;;  %v577_v14 = vmax.f32 %v524_v10, 0.0  ;;  %v5571_v10 = vld [vmem:[%s7196_s3 + $0x184] ss:$8 sps:$4 sm:$0xff]  }
 0x130   : > { %v5975_v16 = vpop.f32.mrf.mxu0  ;;  %1502 = vmatprep.subr.bf16.mxu1 %v5824_v22 }
 0x131   : > { %v527_v6 = vadd.f32 %v5955_v24, %v5975_v16  ;;  %v5494_v16 = vld [vmem:[%s7196_s3] ss:$8 sps:$4 sm:$0xff]  }
 0x132   : > { %v5060_v20 = vpop.f32.mrf.mxu0 }
 0x133   : > { %1503 = vmatpush1.bf16.msra.mxu1 %v592_v19  ;;  %v578_v12 = vmax.f32 %v527_v6, 0.0  ;;  %v5503_v19 = vld [vmem:[%s7196_s3 + $0x34] ss:$8 sps:$4 sm:$0xff]   ;;  %v5505_v20 = vld [vmem:[%s7196_s3 + $0x30] ss:$8 sps:$4 sm:$0xff]  }
 0x134   : > { %v531_v25 = vpop.f32.mrf.mxu0  ;;  %1504 = vmatprep.subr.bf16.mxu1 %v5824_v22  ;;  %v5565_v6 = vld [vmem:[%s7196_s3 + $0x160] ss:$8 sps:$4 sm:$0xff]  }
 0x135   : > { %v532_v4 = vadd.f32 %v5955_v24, %v531_v25  ;;  %v594_v15 = vpack.c.bf16 %v578_v12, %v577_v14  ;;  %v5508_v25 = vld [vmem:[%s7196_s3 + $0x40] ss:$8 sps:$4 sm:$0xff]  }
 0x136   : > { %v5063_v29 = vpop.f32.mrf.mxu0  ;;  %v5573_v12 = vld [vmem:[%s7196_s3 + $0x180] ss:$8 sps:$4 sm:$0xff]  }
 0x137   : > { %1505 = vmatpush1.bf16.msra.mxu1 %v591_v28  ;;  %v579_v11 = vmax.f32 %v532_v4, 0.0  ;;  %v5512_v28 = vld [vmem:[%s7196_s3 + $0x64] ss:$8 sps:$4 sm:$0xff]   ;;  %v5561_v4 = vld [vmem:[%s7196_s3 + $0x150] ss:$8 sps:$4 sm:$0xff]  }
 0x138   : > { %v534_v32 = vpop.f32.mrf.mxu0  ;;  %1506 = vmatprep.subr.bf16.mxu1 %v5824_v22  ;;  %v5562_v29 = vld [vmem:[%s7197_s4 + $0x68] sm:$0xff]  }
 0x139   : > { %v535_v1 = vadd.f32 %v5955_v24, %v534_v32  ;;  %5081 = vmatprep.subr.bf16.mxu0 %v5562_v29  ;;  %v5566_v32 = vld [vmem:[%s7197_s4 + $0x3b8] sm:$0xff]  }
 0x13a   : > { %v5064_v37 = vpop.f32.mrf.mxu0  ;;  %5082 = vmatpush3.bf16.msra.mxu0 %v5562_v29  ;;  %v5584_v29 = vld [vmem:[%s7196_s3 + $0x1b0] ss:$8 sps:$4 sm:$0xff]  }
 0x13b   : > { %1507 = vmatpush1.bf16.msra.mxu1 %v590_v36  ;;  %v580_v7 = vmax.f32 %v535_v1, 0.0  ;;  %5083 = vmatprep.subr.bf16.mxu0 %v5567_v33  ;;  %v5518_v36 = vld [vmem:[%s7196_s3 + $0x84] ss:$8 sps:$4 sm:$0xff]   ;;  %v5520_v37 = vld [vmem:[%s7196_s3 + $0x80] ss:$8 sps:$4 sm:$0xff]  }
 0x13c   : > { %v539_v40 = vpop.f32.mrf.mxu0  ;;  %1508 = vmatprep.subr.bf16.mxu1 %v5824_v22  ;;  %v5556_v1 = vld [vmem:[%s7196_s3 + $0x144] ss:$8 sps:$4 sm:$0xff]  }
 0x13d   : > { %v595_v13 = vpack.c.bf16 %v580_v7, %v579_v11  ;;  %v5568_v7 = vld [vmem:[%s7196_s3 + $0x174] ss:$8 sps:$4 sm:$0xff]   ;;  %v5639_v11 = vld [vmem:[%s7197_s4 + $0x3a8] sm:$0xff]  }
 0x13e   : > { %v5067_v46 = vpop.f32.mrf.mxu0  ;;  %5084 = vmatpush3.bf16.msra.mxu0 %v5567_v33 }
 0x13f   : > { %1509 = vmatpush1.bf16.msra.mxu1 %v589_v44  ;;  %5085 = vmatprep.subr.bf16.mxu0 %v5574_v39  ;;  %v5526_v44 = vld [vmem:[%s7196_s3 + $0xa0] ss:$8 sps:$4 sm:$0xff]   ;;  %v5527_v46 = vld [vmem:[%s7196_s3 + $0xb4] ss:$8 sps:$4 sm:$0xff]  }
 0x140   : > { %v542_v48 = vpop.f32.mrf.mxu0  ;;  %1510 = vmatprep.subr.bf16.mxu1 %v5824_v22 }
 0x141   : > { %v543_v60 = vadd.f32 %v5955_v24, %v542_v48  ;;  %v5529_v48 = vld [vmem:[%s7196_s3 + $0xb0] ss:$8 sps:$4 sm:$0xff]  }
 0x142   : > { %v5068_v49 = vpop.f32.mrf.mxu0  ;;  %5086 = vmatpush3.bf16.msra.mxu0 %v5574_v39 }
 0x143   : > { %1511 = vmatpush1.bf16.msra.mxu1 %v588_v45  ;;  %v582_v2 = vmax.f32 %v543_v60, 0.0  ;;  %5087 = vmatprep.subr.bf16.mxu0 %v5581_v47  ;;  %v5530_v45 = vld [vmem:[%s7196_s3 + $0xc4] ss:$8 sps:$4 sm:$0xff]   ;;  %v5532_v49 = vld [vmem:[%s7196_s3 + $0xc0] ss:$8 sps:$4 sm:$0xff]  }
 0x144   : > { %v547_v50 = vpop.f32.mrf.mxu0  ;;  %1512 = vmatprep.subr.bf16.mxu1 %v5824_v22  ;;  %v5545_v60 = vld [vmem:[%s7196_s3 + $0x114] ss:$8 sps:$4 sm:$0xff]  }
 0x145   : > { %v548_v58 = vadd.f32 %v5955_v24, %v547_v50  ;;  %v5533_v50 = vld [vmem:[%s7196_s3 + $0xd4] ss:$8 sps:$4 sm:$0xff]  }
 0x146   : > { %v5071_v42 = vpop.f32.mrf.mxu0  ;;  %5088 = vmatpush3.bf16.msra.mxu0 %v5581_v47  ;;  %v5594_v47 = vld [vmem:[%s7196_s3 + $0x1e4] ss:$8 sps:$4 sm:$0xff]  }
 0x147   : > { %1513 = vmatpush1.bf16.msra.mxu1 %v5965_v43  ;;  %v583_v0 = vmax.f32 %v548_v58, 0.0  ;;  %v5585_v42 = vld [vmem:[%s7197_s4 + $0x48] sm:$0xff]  }
 0x148   : > { %v550_v51 = vpop.f32.mrf.mxu0  ;;  %1514 = vmatprep.subr.bf16.mxu1 %v5824_v22  ;;  %5089 = vmatprep.subr.bf16.mxu0 %v5585_v42  ;;  %v5542_v58 = vld [vmem:[%s7196_s3 + $0x104] ss:$8 sps:$4 sm:$0xff]  }
 0x149   : > { %v551_v55 = vadd.f32 %v5955_v24, %v550_v51  ;;  %v5535_v51 = vld [vmem:[%s7196_s3 + $0xd0] ss:$8 sps:$4 sm:$0xff]  }
 0x14a   : > { %v5072_v52 = vpop.f32.mrf.mxu0  ;;  %5090 = vmatpush3.bf16.msra.mxu0 %v5585_v42  ;;  %v5596_v42 = vld [vmem:[%s7196_s3 + $0x1e0] ss:$8 sps:$4 sm:$0xff]  }
 0x14b   : > { %1515 = vmatpush1.bf16.msra.mxu1 %v5959_v34  ;;  %v584_v61 = vmax.f32 %v551_v55, 0.0  ;;  %v540_v34 = vadd.f32 %v5955_v24, %v539_v40  ;;  %v5523_v40 = vld [vmem:[%s7196_s3 + $0x90] ss:$8 sps:$4 sm:$0xff]   ;;  %v5536_v52 = vld [vmem:[%s7196_s3 + $0xe4] ss:$8 sps:$4 sm:$0xff]  }
 0x14c   : > { %v555_v53 = vpop.f32.mrf.mxu0  ;;  %1522 = vmatprep.subr.bf16.mxu1 %v5824_v22  ;;  %v6140_v55 = vld [vmem:[%s7197_s4 + $0x38] sm:$0xff]  }
 0x14d   : > { %v556_v54 = vadd.f32 %v5955_v24, %v555_v53  ;;  %v597_v3 = vpack.c.bf16 %v584_v61, %v583_v0  ;;  %v581_v5 = vmax.f32 %v540_v34, 0.0  ;;  %v5497_v24 = vld [vmem:[%s7196_s3 + $0x14] ss:$8 sps:$4 sm:$0xff]   ;;  %v5592_v53 = vld [vmem:[%s7197_s4 + $0x40] sm:$0xff]   ;;  %v5547_v61 = vld [vmem:[%s7196_s3 + $0x110] ss:$8 sps:$4 sm:$0xff]  }
 0x14e   : > { %v5075_v56 = vpop.f32.mrf.mxu0  ;;  %5091 = vmatprep.subr.bf16.mxu0 %v5592_v53  ;;  %v5552_v34 = vld [vmem:[%s7196_s3 + $0x134] ss:$8 sps:$4 sm:$0xff]   ;;  %v5554_v0 = vld [vmem:[%s7196_s3 + $0x130] ss:$8 sps:$4 sm:$0xff]  }
 0x14f   : > { %v585_v57 = vmax.f32 %v556_v54, 0.0  ;;  %v596_v8 = vpack.c.bf16 %v582_v2, %v581_v5  ;;  %5092 = vmatpush3.bf16.msra.mxu0 %v5592_v53  ;;  %v5538_v54 = vld [vmem:[%s7196_s3 + $0xe0] ss:$8 sps:$4 sm:$0xff]   ;;  %v5539_v56 = vld [vmem:[%s7196_s3 + $0xf4] ss:$8 sps:$4 sm:$0xff]  }
 0x150   : > { %v558_v59 = vpop.f32.mrf.mxu0  ;;  %5101 = vmatprep.subr.bf16.mxu0 %v6140_v55  ;;  %v5558_v2 = vld [vmem:[%s7196_s3 + $0x140] ss:$8 sps:$4 sm:$0xff]   ;;  %v5563_v5 = vld [vmem:[%s7196_s3 + $0x164] ss:$8 sps:$4 sm:$0xff]   ;;  %v5600_v53 = vld [vmem:[%s7196_s3 + $0x1f4] ss:$8 sps:$4 sm:$0xff]  }
 0x151   : > { %v598_v43 = vpack.c.bf16 %v585_v57, %v585_v57  ;;  %v5541_v57 = vld [vmem:[%s7196_s3 + $0xf0] ss:$8 sps:$4 sm:$0xff]  }
 0x152   : > { %v5076_v62 = vpop.f32.mrf.mxu0  ;;  %v5598_v59 = vld [vmem:[%s7197_s4 + $0x3b0] sm:$0xff]  }
 0x153   : > { %v1498_v63 = vsel %vm1496_vm2, %v598_v43, 0  ;;  %v5544_v43 = vld [vmem:[%s7196_s3 + $0x100] ss:$8 sps:$4 sm:$0xff]   ;;  %v5548_v62 = vld [vmem:[%s7196_s3 + $0x124] ss:$8 sps:$4 sm:$0xff]  }
 0x154   : > { %1523 = vmatpush2.bf16.msra.mxu1 %v1498_v63  ;;  %v5551_v63 = vld [vmem:[%s7196_s3 + $0x120] ss:$8 sps:$4 sm:$0xff]  }
 0x155   : > { %1524 = vmatprep.subr.bf16.mxu1 %v5824_v22 }
 0x158   : > { %1525 = vmatpush2.bf16.msra.mxu1 %v597_v3  ;;  %v5559_v3 = vld [vmem:[%s7196_s3 + $0x154] ss:$8 sps:$4 sm:$0xff]  }
 0x159   : > { %1526 = vmatprep.subr.bf16.mxu1 %v5824_v22 }
 0x15c   : > { %1527 = vmatpush2.bf16.msra.mxu1 %v596_v8  ;;  %v5570_v8 = vld [vmem:[%s7196_s3 + $0x170] ss:$8 sps:$4 sm:$0xff]  }
 0x15d   : > { %1528 = vmatprep.subr.bf16.mxu1 %v5824_v22 }
 0x160   : > { %1529 = vmatpush2.bf16.msra.mxu1 %v595_v13  ;;  %v5575_v13 = vld [vmem:[%s7196_s3 + $0x194] ss:$8 sps:$4 sm:$0xff]  }
 0x161   : > { %1530 = vmatprep.subr.bf16.mxu1 %v5824_v22  ;;  %v5500_v22 = vld [vmem:[%s7196_s3 + $0x24] ss:$8 sps:$4 sm:$0xff]  }
 0x164   : > { %1531 = vmatpush2.bf16.msra.mxu1 %v594_v15 }
 0x165   : > { %5413 = vmatprep.subr.bf16.mxu1 %v5566_v32 }
 0x167   : > { %1533 = vmatmul.mubr.bf16.vlgmr.msra.gmra.mxu1 %v5494_v16 }
 0x168   : > { %4562 = vmatprep.mubr.msk.bf16.mxu1 %vm1303_vm1, %v5497_v24  ;;  %5414 = vmatpush3.bf16.msra.mxu1 %v5566_v32  ;;  %v5577_v24 = vld [vmem:[%s7196_s3 + $0x190] ss:$8 sps:$4 sm:$0xff]  }
 0x169   : > { %5415 = vmatprep.subr.bf16.mxu1 %v5598_v59 }
 0x16c   : > { %5416 = vmatpush3.bf16.msra.mxu1 %v5598_v59 }
 0x16d   : > { %5417 = vmatprep.subr.bf16.mxu1 %v5639_v11 }
 0x16f   : > { %1541 = vmatmul.mubr.bf16.gmra.mxu1 %v5499_v9  ;;  %v5578_v9 = vld [vmem:[%s7196_s3 + $0x1a4] ss:$8 sps:$4 sm:$0xff]  }
 0x170   : > { %4563 = vmatprep.mubr.msk.bf16.mxu1 %vm1303_vm1, %v5500_v22  ;;  %5418 = vmatpush3.bf16.msra.mxu1 %v5639_v11  ;;  %v5609_v11 = vld [vmem:[%s7197_s4 + $0x8] sm:$0xff]  }
 0x177   : > { %1549 = vmatmul.mubr.bf16.gmra.mxu1 %v5502_v18 }
 0x178   : > { %4564 = vmatprep.mubr.msk.bf16.mxu1 %vm1303_vm1, %v5503_v19 }
 0x17f   : > { %1557 = vmatmul.mubr.bf16.gmra.mxu1 %v5505_v20  ;;  %v5580_v20 = vld [vmem:[%s7196_s3 + $0x1a0] ss:$8 sps:$4 sm:$0xff]  }
 0x180   : > { %4565 = vmatprep.mubr.msk.bf16.mxu1 %vm1303_vm1, %v5506_v21 }
 0x187   : > { %1565 = vmatmul.mubr.bf16.gmra.mxu1 %v5508_v25 }
 0x188   : > { %4566 = vmatprep.mubr.msk.bf16.mxu1 %vm1303_vm1, %v5509_v26 }
 0x18f   : > { %1573 = vmatmul.mubr.bf16.gmra.mxu1 %v5511_v27 }
 0x190   : > { %4567 = vmatprep.mubr.msk.bf16.mxu1 %vm1303_vm1, %v5512_v28 }
 0x197   : > { %1581 = vmatmul.mubr.bf16.gmra.mxu1 %v5514_v30  ;;  %v5586_v30 = vld [vmem:[%s7196_s3 + $0x1c4] ss:$8 sps:$4 sm:$0xff]  }
 0x198   : > { %4568 = vmatprep.mubr.msk.bf16.mxu1 %vm1303_vm1, %v5515_v31 }
 0x19f   : > { %1589 = vmatmul.mubr.bf16.gmra.mxu1 %v5517_v35 }
 0x1a0   : > { %4569 = vmatprep.mubr.msk.bf16.mxu1 %vm1303_vm1, %v5518_v36  ;;  %v5588_v36 = vld [vmem:[%s7196_s3 + $0x1c0] ss:$8 sps:$4 sm:$0xff]  }
 0x1a7   : > { %1597 = vmatmul.mubr.bf16.gmra.mxu1 %v5520_v37  ;;  %v5589_v37 = vld [vmem:[%s7196_s3 + $0x1d4] ss:$8 sps:$4 sm:$0xff]  }
 0x1a8   : > { %4570 = vmatprep.mubr.msk.bf16.mxu1 %vm1303_vm1, %v5521_v38 }
 0x1af   : > { %1605 = vmatmul.mubr.bf16.gmra.mxu1 %v5523_v40 }
 0x1b0   : > { %4571 = vmatprep.mubr.msk.bf16.mxu1 %vm1303_vm1, %v5524_v41 }
 0x1b7   : > { %1613 = vmatmul.mubr.bf16.gmra.mxu1 %v5526_v44  ;;  %v5591_v44 = vld [vmem:[%s7196_s3 + $0x1d0] ss:$8 sps:$4 sm:$0xff]  }
 0x1b8   : > { %4572 = vmatprep.mubr.msk.bf16.mxu1 %vm1303_vm1, %v5527_v46 }
 0x1bf   : > { %1621 = vmatmul.mubr.bf16.gmra.mxu1 %v5529_v48 }
 0x1c0   : > { %4573 = vmatprep.mubr.msk.bf16.mxu1 %vm1303_vm1, %v5530_v45 }
 0x1c7   : > { %1629 = vmatmul.mubr.bf16.gmra.mxu1 %v5532_v49 }
 0x1c8   : > { %4574 = vmatprep.mubr.msk.bf16.mxu1 %vm1303_vm1, %v5533_v50 }
 0x1cf   : > { %1637 = vmatmul.mubr.bf16.gmra.mxu1 %v5535_v51 }
 0x1d0   : > { %4575 = vmatprep.mubr.msk.bf16.mxu1 %vm1303_vm1, %v5536_v52  ;;  %v5597_v52 = vld [vmem:[%s7197_s4 + $0x30] sm:$0xff]  }
 0x1d7   : > { %1645 = vmatmul.mubr.bf16.gmra.mxu1 %v5538_v54 }
 0x1d8   : > { %4576 = vmatprep.mubr.msk.bf16.mxu1 %vm1303_vm1, %v5539_v56 }
 0x1df   : > { %1653 = vmatmul.mubr.bf16.gmra.mxu1 %v5541_v57  ;;  %v5599_v57 = vld [vmem:[%s7197_s4 + $0x28] sm:$0xff]  }
 0x1e0   : > { %4577 = vmatprep.mubr.msk.bf16.mxu1 %vm1303_vm1, %v5542_v58 }
 0x1e7   : > { %1661 = vmatmul.mubr.bf16.gmra.mxu1 %v5544_v43  ;;  %v5602_v43 = vld [vmem:[%s7196_s3 + $0x1f0] ss:$8 sps:$4 sm:$0xff]  }
 0x1e8   : > { %4578 = vmatprep.mubr.msk.bf16.mxu1 %vm1303_vm1, %v5545_v60 }
 0x1ef   : > { %1669 = vmatmul.mubr.bf16.gmra.mxu1 %v5547_v61  ;;  %v5605_v61 = vld [vmem:[%s7196_s3 + $0x204] ss:$8 sps:$4 sm:$0xff]  }
 0x1f0   : > { %4579 = vmatprep.mubr.msk.bf16.mxu1 %vm1303_vm1, %v5548_v62  ;;  %v5680_v62 = vld [vmem:[%s7197_s4 + $0x3a0] sm:$0xff]  }
 0x1f1   : > { %5419 = vmatprep.subr.bf16.mxu1 %v5680_v62 }
 0x1f2   : > { %5420 = vmatpush3.bf16.msra.mxu1 %v5680_v62  ;;  %v5641_v62 = vld [vmem:[%s7196_s3 + $0x274] ss:$8 sps:$4 sm:$0xff]  }
 0x1f7   : > { %1677 = vmatmul.mubr.bf16.gmra.mxu1 %v5551_v63 }
 0x1f8   : > { %4580 = vmatprep.mubr.msk.bf16.mxu1 %vm1303_vm1, %v5552_v34 }
 0x1ff   : > { %1685 = vmatmul.mubr.bf16.gmra.mxu1 %v5554_v0  ;;  %v5604_v0 = vld [vmem:[%s7197_s4 + $0x18] sm:$0xff]  }
 0x200   : > { %4581 = vmatprep.mubr.msk.bf16.mxu1 %vm1303_vm1, %v5556_v1 }
 0x207   : > { %1693 = vmatmul.mubr.bf16.gmra.mxu1 %v5558_v2 }
 0x208   : > { %4582 = vmatprep.mubr.msk.bf16.mxu1 %vm1303_vm1, %v5559_v3  ;;  %v5607_v3 = vld [vmem:[%s7196_s3 + $0x200] ss:$8 sps:$4 sm:$0xff]  }
 0x20f   : > { %1701 = vmatmul.mubr.bf16.gmra.mxu1 %v5561_v4 }
 0x210   : > { %4583 = vmatprep.mubr.msk.bf16.mxu1 %vm1303_vm1, %v5563_v5  ;;  %v5608_v5 = vld [vmem:[%s7197_s4 + $0x10] sm:$0xff]  }
 0x217   : > { %1709 = vmatmul.mubr.bf16.gmra.mxu1 %v5565_v6 }
 0x218   : > { %4584 = vmatprep.mubr.msk.bf16.mxu1 %vm1303_vm1, %v5568_v7  ;;  %v5610_v7 = vld [vmem:[%s7196_s3 + $0x214] ss:$8 sps:$4 sm:$0xff]  }
 0x21f   : > { %1717 = vmatmul.mubr.bf16.gmra.mxu1 %v5570_v8 }
 0x220   : > { %4585 = vmatprep.mubr.msk.bf16.mxu1 %vm1303_vm1, %v5571_v10 }
 0x227   : > { %v6222_v14 = vpop.f32.mrf.mxu1  ;;  %1725 = vmatmul.mubr.bf16.gmra.mxu1 %v5573_v12 }
 0x228   : > { %4586 = vmatprep.mubr.msk.bf16.mxu1 %vm1303_vm1, %v5575_v13 }
 0x229   : > { %v1536_v15 = vpop.f32.mrf.mxu1 }
 0x22a   : > { %v5612_v15 = vld [vmem:[%s7196_s3 + $0x210] ss:$8 sps:$4 sm:$0xff]  }
 0x22b   : > { %v6225_v16 = vpop.f32.mrf.mxu1 }
 0x22c   : > { %v2045_v8 = vpack.c.bf16 %v6225_v16, %v6222_v14  ;;  %v5613_v14 = vld [vmem:[%s7197_s4] sm:$0xff]  }
 0x22d   : > { %v1539_v22 = vpop.f32.mrf.mxu1  ;;  %v5615_v16 = vld [vmem:[%s7196_s3 + $0x224] ss:$8 sps:$4 sm:$0xff]  }
 0x22e   : > { %v5614_v22 = vld [vmem:[%s7197_s4 + $0xb8] sm:$0xff]  }
 0x22f   : > { %v6233_v17 = vpop.f32.mrf.mxu1  ;;  %1733 = vmatmul.mubr.bf16.gmra.mxu1 %v5577_v24 }
 0x230   : > { %4587 = vmatprep.mubr.msk.bf16.mxu1 %vm1303_vm1, %v5578_v9 }
 0x231   : > { %v1544_v18 = vpop.f32.mrf.mxu1 }
 0x233   : > { %v6236_v19 = vpop.f32.mrf.mxu1 }
 0x234   : > { %v2046_v21 = vpack.c.bf16 %v6236_v19, %v6233_v17  ;;  %v5622_v17 = vld [vmem:[%s7196_s3 + $0x230] ss:$8 sps:$4 sm:$0xff]   ;;  %v5623_v19 = vld [vmem:[%s7197_s4 + $0xa0] sm:$0xff]  }
 0x235   : > { %v1547_v25 = vpop.f32.mrf.mxu1 }
 0x236   : > { %v5618_v25 = vld [vmem:[%s7197_s4 + $0xb0] sm:$0xff]  }
 0x237   : > { %v6246_v26 = vpop.f32.mrf.mxu1  ;;  %1741 = vmatmul.mubr.bf16.gmra.mxu1 %v5580_v20 }
 0x238   : > { %4588 = vmatprep.mubr.msk.bf16.mxu1 %vm1303_vm1, %v5582_v23  ;;  %v5617_v23 = vld [vmem:[%s7196_s3 + $0x220] ss:$8 sps:$4 sm:$0xff]  }
 0x239   : > { %v1552_v27 = vpop.f32.mrf.mxu1 }
 0x23b   : > { %v6249_v28 = vpop.f32.mrf.mxu1 }
 0x23c   : > { %v2047_v27 = vpack.c.bf16 %v6249_v28, %v6246_v26 }
 0x23d   : > { %v1555_v31 = vpop.f32.mrf.mxu1 }
 0x23f   : > { %v6257_v32 = vpop.f32.mrf.mxu1  ;;  %1749 = vmatmul.mubr.bf16.gmra.mxu1 %v5584_v29 }
 0x240   : > { %4589 = vmatprep.mubr.msk.bf16.mxu1 %vm1303_vm1, %v5586_v30  ;;  %v5620_v30 = vld [vmem:[%s7196_s3 + $0x234] ss:$8 sps:$4 sm:$0xff]  }
 0x241   : > { %v1560_v33 = vpop.f32.mrf.mxu1 }
 0x242   : > { %v5619_v33 = vld [vmem:[%s7197_s4 + $0xa8] sm:$0xff]  }
 0x243   : > { %v6260_v35 = vpop.f32.mrf.mxu1 }
 0x244   : > { %v2048_v28 = vpack.c.bf16 %v6260_v35, %v6257_v32  ;;  %v5624_v32 = vld [vmem:[%s7197_s4 + $0x98] sm:$0xff]  }
 0x245   : > { %v1563_v38 = vpop.f32.mrf.mxu1 }
 0x246   : > { %v5625_v38 = vld [vmem:[%s7196_s3 + $0x244] ss:$8 sps:$4 sm:$0xff]  }
 0x247   : > { %v1566_v39 = vpop.f32.mrf.mxu1  ;;  %1757 = vmatmul.mubr.bf16.gmra.mxu1 %v5588_v36 }
 0x248   : > { %4590 = vmatprep.mubr.msk.bf16.mxu1 %vm1303_vm1, %v5589_v37 }
 0x249   : > { %v1568_v40 = vpop.f32.mrf.mxu1 }
 0x24b   : > { %v1569_v41 = vpop.f32.mrf.mxu1 }
 0x24c   : > { %v2049_v46 = vpack.c.bf16 %v1569_v41, %v1566_v39  ;;  %v5627_v41 = vld [vmem:[%s7196_s3 + $0x240] ss:$8 sps:$4 sm:$0xff]  }
 0x24d   : > { %v1571_v48 = vpop.f32.mrf.mxu1 }
 0x24e   : > { %5093 = vmatprep.mubr.bf16.mxu0 %v2049_v46 }
 0x24f   : > { %v1574_v45 = vpop.f32.mrf.mxu1  ;;  %1765 = vmatmul.mubr.bf16.gmra.mxu1 %v5591_v44  ;;  %v5628_v44 = vld [vmem:[%s7197_s4 + $0x90] sm:$0xff]  }
 0x250   : > { %4591 = vmatprep.mubr.msk.bf16.mxu1 %vm1303_vm1, %v5594_v47  ;;  %v5630_v47 = vld [vmem:[%s7196_s3 + $0x254] ss:$8 sps:$4 sm:$0xff]  }
 0x251   : > { %v1576_v49 = vpop.f32.mrf.mxu1 }
 0x253   : > { %v1577_v50 = vpop.f32.mrf.mxu1 }
 0x254   : > { %v2050_v51 = vpack.c.bf16 %v1577_v50, %v1574_v45  ;;  %v5629_v45 = vld [vmem:[%s7197_s4 + $0x88] sm:$0xff]  }
 0x255   : > { %v1579_v54 = vpop.f32.mrf.mxu1 }
 0x256   : > { %5094 = vmatmul.mubr.bf16.vlgmr.msra.gmra.mxu0 %v2050_v51  ;;  %v5633_v51 = vld [vmem:[%s7197_s4 + $0x80] sm:$0xff]  }
 0x257   : > { %5102 = vmatpush3.bf16.msra.mxu0 %v6140_v55  ;;  %v1582_v56 = vpop.f32.mrf.mxu1  ;;  %1773 = vmatmul.mubr.bf16.gmra.mxu1 %v5596_v42  ;;  %v5603_v55 = vld [vmem:[%s7197_s4 + $0x20] sm:$0xff]   ;;  %v5632_v42 = vld [vmem:[%s7196_s3 + $0x250] ss:$8 sps:$4 sm:$0xff]  }
 0x258   : > { %5103 = vmatprep.subr.bf16.mxu0 %v5597_v52  ;;  %4592 = vmatprep.mubr.msk.bf16.mxu1 %vm1303_vm1, %v5600_v53  ;;  %v5635_v53 = vld [vmem:[%s7196_s3 + $0x264] ss:$8 sps:$4 sm:$0xff]  }
 0x259   : > { %v1584_v58 = vpop.f32.mrf.mxu1 }
 0x25b   : > { %5104 = vmatpush3.bf16.msra.mxu0 %v5597_v52  ;;  %v1585_v59 = vpop.f32.mrf.mxu1 }
 0x25c   : > { %v2051_v60 = vpack.c.bf16 %v1585_v59, %v1582_v56  ;;  %5105 = vmatprep.subr.bf16.mxu0 %v5599_v57  ;;  %v5634_v56 = vld [vmem:[%s7197_s4 + $0xf8] sm:$0xff]  }
 0x25d   : > { %v1587_v63 = vpop.f32.mrf.mxu1 }
 0x25e   : > { %5097 = vmatprep.mubr.bf16.mxu0 %v2051_v60  ;;  %v5638_v60 = vld [vmem:[%s7197_s4 + $0xf0] sm:$0xff]  }
 0x25f   : > { %5106 = vmatpush3.bf16.msra.mxu0 %v5599_v57  ;;  %v1590_v34 = vpop.f32.mrf.mxu1  ;;  %1781 = vmatmul.mubr.bf16.gmra.mxu1 %v5602_v43  ;;  %v5637_v43 = vld [vmem:[%s7196_s3 + $0x260] ss:$8 sps:$4 sm:$0xff]  }
 0x260   : > { %5107 = vmatprep.subr.bf16.mxu0 %v5603_v55  ;;  %4593 = vmatprep.mubr.msk.bf16.mxu1 %vm1303_vm1, %v5605_v61 }
 0x261   : > { %v1592_v1 = vpop.f32.mrf.mxu1 }
 0x263   : > { %5108 = vmatpush3.bf16.msra.mxu0 %v5603_v55  ;;  %v1593_v2 = vpop.f32.mrf.mxu1 }
 0x264   : > { %v2052_v4 = vpack.c.bf16 %v1593_v2, %v1590_v34  ;;  %5109 = vmatprep.subr.bf16.mxu0 %v5604_v0  ;;  %v5640_v34 = vld [vmem:[%s7197_s4 + $0xe8] sm:$0xff]  }
 0x265   : > { %v1595_v6 = vpop.f32.mrf.mxu1 }
 0x266   : > { %5098 = vmatmul.mubr.bf16.gmra.mxu0 %v2052_v4  ;;  %v5644_v4 = vld [vmem:[%s7197_s4 + $0xe0] sm:$0xff]  }
 0x267   : > { %5110 = vmatpush3.bf16.msra.mxu0 %v5604_v0  ;;  %v1598_v10 = vpop.f32.mrf.mxu1  ;;  %1789 = vmatmul.mubr.bf16.gmra.mxu1 %v5607_v3  ;;  %v5643_v3 = vld [vmem:[%s7196_s3 + $0x270] ss:$8 sps:$4 sm:$0xff]  }
 0x268   : > { %5117 = vmatprep.mubr.bf16.mxu0 %v2045_v8  ;;  %5111 = vmatprep.subr.bf16.mxu0 %v5608_v5  ;;  %v5646_v8 = vld [vmem:[%s7196_s3 + $0x284] ss:$8 sps:$4 sm:$0xff]  }
 0x269   : > { %v1600_v12 = vpop.f32.mrf.mxu1  ;;  %4594 = vmatprep.mubr.msk.bf16.mxu1 %vm1303_vm1, %v5610_v7 }
 0x26b   : > { %5112 = vmatpush3.bf16.msra.mxu0 %v5608_v5  ;;  %v1601_v13 = vpop.f32.mrf.mxu1  ;;  %v5721_v5 = vld [vmem:[%s7197_s4 + $0x398] sm:$0xff]  }
 0x26c   : > { %5113 = vmatprep.subr.bf16.mxu0 %v5609_v11  ;;  %5421 = vmatprep.subr.bf16.mxu1 %v5721_v5 }
 0x26d   : > { %v1603_v24 = vpop.f32.mrf.mxu1  ;;  %5422 = vmatpush3.bf16.msra.mxu1 %v5721_v5 }
 0x26e   : > { %v5651_v24 = vld [vmem:[%s7196_s3 + $0x294] ss:$8 sps:$4 sm:$0xff]  }
 0x26f   : > { %5114 = vmatpush3.bf16.msra.mxu0 %v5609_v11  ;;  %v6330_v9 = vpop.f32.mrf.mxu1  ;;  %1797 = vmatmul.mubr.bf16.gmra.mxu1 %v5612_v15  ;;  %v5645_v11 = vld [vmem:[%s7197_s4 + $0xd8] sm:$0xff]   ;;  %v5648_v15 = vld [vmem:[%s7196_s3 + $0x280] ss:$8 sps:$4 sm:$0xff]  }
 0x270   : > { %5115 = vmatprep.subr.bf16.mxu0 %v5613_v14  ;;  %4595 = vmatprep.mubr.msk.bf16.mxu1 %vm1303_vm1, %v5615_v16 }
 0x271   : > { %v1608_v18 = vpop.f32.mrf.mxu1 }
 0x273   : > { %5116 = vmatpush3.bf16.msra.mxu0 %v5613_v14  ;;  %v6336_v20 = vpop.f32.mrf.mxu1  ;;  %v5649_v14 = vld [vmem:[%s7197_s4 + $0xd0] sm:$0xff]  }
 0x274   : > { %5125 = vmatprep.subr.bf16.mxu0 %v5614_v22  ;;  %v2054_v59 = vpack.c.bf16 %v6336_v20, %v6330_v9 }
 0x275   : > { %v1611_v29 = vpop.f32.mrf.mxu1 }
 0x276   : > { %5118 = vmatmul.mubr.bf16.vlgmr.msra.gmra.mxu0 %v2046_v21  ;;  %v2053_v21 = vpack.c.bf16 %v1601_v13, %v1598_v10  ;;  %v5656_v29 = vld [vmem:[%s7196_s3 + $0x2a4] ss:$8 sps:$4 sm:$0xff]  }
 0x277   : > { %5121 = vmatprep.mubr.bf16.mxu0 %v2047_v27  ;;  %5126 = vmatpush3.bf16.msra.mxu0 %v5614_v22  ;;  %v1614_v31 = vpop.f32.mrf.mxu1  ;;  %v5650_v22 = vld [vmem:[%s7197_s4 + $0xc8] sm:$0xff]  }
 0x278   : > { %1805 = vmatmul.mubr.bf16.gmra.mxu1 %v5617_v23  ;;  %5127 = vmatprep.subr.bf16.mxu0 %v5618_v25  ;;  %v5653_v23 = vld [vmem:[%s7196_s3 + $0x290] ss:$8 sps:$4 sm:$0xff]  }
 0x279   : > { %v1616_v36 = vpop.f32.mrf.mxu1  ;;  %4596 = vmatprep.mubr.msk.bf16.mxu1 %vm1303_vm1, %v5620_v30 }
 0x27b   : > { %5128 = vmatpush3.bf16.msra.mxu0 %v5618_v25  ;;  %v1617_v26 = vpop.f32.mrf.mxu1  ;;  %v5654_v25 = vld [vmem:[%s7197_s4 + $0xc0] sm:$0xff]  }
 0x27c   : > { %5129 = vmatprep.subr.bf16.mxu0 %v5619_v33  ;;  %v2055_v55 = vpack.c.bf16 %v1617_v26, %v1614_v31  ;;  %v5655_v31 = vld [vmem:[%s7197_s4 + $0x138] sm:$0xff]  }
 0x27d   : > { %v1619_v37 = vpop.f32.mrf.mxu1 }
 0x27e   : > { %5122 = vmatmul.mubr.bf16.gmra.mxu0 %v2048_v28  ;;  %v5658_v28 = vld [vmem:[%s7196_s3 + $0x2a0] ss:$8 sps:$4 sm:$0xff]   ;;  %v5661_v37 = vld [vmem:[%s7196_s3 + $0x2b4] ss:$8 sps:$4 sm:$0xff]  }
 0x27f   : > { %5130 = vmatpush3.bf16.msra.mxu0 %v5619_v33  ;;  %5141 = vmatprep.mubr.bf16.mxu0 %v2053_v21  ;;  %v1622_v39 = vpop.f32.mrf.mxu1 }
 0x280   : > { %1813 = vmatmul.mubr.bf16.gmra.mxu1 %v5622_v17  ;;  %5131 = vmatprep.subr.bf16.mxu0 %v5623_v19  ;;  %v5659_v17 = vld [vmem:[%s7197_s4 + $0x130] sm:$0xff]  }
 0x281   : > { %v1624_v35 = vpop.f32.mrf.mxu1  ;;  %4597 = vmatprep.mubr.msk.bf16.mxu1 %vm1303_vm1, %v5625_v38 }
 0x283   : > { %5132 = vmatpush3.bf16.msra.mxu0 %v5623_v19  ;;  %v1625_v40 = vpop.f32.mrf.mxu1 }
 0x284   : > { %5133 = vmatprep.subr.bf16.mxu0 %v5624_v32  ;;  %v2056_v2 = vpack.c.bf16 %v1625_v40, %v1622_v39  ;;  %v5660_v39 = vld [vmem:[%s7197_s4 + $0x128] sm:$0xff]  }
 0x285   : > { %v1627_v46 = vpop.f32.mrf.mxu1 }
 0x287   : > { %5134 = vmatpush3.bf16.msra.mxu0 %v5624_v32  ;;  %v1630_v48 = vpop.f32.mrf.mxu1 }
 0x288   : > { %1821 = vmatmul.mubr.bf16.gmra.mxu1 %v5627_v41  ;;  %5135 = vmatprep.subr.bf16.mxu0 %v5628_v44  ;;  %v5663_v41 = vld [vmem:[%s7196_s3 + $0x2b0] ss:$8 sps:$4 sm:$0xff]  }
 0x289   : > { %v1632_v49 = vpop.f32.mrf.mxu1  ;;  %4598 = vmatprep.mubr.msk.bf16.mxu1 %vm1303_vm1, %v5630_v47 }
 0x28a   : > { %v5665_v49 = vld [vmem:[%s7197_s4 + $0x118] sm:$0xff]  }
 0x28b   : > { %5136 = vmatpush3.bf16.msra.mxu0 %v5628_v44  ;;  %v1633_v50 = vpop.f32.mrf.mxu1  ;;  %v5664_v44 = vld [vmem:[%s7197_s4 + $0x120] sm:$0xff]  }
 0x28c   : > { %5137 = vmatprep.subr.bf16.mxu0 %v5629_v45  ;;  %v2057_v6 = vpack.c.bf16 %v1633_v50, %v1630_v48  ;;  %v5666_v48 = vld [vmem:[%s7196_s3 + $0x2c4] ss:$8 sps:$4 sm:$0xff]  }
 0x28d   : > { %v1635_v52 = vpop.f32.mrf.mxu1 }
 0x28e   : > { %v5669_v52 = vld [vmem:[%s7197_s4 + $0x110] sm:$0xff]  }
 0x28f   : > { %5138 = vmatpush3.bf16.msra.mxu0 %v5629_v45  ;;  %v6393_v54 = vpop.f32.mrf.mxu1 }
 0x290   : > { %1829 = vmatmul.mubr.bf16.gmra.mxu1 %v5632_v42  ;;  %5139 = vmatprep.subr.bf16.mxu0 %v5633_v51 }
 0x291   : > { %v1640_v57 = vpop.f32.mrf.mxu1  ;;  %4599 = vmatprep.mubr.msk.bf16.mxu1 %vm1303_vm1, %v5635_v53 }
 0x292   : > { %v5670_v57 = vld [vmem:[%s7197_s4 + $0x108] sm:$0xff]  }
 0x293   : > { %5140 = vmatpush3.bf16.msra.mxu0 %v5633_v51  ;;  %v6399_v58 = vpop.f32.mrf.mxu1  ;;  %v5668_v51 = vld [vmem:[%s7196_s3 + $0x2c0] ss:$8 sps:$4 sm:$0xff]  }
 0x294   : > { %5149 = vmatprep.subr.bf16.mxu0 %v5634_v56  ;;  %v2058_v26 = vpack.c.bf16 %v6399_v58, %v6393_v54  ;;  %v5671_v54 = vld [vmem:[%s7196_s3 + $0x2d4] ss:$8 sps:$4 sm:$0xff]  }
 0x295   : > { %v1643_v61 = vpop.f32.mrf.mxu1 }
 0x296   : > { %5142 = vmatmul.mubr.bf16.vlgmr.msra.gmra.mxu0 %v2054_v59  ;;  %v5676_v61 = vld [vmem:[%s7196_s3 + $0x2e4] ss:$8 sps:$4 sm:$0xff]  }
 0x297   : > { %5145 = vmatprep.mubr.bf16.mxu0 %v2055_v55  ;;  %5150 = vmatpush3.bf16.msra.mxu0 %v5634_v56  ;;  %v6412_v63 = vpop.f32.mrf.mxu1 }
 0x298   : > { %1837 = vmatmul.mubr.bf16.gmra.mxu1 %v5637_v43  ;;  %5151 = vmatprep.subr.bf16.mxu0 %v5638_v60  ;;  %v5673_v43 = vld [vmem:[%s7196_s3 + $0x2d0] ss:$8 sps:$4 sm:$0xff]  }
 0x299   : > { %v1648_v0 = vpop.f32.mrf.mxu1  ;;  %4600 = vmatprep.mubr.msk.bf16.mxu1 %vm1303_vm1, %v5641_v62 }
 0x29b   : > { %5152 = vmatpush3.bf16.msra.mxu0 %v5638_v60  ;;  %v1649_v1 = vpop.f32.mrf.mxu1  ;;  %v5674_v60 = vld [vmem:[%s7197_s4 + $0x100] sm:$0xff]  }
 0x29c   : > { %5153 = vmatprep.subr.bf16.mxu0 %v5640_v34  ;;  %v2059_v19 = vpack.c.bf16 %v1649_v1, %v6412_v63  ;;  %v5675_v63 = vld [vmem:[%s7197_s4 + $0x178] sm:$0xff]  }
 0x29d   : > { %v1651_v7 = vpop.f32.mrf.mxu1 }
 0x29e   : > { %5146 = vmatmul.mubr.bf16.gmra.mxu0 %v2056_v2  ;;  %v5678_v2 = vld [vmem:[%s7196_s3 + $0x2e0] ss:$8 sps:$4 sm:$0xff]  }
 0x29f   : > { %5154 = vmatpush3.bf16.msra.mxu0 %v5640_v34  ;;  %5165 = vmatprep.mubr.bf16.mxu0 %v2057_v6  ;;  %v1654_v10 = vpop.f32.mrf.mxu1  ;;  %v5682_v6 = vld [vmem:[%s7196_s3 + $0x2f4] ss:$8 sps:$4 sm:$0xff]  }
 0x2a0   : > { %1845 = vmatmul.mubr.bf16.gmra.mxu1 %v5643_v3  ;;  %5155 = vmatprep.subr.bf16.mxu0 %v5644_v4  ;;  %v5679_v3 = vld [vmem:[%s7197_s4 + $0x170] sm:$0xff]  }
 0x2a1   : > { %v1656_v12 = vpop.f32.mrf.mxu1  ;;  %4601 = vmatprep.mubr.msk.bf16.mxu1 %vm1303_vm1, %v5646_v8  ;;  %v5681_v8 = vld [vmem:[%s7197_s4 + $0x168] sm:$0xff]  }
 0x2a3   : > { %5156 = vmatpush3.bf16.msra.mxu0 %v5644_v4  ;;  %v1657_v13 = vpop.f32.mrf.mxu1 }
 0x2a4   : > { %5157 = vmatprep.subr.bf16.mxu0 %v5645_v11  ;;  %v2060_v40 = vpack.c.bf16 %v1657_v13, %v1654_v10  ;;  %v5684_v13 = vld [vmem:[%s7196_s3 + $0x2f0] ss:$8 sps:$4 sm:$0xff]  }
 0x2a5   : > { %v1659_v16 = vpop.f32.mrf.mxu1 }
 0x2a7   : > { %5158 = vmatpush3.bf16.msra.mxu0 %v5645_v11  ;;  %v1662_v9 = vpop.f32.mrf.mxu1 }
 0x2a8   : > { %1853 = vmatmul.mubr.bf16.gmra.mxu1 %v5648_v15  ;;  %5159 = vmatprep.subr.bf16.mxu0 %v5649_v14  ;;  %v5685_v15 = vld [vmem:[%s7197_s4 + $0x160] sm:$0xff]  }
 0x2a9   : > { %v1664_v18 = vpop.f32.mrf.mxu1  ;;  %4602 = vmatprep.mubr.msk.bf16.mxu1 %vm1303_vm1, %v5651_v24  ;;  %v5687_v24 = vld [vmem:[%s7196_s3 + $0x304] ss:$8 sps:$4 sm:$0xff]  }
 0x2aa   : > { %v5686_v18 = vld [vmem:[%s7197_s4 + $0x158] sm:$0xff]  }
 0x2ab   : > { %5160 = vmatpush3.bf16.msra.mxu0 %v5649_v14  ;;  %v1665_v20 = vpop.f32.mrf.mxu1 }
 0x2ac   : > { %5161 = vmatprep.subr.bf16.mxu0 %v5650_v22  ;;  %v2061_v46 = vpack.c.bf16 %v1665_v20, %v1662_v9  ;;  %v5762_v9 = vld [vmem:[%s7197_s4 + $0x390] sm:$0xff]  }
 0x2ad   : > { %v1667_v27 = vpop.f32.mrf.mxu1  ;;  %5423 = vmatprep.subr.bf16.mxu1 %v5762_v9 }
 0x2ae   : > { %5424 = vmatpush3.bf16.msra.mxu1 %v5762_v9  ;;  %v5690_v27 = vld [vmem:[%s7197_s4 + $0x150] sm:$0xff]   ;;  %v5722_v9 = vld [vmem:[%s7197_s4 + $0x1e8] sm:$0xff]  }
 0x2af   : > { %5162 = vmatpush3.bf16.msra.mxu0 %v5650_v22  ;;  %v6456_v30 = vpop.f32.mrf.mxu1 }
 0x2b0   : > { %1861 = vmatmul.mubr.bf16.gmra.mxu1 %v5653_v23  ;;  %5163 = vmatprep.subr.bf16.mxu0 %v5654_v25 }
 0x2b1   : > { %v1672_v33 = vpop.f32.mrf.mxu1  ;;  %4603 = vmatprep.mubr.msk.bf16.mxu1 %vm1303_vm1, %v5656_v29 }
 0x2b2   : > { %v5691_v33 = vld [vmem:[%s7197_s4 + $0x148] sm:$0xff]  }
 0x2b3   : > { %5164 = vmatpush3.bf16.msra.mxu0 %v5654_v25  ;;  %v6462_v36 = vpop.f32.mrf.mxu1  ;;  %v5689_v25 = vld [vmem:[%s7196_s3 + $0x300] ss:$8 sps:$4 sm:$0xff]  }
 0x2b4   : > { %5173 = vmatprep.subr.bf16.mxu0 %v5655_v31  ;;  %v2062_v1 = vpack.c.bf16 %v6462_v36, %v6456_v30  ;;  %v5692_v30 = vld [vmem:[%s7196_s3 + $0x314] ss:$8 sps:$4 sm:$0xff]  }
 0x2b5   : > { %v1675_v21 = vpop.f32.mrf.mxu1 }
 0x2b6   : > { %5166 = vmatmul.mubr.bf16.vlgmr.msra.gmra.mxu0 %v2058_v26  ;;  %v5697_v21 = vld [vmem:[%s7196_s3 + $0x324] ss:$8 sps:$4 sm:$0xff]  }
 0x2b7   : > { %5169 = vmatprep.mubr.bf16.mxu0 %v2059_v19  ;;  %5174 = vmatpush3.bf16.msra.mxu0 %v5655_v31  ;;  %v1678_v38 = vpop.f32.mrf.mxu1 }
 0x2b8   : > { %1869 = vmatmul.mubr.bf16.gmra.mxu1 %v5658_v28  ;;  %5175 = vmatprep.subr.bf16.mxu0 %v5659_v17  ;;  %v5694_v28 = vld [vmem:[%s7196_s3 + $0x310] ss:$8 sps:$4 sm:$0xff]  }
 0x2b9   : > { %v1680_v32 = vpop.f32.mrf.mxu1  ;;  %4604 = vmatprep.mubr.msk.bf16.mxu1 %vm1303_vm1, %v5661_v37 }
 0x2bb   : > { %5176 = vmatpush3.bf16.msra.mxu0 %v5659_v17  ;;  %v1681_v35 = vpop.f32.mrf.mxu1  ;;  %v5695_v17 = vld [vmem:[%s7197_s4 + $0x140] sm:$0xff]  }
 0x2bc   : > { %5177 = vmatprep.subr.bf16.mxu0 %v5660_v39  ;;  %v2063_v4 = vpack.c.bf16 %v1681_v35, %v1678_v38  ;;  %v5696_v38 = vld [vmem:[%s7197_s4 + $0x1b8] sm:$0xff]  }
 0x2bd   : > { %v1683_v47 = vpop.f32.mrf.mxu1 }
 0x2be   : > { %5170 = vmatmul.mubr.bf16.gmra.mxu0 %v2060_v40  ;;  %v5699_v40 = vld [vmem:[%s7196_s3 + $0x320] ss:$8 sps:$4 sm:$0xff]   ;;  %v5702_v47 = vld [vmem:[%s7196_s3 + $0x334] ss:$8 sps:$4 sm:$0xff]  }
 0x2bf   : > { %5178 = vmatpush3.bf16.msra.mxu0 %v5660_v39  ;;  %5189 = vmatprep.mubr.bf16.mxu0 %v2061_v46  ;;  %v1686_v45 = vpop.f32.mrf.mxu1 }
 0x2c0   : > { %1877 = vmatmul.mubr.bf16.gmra.mxu1 %v5663_v41  ;;  %5179 = vmatprep.subr.bf16.mxu0 %v5664_v44  ;;  %v5700_v41 = vld [vmem:[%s7197_s4 + $0x1b0] sm:$0xff]  }
 0x2c1   : > { %v1688_v50 = vpop.f32.mrf.mxu1  ;;  %4605 = vmatprep.mubr.msk.bf16.mxu1 %vm1303_vm1, %v5666_v48 }
 0x2c3   : > { %5180 = vmatpush3.bf16.msra.mxu0 %v5664_v44  ;;  %v1689_v42 = vpop.f32.mrf.mxu1 }
 0x2c4   : > { %5181 = vmatprep.subr.bf16.mxu0 %v5665_v49  ;;  %v2064_v12 = vpack.c.bf16 %v1689_v42, %v1686_v45  ;;  %v5701_v45 = vld [vmem:[%s7197_s4 + $0x1a8] sm:$0xff]  }
 0x2c5   : > { %v1691_v53 = vpop.f32.mrf.mxu1 }
 0x2c7   : > { %5182 = vmatpush3.bf16.msra.mxu0 %v5665_v49  ;;  %v1694_v56 = vpop.f32.mrf.mxu1 }
 0x2c8   : > { %1885 = vmatmul.mubr.bf16.gmra.mxu1 %v5668_v51  ;;  %5183 = vmatprep.subr.bf16.mxu0 %v5669_v52  ;;  %v5704_v51 = vld [vmem:[%s7196_s3 + $0x330] ss:$8 sps:$4 sm:$0xff]  }
 0x2c9   : > { %v1696_v58 = vpop.f32.mrf.mxu1  ;;  %4606 = vmatprep.mubr.msk.bf16.mxu1 %vm1303_vm1, %v5671_v54 }
 0x2ca   : > { %v5706_v58 = vld [vmem:[%s7197_s4 + $0x198] sm:$0xff]  }
 0x2cb   : > { %5184 = vmatpush3.bf16.msra.mxu0 %v5669_v52  ;;  %v1697_v59 = vpop.f32.mrf.mxu1  ;;  %v5705_v52 = vld [vmem:[%s7197_s4 + $0x1a0] sm:$0xff]  }
 0x2cc   : > { %5185 = vmatprep.subr.bf16.mxu0 %v5670_v57  ;;  %v2065_v14 = vpack.c.bf16 %v1697_v59, %v1694_v56  ;;  %v5707_v56 = vld [vmem:[%s7196_s3 + $0x344] ss:$8 sps:$4 sm:$0xff]  }
 0x2cd   : > { %v1699_v55 = vpop.f32.mrf.mxu1 }
 0x2ce   : > { %v5710_v55 = vld [vmem:[%s7197_s4 + $0x190] sm:$0xff]  }
 0x2cf   : > { %5186 = vmatpush3.bf16.msra.mxu0 %v5670_v57  ;;  %v6515_v62 = vpop.f32.mrf.mxu1 }
 0x2d0   : > { %1893 = vmatmul.mubr.bf16.gmra.mxu1 %v5673_v43  ;;  %5187 = vmatprep.subr.bf16.mxu0 %v5674_v60 }
 0x2d1   : > { %v1704_v34 = vpop.f32.mrf.mxu1  ;;  %4607 = vmatprep.mubr.msk.bf16.mxu1 %vm1303_vm1, %v5676_v61 }
 0x2d2   : > { %v5711_v34 = vld [vmem:[%s7197_s4 + $0x188] sm:$0xff]  }
 0x2d3   : > { %5188 = vmatpush3.bf16.msra.mxu0 %v5674_v60  ;;  %v6521_v0 = vpop.f32.mrf.mxu1  ;;  %v5709_v60 = vld [vmem:[%s7196_s3 + $0x340] ss:$8 sps:$4 sm:$0xff]  }
 0x2d4   : > { %5197 = vmatprep.subr.bf16.mxu0 %v5675_v63  ;;  %v2066_v35 = vpack.c.bf16 %v6521_v0, %v6515_v62  ;;  %v5712_v62 = vld [vmem:[%s7196_s3 + $0x354] ss:$8 sps:$4 sm:$0xff]  }
 0x2d5   : > { %v1707_v5 = vpop.f32.mrf.mxu1 }
 0x2d6   : > { %5190 = vmatmul.mubr.bf16.vlgmr.msra.gmra.mxu0 %v2062_v1  ;;  %v5717_v5 = vld [vmem:[%s7196_s3 + $0x364] ss:$8 sps:$4 sm:$0xff]  }
 0x2d7   : > { %5193 = vmatprep.mubr.bf16.mxu0 %v2063_v4  ;;  %5198 = vmatpush3.bf16.msra.mxu0 %v5675_v63  ;;  %v6534_v7 = vpop.f32.mrf.mxu1 }
 0x2d8   : > { %1901 = vmatmul.mubr.bf16.gmra.mxu1 %v5678_v2  ;;  %5199 = vmatprep.subr.bf16.mxu0 %v5679_v3  ;;  %v5714_v2 = vld [vmem:[%s7196_s3 + $0x350] ss:$8 sps:$4 sm:$0xff]  }
 0x2d9   : > { %v1712_v10 = vpop.f32.mrf.mxu1  ;;  %4608 = vmatprep.mubr.msk.bf16.mxu1 %vm1303_vm1, %v5682_v6 }
 0x2db   : > { %5200 = vmatpush3.bf16.msra.mxu0 %v5679_v3  ;;  %v1713_v11 = vpop.f32.mrf.mxu1  ;;  %v5715_v3 = vld [vmem:[%s7197_s4 + $0x180] sm:$0xff]  }
 0x2dc   : > { %5201 = vmatprep.subr.bf16.mxu0 %v5681_v8  ;;  %v2067_v44 = vpack.c.bf16 %v1713_v11, %v6534_v7  ;;  %v5716_v7 = vld [vmem:[%s7197_s4 + $0x1f8] sm:$0xff]  }
 0x2dd   : > { %v1715_v16 = vpop.f32.mrf.mxu1 }
 0x2de   : > { %5194 = vmatmul.mubr.bf16.gmra.mxu0 %v2064_v12  ;;  %v5719_v12 = vld [vmem:[%s7196_s3 + $0x360] ss:$8 sps:$4 sm:$0xff]   ;;  %v5723_v16 = vld [vmem:[%s7196_s3 + $0x374] ss:$8 sps:$4 sm:$0xff]  }
 0x2df   : > { %5202 = vmatpush3.bf16.msra.mxu0 %v5681_v8  ;;  %5213 = vmatprep.mubr.bf16.mxu0 %v2065_v14  ;;  %v6552_v22 = vpop.f32.mrf.mxu1 }
 0x2e0   : > { %1909 = vmatmul.mubr.bf16.gmra.mxu1 %v5684_v13  ;;  %5203 = vmatprep.subr.bf16.mxu0 %v5685_v15  ;;  %v5720_v13 = vld [vmem:[%s7197_s4 + $0x1f0] sm:$0xff]  }
 0x2e1   : > { %v1720_v20 = vpop.f32.mrf.mxu1  ;;  %4609 = vmatprep.mubr.msk.bf16.mxu1 %vm1303_vm1, %v5687_v24 }
 0x2e3   : > { %5204 = vmatpush3.bf16.msra.mxu0 %v5685_v15  ;;  %v1721_v23 = vpop.f32.mrf.mxu1 }
 0x2e4   : > { %5205 = vmatprep.subr.bf16.mxu0 %v5686_v18  ;;  %v2068_v42 = vpack.c.bf16 %v1721_v23, %v6552_v22 }
 0x2e5   : > { %v1723_v29 = vpop.f32.mrf.mxu1 }
 0x2e7   : > { %5206 = vmatpush3.bf16.msra.mxu0 %v5686_v18  ;;  %v1726_v31 = vpop.f32.mrf.mxu1 }
 0x2e8   : > { %1917 = vmatmul.mubr.bf16.gmra.mxu1 %v5689_v25  ;;  %5207 = vmatprep.subr.bf16.mxu0 %v5690_v27  ;;  %v5725_v25 = vld [vmem:[%s7196_s3 + $0x370] ss:$8 sps:$4 sm:$0xff]  }
 0x2e9   : > { %v1728_v36 = vpop.f32.mrf.mxu1  ;;  %4610 = vmatprep.mubr.msk.bf16.mxu1 %vm1303_vm1, %v5692_v30 }
 0x2eb   : > { %5208 = vmatpush3.bf16.msra.mxu0 %v5690_v27  ;;  %v1729_v26 = vpop.f32.mrf.mxu1  ;;  %v5726_v27 = vld [vmem:[%s7197_s4 + $0x1e0] sm:$0xff]  }
 0x2ec   : > { %5209 = vmatprep.subr.bf16.mxu0 %v5691_v33  ;;  %v2069_v53 = vpack.c.bf16 %v1729_v26, %v1726_v31  ;;  %v5728_v31 = vld [vmem:[%s7196_s3 + $0x384] ss:$8 sps:$4 sm:$0xff]  }
 0x2ed   : > { %v1731_v19 = vpop.f32.mrf.mxu1 }
 0x2ef   : > { %5210 = vmatpush3.bf16.msra.mxu0 %v5691_v33  ;;  %v6580_v37 = vpop.f32.mrf.mxu1  ;;  %v5782_v33 = vld [vmem:[%s7197_s4 + $0x388] sm:$0xff]  }
 0x2f0   : > { %1925 = vmatmul.mubr.bf16.gmra.mxu1 %v5694_v28  ;;  %5211 = vmatprep.subr.bf16.mxu0 %v5695_v17  ;;  %v5727_v28 = vld [vmem:[%s7197_s4 + $0x1d8] sm:$0xff]  }
 0x2f1   : > { %v1736_v39 = vpop.f32.mrf.mxu1  ;;  %4611 = vmatprep.mubr.msk.bf16.mxu1 %vm1303_vm1, %v5697_v21  ;;  %5425 = vmatprep.subr.bf16.mxu1 %v5782_v33 }
 0x2f2   : > { %5426 = vmatpush3.bf16.msra.mxu1 %v5782_v33 }
 0x2f3   : > { %5212 = vmatpush3.bf16.msra.mxu0 %v5695_v17  ;;  %v6586_v32 = vpop.f32.mrf.mxu1 }
 0x2f4   : > { %5221 = vmatprep.subr.bf16.mxu0 %v5696_v38  ;;  %v2070_v11 = vpack.c.bf16 %v6586_v32, %v6580_v37  ;;  %v5730_v37 = vld [vmem:[%s7196_s3 + $0x380] ss:$8 sps:$4 sm:$0xff]   ;;  %v5733_v32 = vld [vmem:[%s7196_s3 + $0x394] ss:$8 sps:$4 sm:$0xff]  }
 0x2f5   : > { %v1739_v46 = vpop.f32.mrf.mxu1 }
 0x2f6   : > { %5214 = vmatmul.mubr.bf16.vlgmr.msra.gmra.mxu0 %v2066_v35 }
 0x2f7   : > { %5217 = vmatprep.mubr.bf16.mxu0 %v2067_v44  ;;  %5222 = vmatpush3.bf16.msra.mxu0 %v5696_v38  ;;  %v1742_v48 = vpop.f32.mrf.mxu1  ;;  %v5731_v38 = vld [vmem:[%s7197_s4 + $0x1d0] sm:$0xff]   ;;  %v5732_v44 = vld [vmem:[%s7197_s4 + $0x1c8] sm:$0xff]  }
 0x2f8   : > { %1933 = vmatmul.mubr.bf16.gmra.mxu1 %v5699_v40  ;;  %5223 = vmatprep.subr.bf16.mxu0 %v5700_v41 }
 0x2f9   : > { %v1744_v49 = vpop.f32.mrf.mxu1  ;;  %4612 = vmatprep.mubr.msk.bf16.mxu1 %vm1303_vm1, %v5702_v47 }
 0x2fa   : > { %v5736_v49 = vld [vmem:[%s7197_s4 + $0x1c0] sm:$0xff]  }
 0x2fb   : > { %5224 = vmatpush3.bf16.msra.mxu0 %v5700_v41  ;;  %v1745_v50 = vpop.f32.mrf.mxu1 }
 0x2fc   : > { %5225 = vmatprep.subr.bf16.mxu0 %v5701_v45  ;;  %v2071_v15 = vpack.c.bf16 %v1745_v50, %v1742_v48 }
 0x2fd   : > { %v1747_v54 = vpop.f32.mrf.mxu1 }
 0x2fe   : > { %5218 = vmatmul.mubr.bf16.gmra.mxu0 %v2068_v42  ;;  %v5738_v42 = vld [vmem:[%s7196_s3 + $0x3a4] ss:$8 sps:$4 sm:$0xff]  }
 0x2ff   : > { %5226 = vmatpush3.bf16.msra.mxu0 %v5701_v45  ;;  %5237 = vmatprep.mubr.bf16.mxu0 %v2069_v53  ;;  %v6614_v57 = vpop.f32.mrf.mxu1  ;;  %v5735_v45 = vld [vmem:[%s7196_s3 + $0x390] ss:$8 sps:$4 sm:$0xff]  }
 0x300   : > { %1941 = vmatmul.mubr.bf16.gmra.mxu1 %v5704_v51  ;;  %5227 = vmatprep.subr.bf16.mxu0 %v5705_v52  ;;  %v5737_v53 = vld [vmem:[%s7197_s4 + $0x238] sm:$0xff]  }
 0x301   : > { %v1752_v59 = vpop.f32.mrf.mxu1  ;;  %4613 = vmatprep.mubr.msk.bf16.mxu1 %vm1303_vm1, %v5707_v56 }
 0x302   : > { %v5740_v59 = vld [vmem:[%s7196_s3 + $0x3a0] ss:$8 sps:$4 sm:$0xff]  }
 0x303   : > { %5228 = vmatpush3.bf16.msra.mxu0 %v5705_v52  ;;  %v1753_v43 = vpop.f32.mrf.mxu1 }
 0x304   : > { %5229 = vmatprep.subr.bf16.mxu0 %v5706_v58  ;;  %v2072_v23 = vpack.c.bf16 %v1753_v43, %v6614_v57  ;;  %v5741_v43 = vld [vmem:[%s7197_s4 + $0x230] sm:$0xff]  }
 0x305   : > { %v1755_v61 = vpop.f32.mrf.mxu1 }
 0x306   : > { %v5743_v61 = vld [vmem:[%s7196_s3 + $0x3b4] ss:$8 sps:$4 sm:$0xff]  }
 0x307   : > { %5230 = vmatpush3.bf16.msra.mxu0 %v5706_v58  ;;  %v1758_v63 = vpop.f32.mrf.mxu1 }
 0x308   : > { %1949 = vmatmul.mubr.bf16.gmra.mxu1 %v5709_v60  ;;  %5231 = vmatprep.subr.bf16.mxu0 %v5710_v55 }
 0x309   : > { %v1760_v0 = vpop.f32.mrf.mxu1  ;;  %4614 = vmatprep.mubr.msk.bf16.mxu1 %vm1303_vm1, %v5712_v62 }
 0x30b   : > { %5232 = vmatpush3.bf16.msra.mxu0 %v5710_v55  ;;  %v1761_v1 = vpop.f32.mrf.mxu1 }
 0x30c   : > { %5233 = vmatprep.subr.bf16.mxu0 %v5711_v34  ;;  %v2073_v29 = vpack.c.bf16 %v1761_v1, %v1758_v63  ;;  %v5742_v1 = vld [vmem:[%s7197_s4 + $0x228] sm:$0xff]  }
 0x30d   : > { %v1763_v4 = vpop.f32.mrf.mxu1 }
 0x30f   : > { %5234 = vmatpush3.bf16.msra.mxu0 %v5711_v34  ;;  %v6642_v6 = vpop.f32.mrf.mxu1 }
 0x310   : > { %1957 = vmatmul.mubr.bf16.gmra.mxu1 %v5714_v2  ;;  %5235 = vmatprep.subr.bf16.mxu0 %v5715_v3 }
 0x311   : > { %v1768_v8 = vpop.f32.mrf.mxu1  ;;  %4615 = vmatprep.mubr.msk.bf16.mxu1 %vm1303_vm1, %v5717_v5 }
 0x313   : > { %5236 = vmatpush3.bf16.msra.mxu0 %v5715_v3  ;;  %v6648_v10 = vpop.f32.mrf.mxu1 }
 0x314   : > { %5245 = vmatprep.subr.bf16.mxu0 %v5716_v7  ;;  %v2074_v57 = vpack.c.bf16 %v6648_v10, %v6642_v6  ;;  %v5745_v10 = vld [vmem:[%s7196_s3 + $0x3b0] ss:$8 sps:$4 sm:$0xff]  }
 0x315   : > { %v1771_v14 = vpop.f32.mrf.mxu1 }
 0x316   : > { %5238 = vmatmul.mubr.bf16.vlgmr.msra.gmra.mxu0 %v2070_v11  ;;  %v6667_v18 = vpop.f32.mrf.mxu0  ;;  %v5746_v11 = vld [vmem:[%s7197_s4 + $0x220] sm:$0xff]  }
 0x317   : > { %5241 = vmatprep.mubr.bf16.mxu0 %v2071_v15  ;;  %5246 = vmatpush3.bf16.msra.mxu0 %v5716_v7  ;;  %v6661_v24 = vpop.f32.mrf.mxu1 }
 0x318   : > { %1965 = vmatmul.mubr.bf16.gmra.mxu1 %v5719_v12  ;;  %5247 = vmatprep.subr.bf16.mxu0 %v5720_v13  ;;  %v6684_v36 = vpop.f32.mrf.mxu0 }
 0x319   : > { %v1776_v22 = vpop.f32.mrf.mxu1  ;;  %4616 = vmatprep.mubr.msk.bf16.mxu1 %vm1303_vm1, %v5723_v16 }
 0x31a   : > { %v5096_v19 = vpop.f32.mrf.mxu0  ;;  %v5747_v22 = vld [vmem:[%s7197_s4 + $0x218] sm:$0xff]  }
 0x31b   : > { %5248 = vmatpush3.bf16.msra.mxu0 %v5720_v13  ;;  %v6669_v20 = vpop.f32.mrf.mxu1  ;;  %v5748_v13 = vld [vmem:[%s7196_s3 + $0x3c4] ss:$8 sps:$4 sm:$0xff]  }
 0x31c   : > { %5249 = vmatprep.subr.bf16.mxu0 %v5722_v9  ;;  %v6703_v35 = vpop.f32.mrf.mxu0  ;;  %v2075_v60 = vpack.c.bf16 %v6669_v20, %v6661_v24 }
 0x31d   : > { %v1779_v30 = vpop.f32.mrf.mxu1 }
 0x31e   : > { %5242 = vmatmul.mubr.bf16.gmra.mxu0 %v2072_v23  ;;  %v5751_v30 = vld [vmem:[%s7197_s4 + $0x210] sm:$0xff]  }
 0x31f   : > { %5250 = vmatpush3.bf16.msra.mxu0 %v5722_v9  ;;  %5261 = vmatprep.mubr.bf16.mxu0 %v2073_v29  ;;  %v6686_v26 = vpop.f32.mrf.mxu1  ;;  %v5750_v29 = vld [vmem:[%s7196_s3 + $0x3c0] ss:$8 sps:$4 sm:$0xff]  }
 0x320   : > { %1973 = vmatmul.mubr.bf16.gmra.mxu1 %v5725_v25  ;;  %5251 = vmatprep.subr.bf16.mxu0 %v5726_v27 }
 0x321   : > { %v1784_v17 = vpop.f32.mrf.mxu1  ;;  %4617 = vmatprep.mubr.msk.bf16.mxu1 %vm1303_vm1, %v5728_v31  ;;  %v5753_v31 = vld [vmem:[%s7196_s3 + $0x3d4] ss:$8 sps:$4 sm:$0xff]  }
 0x323   : > { %5252 = vmatpush3.bf16.msra.mxu0 %v5726_v27  ;;  %v6692_v21 = vpop.f32.mrf.mxu1 }
 0x324   : > { %5253 = vmatprep.subr.bf16.mxu0 %v5727_v28  ;;  %v2076_v6 = vpack.c.bf16 %v6692_v21, %v6686_v26  ;;  %v5752_v26 = vld [vmem:[%s7197_s4 + $0x208] sm:$0xff]   ;;  %v5756_v21 = vld [vmem:[%s7197_s4 + $0x200] sm:$0xff]  }
 0x325   : > { %v1787_v39 = vpop.f32.mrf.mxu1 }
 0x326   : > { %v5099_v41 = vpop.f32.mrf.mxu0 }
 0x327   : > { %5254 = vmatpush3.bf16.msra.mxu0 %v5727_v28  ;;  %v1790_v40 = vpop.f32.mrf.mxu1 }
 0x328   : > { %1981 = vmatmul.mubr.bf16.gmra.mxu1 %v5730_v37  ;;  %5255 = vmatprep.subr.bf16.mxu0 %v5731_v38  ;;  %v2239_v48 = vpop.f32.mrf.mxu0  ;;  %v5758_v37 = vld [vmem:[%s7196_s3 + $0x3e4] ss:$8 sps:$4 sm:$0xff]  }
 0x329   : > { %v1792_v46 = vpop.f32.mrf.mxu1  ;;  %4618 = vmatprep.mubr.msk.bf16.mxu1 %vm1303_vm1, %v5733_v32  ;;  %v5757_v32 = vld [vmem:[%s7197_s4 + $0x278] sm:$0xff]  }
 0x32a   : > { %v5100_v52 = vpop.f32.mrf.mxu0 }
 0x32b   : > { %5256 = vmatpush3.bf16.msra.mxu0 %v5731_v38  ;;  %v1793_v47 = vpop.f32.mrf.mxu1 }
 0x32c   : > { %5257 = vmatprep.subr.bf16.mxu0 %v5732_v44  ;;  %v6728_v58 = vpop.f32.mrf.mxu0  ;;  %v2077_v12 = vpack.c.bf16 %v1793_v47, %v1790_v40  ;;  %v5760_v47 = vld [vmem:[%s7196_s3 + $0x3e0] ss:$8 sps:$4 sm:$0xff]  }
 0x32d   : > { %v1795_v50 = vpop.f32.mrf.mxu1 }
 0x32f   : > { %5258 = vmatpush3.bf16.msra.mxu0 %v5732_v44  ;;  %v6718_v51 = vpop.f32.mrf.mxu1 }
 0x330   : > { %1989 = vmatmul.mubr.bf16.gmra.mxu1 %v5735_v45  ;;  %5259 = vmatprep.subr.bf16.mxu0 %v5736_v49 }
 0x331   : > { %v1800_v54 = vpop.f32.mrf.mxu1  ;;  %4619 = vmatprep.mubr.msk.bf16.mxu1 %vm1303_vm1, %v5738_v42 }
 0x332   : > { %v5763_v54 = vld [vmem:[%s7197_s4 + $0x268] sm:$0xff]  }
 0x333   : > { %5260 = vmatpush3.bf16.msra.mxu0 %v5736_v49  ;;  %v6724_v56 = vpop.f32.mrf.mxu1  ;;  %v5764_v49 = vld [vmem:[%s7196_s3 + $0x3f4] ss:$8 sps:$4 sm:$0xff]  }
 0x334   : > { %5269 = vmatprep.subr.bf16.mxu0 %v5737_v53 }
 0x335   : > { %v1803_v55 = vpop.f32.mrf.mxu1 }
 0x336   : > { %v5119_v62 = vpop.f32.mrf.mxu0  ;;  %5262 = vmatmul.mubr.bf16.vlgmr.msra.gmra.mxu0 %v2074_v57 }
 0x337   : > { %v6742_v63 = vadd.f32 %v5119_v62, %v6667_v18  ;;  %5265 = vmatprep.mubr.bf16.mxu0 %v2075_v60  ;;  %5270 = vmatpush3.bf16.msra.mxu0 %v5737_v53 }
 0x338   : > { %v6744_v34 = vpop.f32.mrf.mxu1  ;;  %1997 = vmatmul.mubr.bf16.gmra.mxu1 %v5740_v59  ;;  %v2336_v0 = vpop.f32.mrf.mxu0  ;;  %5271 = vmatprep.subr.bf16.mxu0 %v5741_v43 }
 0x339   : > { %v6750_v2 = vadd.f32 %v2336_v0, %v6684_v36  ;;  %4620 = vmatprep.mubr.msk.bf16.mxu1 %vm1303_vm1, %v5743_v61 }
 0x33a   : > { %v1808_v3 = vpop.f32.mrf.mxu1  ;;  %v5120_v4 = vpop.f32.mrf.mxu0 }
 0x33b   : > { %v6753_v5 = vadd.f32 %v5120_v4, %v5096_v19  ;;  %5272 = vmatpush3.bf16.msra.mxu0 %v5741_v43  ;;  %v5755_v19 = vld [vmem:[%s7196_s3 + $0x3d0] ss:$8 sps:$4 sm:$0xff]  }
 0x33c   : > { %v6757_v7 = vpop.f32.mrf.mxu1  ;;  %v6759_v8 = vpop.f32.mrf.mxu0  ;;  %5273 = vmatprep.subr.bf16.mxu0 %v5742_v1 }
 0x33d   : > { %v2079_v45 = vpack.c.bf16 %v6757_v7, %v6744_v34  ;;  %v2340_v43 = vadd.f32 %v6759_v8, %v6703_v35  ;;  %v5767_v34 = vld [vmem:[%s7197_s4 + $0x260] sm:$0xff]   ;;  %v5768_v7 = vld [vmem:[%s7197_s4 + $0x258] sm:$0xff]  }
 0x33e   : > { %v1811_v15 = vpop.f32.mrf.mxu1  ;;  %v5123_v14 = vpop.f32.mrf.mxu0  ;;  %5266 = vmatmul.mubr.bf16.gmra.mxu0 %v2076_v6 }
 0x33f   : > { %v6770_v16 = vadd.f32 %v5123_v14, %v5099_v41  ;;  %5274 = vmatpush3.bf16.msra.mxu0 %v5742_v1  ;;  %5285 = vmatprep.mubr.bf16.mxu0 %v2077_v12  ;;  %v2078_v41 = vpack.c.bf16 %v6724_v56, %v6718_v51  ;;  %v5799_v1 = vld [vmem:[%s7197_s4 + $0x380] sm:$0xff]  }
 0x340   : > { %v6772_v24 = vpop.f32.mrf.mxu1  ;;  %2005 = vmatmul.mubr.bf16.gmra.mxu1 %v5745_v10  ;;  %v2352_v9 = vpop.f32.mrf.mxu0  ;;  %5275 = vmatprep.subr.bf16.mxu0 %v5746_v11 }
 0x341   : > { %v6777_v18 = vadd.f32 %v2352_v9, %v2239_v48  ;;  %4621 = vmatprep.mubr.msk.bf16.mxu1 %vm1303_vm1, %v5748_v13  ;;  %v5761_v48 = vld [vmem:[%s7197_s4 + $0x270] sm:$0xff]   ;;  %5427 = vmatprep.subr.bf16.mxu1 %v5799_v1 }
 0x342   : > { %v1816_v20 = vpop.f32.mrf.mxu1  ;;  %v5124_v23 = vpop.f32.mrf.mxu0  ;;  %5428 = vmatpush3.bf16.msra.mxu1 %v5799_v1 }
 0x343   : > { %v6780_v25 = vadd.f32 %v5124_v23, %v5100_v52  ;;  %5276 = vmatpush3.bf16.msra.mxu0 %v5746_v11  ;;  %v5771_v23 = vld [vmem:[%s7197_s4 + $0x240] sm:$0xff]  }
 0x344   : > { %v6782_v27 = vpop.f32.mrf.mxu1  ;;  %5277 = vmatprep.subr.bf16.mxu0 %v5747_v22  ;;  %v2355_v44 = vpop.f32.mrf.mxu0 }
 0x345   : > { %v2080_v55 = vpack.c.bf16 %v6782_v27, %v6772_v24  ;;  %v2356_v12 = vadd.f32 %v2355_v44, %v6728_v58  ;;  %v5770_v58 = vld [vmem:[%s7197_s4 + $0x248] sm:$0xff]  }
 0x346   : > { %v1819_v33 = vpop.f32.mrf.mxu1 }
 0x347   : > { %5278 = vmatpush3.bf16.msra.mxu0 %v5747_v22 }
 0x348   : > { %v1822_v36 = vpop.f32.mrf.mxu1  ;;  %2013 = vmatmul.mubr.bf16.gmra.mxu1 %v5750_v29  ;;  %5279 = vmatprep.subr.bf16.mxu0 %v5751_v30  ;;  %v5772_v29 = vld [vmem:[%s7197_s4 + $0x2b8] sm:$0xff]  }
 0x349   : > { %4622 = vmatprep.mubr.msk.bf16.mxu1 %vm1303_vm1, %v5753_v31 }
 0x34a   : > { %v1824_v28 = vpop.f32.mrf.mxu1 }
 0x34b   : > { %5280 = vmatpush3.bf16.msra.mxu0 %v5751_v30 }
 0x34c   : > { %v1825_v17 = vpop.f32.mrf.mxu1  ;;  %5281 = vmatprep.subr.bf16.mxu0 %v5752_v26 }
 0x34d   : > { %v2081_v0 = vpack.c.bf16 %v1825_v17, %v1822_v36  ;;  %v5773_v36 = vld [vmem:[%s7197_s4 + $0x2b0] sm:$0xff]  }
 0x34e   : > { %v1827_v38 = vpop.f32.mrf.mxu1 }
 0x34f   : > { %5282 = vmatpush3.bf16.msra.mxu0 %v5752_v26  ;;  %v5774_v38 = vld [vmem:[%s7197_s4 + $0x2a8] sm:$0xff]  }
 0x350   : > { %v6806_v39 = vpop.f32.mrf.mxu1  ;;  %2021 = vmatmul.mubr.bf16.gmra.mxu1 %v5755_v19  ;;  %5283 = vmatprep.subr.bf16.mxu0 %v5756_v21 }
 0x351   : > { %4623 = vmatprep.mubr.msk.bf16.mxu1 %vm1303_vm1, %v5758_v37 }
 0x352   : > { %v1832_v40 = vpop.f32.mrf.mxu1 }
 0x353   : > { %5284 = vmatpush3.bf16.msra.mxu0 %v5756_v21 }
 0x354   : > { %v6814_v46 = vpop.f32.mrf.mxu1  ;;  %5293 = vmatprep.subr.bf16.mxu0 %v5757_v32 }
 0x355   : > { %v2082_v31 = vpack.c.bf16 %v6814_v46, %v6806_v39 }
 0x356   : > { %v1835_v50 = vpop.f32.mrf.mxu1  ;;  %v5143_v42 = vpop.f32.mrf.mxu0  ;;  %5286 = vmatmul.mubr.bf16.vlgmr.msra.gmra.mxu0 %v2078_v41 }
 0x357   : > { %v6828_v51 = vadd.f32 %v5143_v42, %v6742_v63  ;;  %5289 = vmatprep.mubr.bf16.mxu0 %v2079_v45  ;;  %5294 = vmatpush3.bf16.msra.mxu0 %v5757_v32  ;;  %v5766_v63 = vld [vmem:[%s7196_s3 + $0x3f0] ss:$8 sps:$4 sm:$0xff]  }
 0x358   : > { %v6830_v52 = vpop.f32.mrf.mxu1  ;;  %2029 = vmatmul.mubr.bf16.gmra.mxu1 %v5760_v47  ;;  %v2465_v53 = vpop.f32.mrf.mxu0  ;;  %5295 = vmatprep.subr.bf16.mxu0 %v5761_v48 }
 0x359   : > { %v6836_v56 = vadd.f32 %v2465_v53, %v6750_v2  ;;  %4624 = vmatprep.mubr.msk.bf16.mxu1 %vm1303_vm1, %v5764_v49 }
 0x35a   : > { %v1840_v57 = vpop.f32.mrf.mxu1  ;;  %v5144_v59 = vpop.f32.mrf.mxu0 }
 0x35b   : > { %v6842_v60 = vadd.f32 %v5144_v59, %v6753_v5  ;;  %5296 = vmatpush3.bf16.msra.mxu0 %v5761_v48  ;;  %v5775_v48 = vld [vmem:[%s7197_s4 + $0x2a0] sm:$0xff]  }
 0x35c   : > { %v1841_v61 = vpop.f32.mrf.mxu1  ;;  %v2468_v62 = vpop.f32.mrf.mxu0  ;;  %5297 = vmatprep.subr.bf16.mxu0 %v5763_v54 }
 0x35d   : > { %v6852_v35 = vadd.f32 %v2468_v62, %v2340_v43  ;;  %v2083_v26 = vpack.c.bf16 %v1841_v61, %v6830_v52  ;;  %v5777_v61 = vld [vmem:[%s7197_s4 + $0x290] sm:$0xff]  }
 0x35e   : > { %v1843_v2 = vpop.f32.mrf.mxu1  ;;  %v5147_v3 = vpop.f32.mrf.mxu0  ;;  %5290 = vmatmul.mubr.bf16.gmra.mxu0 %v2080_v55 }
 0x35f   : > { %v6858_v4 = vadd.f32 %v5147_v3, %v6770_v16  ;;  %5298 = vmatpush3.bf16.msra.mxu0 %v5763_v54  ;;  %5309 = vmatprep.mubr.bf16.mxu0 %v2081_v0  ;;  %v5769_v16 = vld [vmem:[%s7197_s4 + $0x250] sm:$0xff]   ;;  %v5776_v54 = vld [vmem:[%s7197_s4 + $0x298] sm:$0xff]   ;;  %v5778_v0 = vld [vmem:[%s7197_s4 + $0x288] sm:$0xff]  }
 0x360   : > { %v6860_v5 = vpop.f32.mrf.mxu1  ;;  %2037 = vmatmul.mubr.bf16.gmra.mxu1 %v5766_v63  ;;  %v2481_v6 = vpop.f32.mrf.mxu0  ;;  %5299 = vmatprep.subr.bf16.mxu0 %v5767_v34  ;;  %v5779_v2 = vld [vmem:[%s7197_s4 + $0x280] sm:$0xff]  }
 0x361   : > { %v6866_v8 = vadd.f32 %v2481_v6, %v6777_v18 }
 0x362   : > { %v1848_v10 = vpop.f32.mrf.mxu1  ;;  %v5148_v11 = vpop.f32.mrf.mxu0 }
 0x363   : > { %v6870_v13 = vadd.f32 %v5148_v11, %v6780_v25  ;;  %5300 = vmatpush3.bf16.msra.mxu0 %v5767_v34  ;;  %v5781_v10 = vld [vmem:[%s7197_s4 + $0x2f0] sm:$0xff]  }
 0x364   : > { %v1849_v15 = vpop.f32.mrf.mxu1  ;;  %v2484_v14 = vpop.f32.mrf.mxu0  ;;  %5301 = vmatprep.subr.bf16.mxu0 %v5768_v7 }
 0x365   : > { %v6875_v24 = vadd.f32 %v2484_v14, %v2356_v12  ;;  %v2084_v44 = vpack.c.bf16 %v1849_v15, %v6860_v5  ;;  %v5780_v5 = vld [vmem:[%s7197_s4 + $0x2f8] sm:$0xff]  }
 0x366   : > { %v1851_v9 = vpop.f32.mrf.mxu1 }
 0x367   : > { %5302 = vmatpush3.bf16.msra.mxu0 %v5768_v7 }
 0x368   : > { %v1854_v22 = vpop.f32.mrf.mxu1  ;;  %5303 = vmatprep.subr.bf16.mxu0 %v5769_v16 }
 0x36a   : > { %v1856_v18 = vpop.f32.mrf.mxu1 }
 0x36b   : > { %5304 = vmatpush3.bf16.msra.mxu0 %v5769_v16 }
 0x36c   : > { %v1857_v20 = vpop.f32.mrf.mxu1  ;;  %5305 = vmatprep.subr.bf16.mxu0 %v5770_v58 }
 0x36d   : > { %v2085_v45 = vpack.c.bf16 %v1857_v20, %v1854_v22 }
 0x36e   : > { %v1859_v25 = vpop.f32.mrf.mxu1 }
 0x36f   : > { %5306 = vmatpush3.bf16.msra.mxu0 %v5770_v58 }
 0x370   : > { %v6883_v27 = vpop.f32.mrf.mxu1  ;;  %5307 = vmatprep.subr.bf16.mxu0 %v5771_v23 }
 0x372   : > { %v1864_v30 = vpop.f32.mrf.mxu1 }
 0x373   : > { %5308 = vmatpush3.bf16.msra.mxu0 %v5771_v23 }
 0x374   : > { %v6890_v33 = vpop.f32.mrf.mxu1  ;;  %5317 = vmatprep.subr.bf16.mxu0 %v5772_v29 }
 0x375   : > { %v2086_v7 = vpack.c.bf16 %v6890_v33, %v6883_v27  ;;  %v5784_v27 = vld [vmem:[%s7197_s4 + $0x2e0] sm:$0xff]  }
 0x376   : > { %v1867_v28 = vpop.f32.mrf.mxu1  ;;  %v5167_v17 = vpop.f32.mrf.mxu0  ;;  %5310 = vmatmul.mubr.bf16.vlgmr.msra.gmra.mxu0 %v2082_v31 }
 0x377   : > { %v6897_v19 = vadd.f32 %v5167_v17, %v6828_v51  ;;  %5313 = vmatprep.mubr.bf16.mxu0 %v2083_v26  ;;  %5318 = vmatpush3.bf16.msra.mxu0 %v5772_v29  ;;  %v5785_v17 = vld [vmem:[%s7197_s4 + $0x2d8] sm:$0xff]  }
 0x378   : > { %v1870_v21 = vpop.f32.mrf.mxu1  ;;  %v2602_v37 = vpop.f32.mrf.mxu0  ;;  %5319 = vmatprep.subr.bf16.mxu0 %v5773_v36 }
 0x379   : > { %v6903_v39 = vadd.f32 %v2602_v37, %v6836_v56 }
 0x37a   : > { %v1872_v32 = vpop.f32.mrf.mxu1  ;;  %v5168_v40 = vpop.f32.mrf.mxu0 }
 0x37b   : > { %v6906_v41 = vadd.f32 %v5168_v40, %v6842_v60  ;;  %5320 = vmatpush3.bf16.msra.mxu0 %v5773_v36  ;;  %v5786_v40 = vld [vmem:[%s7197_s4 + $0x2d0] sm:$0xff]  }
 0x37c   : > { %v1873_v46 = vpop.f32.mrf.mxu1  ;;  %v2605_v47 = vpop.f32.mrf.mxu0  ;;  %5321 = vmatprep.subr.bf16.mxu0 %v5774_v38 }
 0x37d   : > { %v6913_v49 = vadd.f32 %v2605_v47, %v6852_v35  ;;  %v2087_v11 = vpack.c.bf16 %v1873_v46, %v1870_v21  ;;  %v5787_v47 = vld [vmem:[%s7197_s4 + $0x2c8] sm:$0xff]  }
 0x37e   : > { %v1875_v50 = vpop.f32.mrf.mxu1  ;;  %v5171_v42 = vpop.f32.mrf.mxu0  ;;  %5314 = vmatmul.mubr.bf16.gmra.mxu0 %v2084_v44 }
 0x37f   : > { %v6916_v51 = vadd.f32 %v5171_v42, %v6858_v4  ;;  %5322 = vmatpush3.bf16.msra.mxu0 %v5774_v38  ;;  %5333 = vmatprep.mubr.bf16.mxu0 %v2085_v45 }
 0x380   : > { %v1878_v52 = vpop.f32.mrf.mxu1  ;;  %v2618_v53 = vpop.f32.mrf.mxu0  ;;  %5323 = vmatprep.subr.bf16.mxu0 %v5775_v48 }
 0x381   : > { %v6922_v56 = vadd.f32 %v2618_v53, %v6866_v8 }
 0x382   : > { %v1880_v57 = vpop.f32.mrf.mxu1  ;;  %v5172_v59 = vpop.f32.mrf.mxu0 }
 0x383   : > { %v6925_v43 = vadd.f32 %v5172_v59, %v6870_v13  ;;  %5324 = vmatpush3.bf16.msra.mxu0 %v5775_v48 }
 0x384   : > { %v1881_v60 = vpop.f32.mrf.mxu1  ;;  %v2621_v55 = vpop.f32.mrf.mxu0  ;;  %5325 = vmatprep.subr.bf16.mxu0 %v5776_v54 }
 0x385   : > { %v6931_v62 = vadd.f32 %v2621_v55, %v6875_v24  ;;  %v5783_v24 = vld [vmem:[%s7197_s4 + $0x2e8] sm:$0xff]   ;;  %v2088_v20 = vpack.c.bf16 %v1881_v60, %v1878_v52 }
 0x386   : > { %v1883_v63 = vpop.f32.mrf.mxu1 }
 0x387   : > { %5326 = vmatpush3.bf16.msra.mxu0 %v5776_v54 }
 0x388   : > { %v1886_v34 = vpop.f32.mrf.mxu1  ;;  %5327 = vmatprep.subr.bf16.mxu0 %v5777_v61 }
 0x38a   : > { %v1888_v35 = vpop.f32.mrf.mxu1 }
 0x38b   : > { %5328 = vmatpush3.bf16.msra.mxu0 %v5777_v61 }
 0x38c   : > { %v1889_v1 = vpop.f32.mrf.mxu1  ;;  %5329 = vmatprep.subr.bf16.mxu0 %v5778_v0 }
 0x38d   : > { %v2089_v29 = vpack.c.bf16 %v1889_v1, %v1886_v34 }
 0x38e   : > { %v1891_v3 = vpop.f32.mrf.mxu1 }
 0x38f   : > { %5330 = vmatpush3.bf16.msra.mxu0 %v5778_v0 }
 0x390   : > { %v6939_v4 = vpop.f32.mrf.mxu1  ;;  %5331 = vmatprep.subr.bf16.mxu0 %v5779_v2 }
 0x392   : > { %v1896_v6 = vpop.f32.mrf.mxu1 }
 0x393   : > { %5332 = vmatpush3.bf16.msra.mxu0 %v5779_v2 }
 0x394   : > { %v6946_v8 = vpop.f32.mrf.mxu1  ;;  %5341 = vmatprep.subr.bf16.mxu0 %v5780_v5 }
 0x395   : > { %v2090_v53 = vpack.c.bf16 %v6946_v8, %v6939_v4  ;;  %v5792_v4 = vld [vmem:[%s7197_s4 + $0x320] sm:$0xff]  }
 0x396   : > { %v1899_v12 = vpop.f32.mrf.mxu1  ;;  %v5191_v13 = vpop.f32.mrf.mxu0  ;;  %5334 = vmatmul.mubr.bf16.vlgmr.msra.gmra.mxu0 %v2086_v7 }
 0x397   : > { %v6952_v15 = vadd.f32 %v5191_v13, %v6897_v19  ;;  %5337 = vmatprep.mubr.bf16.mxu0 %v2087_v11  ;;  %5342 = vmatpush3.bf16.msra.mxu0 %v5780_v5  ;;  %v5793_v13 = vld [vmem:[%s7197_s4 + $0x318] sm:$0xff]  }
 0x398   : > { %v1902_v14 = vpop.f32.mrf.mxu1  ;;  %v2739_v16 = vpop.f32.mrf.mxu0  ;;  %5343 = vmatprep.subr.bf16.mxu0 %v5781_v10 }
 0x399   : > { %v6958_v9 = vadd.f32 %v2739_v16, %v6903_v39 }
 0x39a   : > { %v1904_v22 = vpop.f32.mrf.mxu1  ;;  %v5192_v58 = vpop.f32.mrf.mxu0 }
 0x39b   : > { %v6961_v18 = vadd.f32 %v5192_v58, %v6906_v41  ;;  %5344 = vmatpush3.bf16.msra.mxu0 %v5781_v10  ;;  %v5794_v58 = vld [vmem:[%s7197_s4 + $0x310] sm:$0xff]  }
 0x39c   : > { %v1905_v23 = vpop.f32.mrf.mxu1  ;;  %v2742_v25 = vpop.f32.mrf.mxu0  ;;  %5345 = vmatprep.subr.bf16.mxu0 %v5783_v24 }
 0x39d   : > { %v6967_v30 = vadd.f32 %v2742_v25, %v6913_v49  ;;  %v5788_v49 = vld [vmem:[%s7197_s4 + $0x2c0] sm:$0xff]   ;;  %v2091_v57 = vpack.c.bf16 %v1905_v23, %v1902_v14  ;;  %v5795_v25 = vld [vmem:[%s7197_s4 + $0x308] sm:$0xff]  }
 0x39e   : > { %v1907_v31 = vpop.f32.mrf.mxu1  ;;  %v5195_v33 = vpop.f32.mrf.mxu0  ;;  %5338 = vmatmul.mubr.bf16.gmra.mxu0 %v2088_v20 }
 0x39f   : > { %v6970_v36 = vadd.f32 %v5195_v33, %v6916_v51  ;;  %5346 = vmatpush3.bf16.msra.mxu0 %v5783_v24  ;;  %5357 = vmatprep.mubr.bf16.mxu0 %v2089_v29  ;;  %v5789_v51 = vld [vmem:[%s7197_s4 + $0x338] sm:$0xff]  }
 0x3a0   : > { %v1910_v26 = vpop.f32.mrf.mxu1  ;;  %v2755_v28 = vpop.f32.mrf.mxu0  ;;  %5347 = vmatprep.subr.bf16.mxu0 %v5784_v27 }
 0x3a1   : > { %v6976_v19 = vadd.f32 %v2755_v28, %v6922_v56  ;;  %v5790_v56 = vld [vmem:[%s7197_s4 + $0x330] sm:$0xff]  }
 0x3a2   : > { %v1912_v21 = vpop.f32.mrf.mxu1  ;;  %v5196_v37 = vpop.f32.mrf.mxu0 }
 0x3a3   : > { %v6979_v38 = vadd.f32 %v5196_v37, %v6925_v43  ;;  %5348 = vmatpush3.bf16.msra.mxu0 %v5784_v27 }
 0x3a4   : > { %v1913_v39 = vpop.f32.mrf.mxu1  ;;  %v2758_v32 = vpop.f32.mrf.mxu0  ;;  %5349 = vmatprep.subr.bf16.mxu0 %v5785_v17 }
 0x3a5   : > { %v6985_v41 = vadd.f32 %v2758_v32, %v6931_v62  ;;  %v5791_v62 = vld [vmem:[%s7197_s4 + $0x328] sm:$0xff]   ;;  %v2092_v1 = vpack.c.bf16 %v1913_v39, %v1910_v26 }
 0x3a6   : > { %v1915_v44 = vpop.f32.mrf.mxu1 }
 0x3a7   : > { %5350 = vmatpush3.bf16.msra.mxu0 %v5785_v17 }
 0x3a8   : > { %v1918_v46 = vpop.f32.mrf.mxu1  ;;  %5351 = vmatprep.subr.bf16.mxu0 %v5786_v40 }
 0x3aa   : > { %v1920_v48 = vpop.f32.mrf.mxu1 }
 0x3ab   : > { %5352 = vmatpush3.bf16.msra.mxu0 %v5786_v40 }
 0x3ac   : > { %v1921_v45 = vpop.f32.mrf.mxu1  ;;  %5353 = vmatprep.subr.bf16.mxu0 %v5787_v47 }
 0x3ad   : > { %v2093_v5 = vpack.c.bf16 %v1921_v45, %v1918_v46 }
 0x3ae   : > { %v1923_v50 = vpop.f32.mrf.mxu1 }
 0x3af   : > { %5354 = vmatpush3.bf16.msra.mxu0 %v5787_v47 }
 0x3b0   : > { %v6993_v42 = vpop.f32.mrf.mxu1  ;;  %5355 = vmatprep.subr.bf16.mxu0 %v5788_v49 }
 0x3b2   : > { %v1928_v52 = vpop.f32.mrf.mxu1 }
 0x3b3   : > { %5356 = vmatpush3.bf16.msra.mxu0 %v5788_v49 }
 0x3b4   : > { %v7000_v54 = vpop.f32.mrf.mxu1  ;;  %5365 = vmatprep.subr.bf16.mxu0 %v5789_v51 }
 0x3b5   : > { %v2094_v28 = vpack.c.bf16 %v7000_v54, %v6993_v42  ;;  %v5801_v42 = vld [vmem:[%s7197_s4 + $0x360] sm:$0xff]  }
 0x3b6   : > { %v1931_v59 = vpop.f32.mrf.mxu1  ;;  %v5215_v43 = vpop.f32.mrf.mxu0  ;;  %5358 = vmatmul.mubr.bf16.vlgmr.msra.gmra.mxu0 %v2090_v53 }
 0x3b7   : > { %v7006_v60 = vadd.f32 %v5215_v43, %v6952_v15  ;;  %5361 = vmatprep.mubr.bf16.mxu0 %v2091_v57  ;;  %5366 = vmatpush3.bf16.msra.mxu0 %v5789_v51  ;;  %v5802_v43 = vld [vmem:[%s7197_s4 + $0x358] sm:$0xff]  }
 0x3b8   : > { %v1934_v55 = vpop.f32.mrf.mxu1  ;;  %v2876_v61 = vpop.f32.mrf.mxu0  ;;  %5367 = vmatprep.subr.bf16.mxu0 %v5790_v56 }
 0x3b9   : > { %v7012_v63 = vadd.f32 %v2876_v61, %v6958_v9 }
 0x3ba   : > { %v1936_v34 = vpop.f32.mrf.mxu1  ;;  %v5216_v0 = vpop.f32.mrf.mxu0 }
 0x3bb   : > { %v7015_v35 = vadd.f32 %v5216_v0, %v6961_v18  ;;  %5368 = vmatpush3.bf16.msra.mxu0 %v5790_v56  ;;  %v5803_v0 = vld [vmem:[%s7197_s4 + $0x350] sm:$0xff]  }
 0x3bc   : > { %v1937_v2 = vpop.f32.mrf.mxu1  ;;  %v2879_v3 = vpop.f32.mrf.mxu0  ;;  %5369 = vmatprep.subr.bf16.mxu0 %v5791_v62 }
 0x3bd   : > { %v7021_v6 = vadd.f32 %v2879_v3, %v6967_v30  ;;  %v5796_v30 = vld [vmem:[%s7197_s4 + $0x300] sm:$0xff]   ;;  %v2095_v21 = vpack.c.bf16 %v1937_v2, %v1934_v55  ;;  %v5804_v3 = vld [vmem:[%s7197_s4 + $0x348] sm:$0xff]  }
 0x3be   : > { %v1939_v7 = vpop.f32.mrf.mxu1  ;;  %v5219_v8 = vpop.f32.mrf.mxu0  ;;  %5362 = vmatmul.mubr.bf16.gmra.mxu0 %v2092_v1 }
 0x3bf   : > { %v7024_v10 = vadd.f32 %v5219_v8, %v6970_v36  ;;  %5370 = vmatpush3.bf16.msra.mxu0 %v5791_v62  ;;  %5381 = vmatprep.mubr.bf16.mxu0 %v2093_v5  ;;  %v5797_v36 = vld [vmem:[%s7197_s4 + $0x378] sm:$0xff]  }
 0x3c0   : > { %v1942_v11 = vpop.f32.mrf.mxu1  ;;  %v2892_v12 = vpop.f32.mrf.mxu0  ;;  %5371 = vmatprep.subr.bf16.mxu0 %v5792_v4 }
 0x3c1   : > { %v7030_v15 = vadd.f32 %v2892_v12, %v6976_v19  ;;  %v5798_v19 = vld [vmem:[%s7197_s4 + $0x370] sm:$0xff]  }
 0x3c2   : > { %v1944_v14 = vpop.f32.mrf.mxu1  ;;  %v5220_v16 = vpop.f32.mrf.mxu0 }
 0x3c3   : > { %v7033_v24 = vadd.f32 %v5220_v16, %v6979_v38  ;;  %5372 = vmatpush3.bf16.msra.mxu0 %v5792_v4 }
 0x3c4   : > { %v1945_v9 = vpop.f32.mrf.mxu1  ;;  %v2895_v22 = vpop.f32.mrf.mxu0  ;;  %5373 = vmatprep.subr.bf16.mxu0 %v5793_v13 }
 0x3c5   : > { %v7039_v18 = vadd.f32 %v2895_v22, %v6985_v41  ;;  %v5800_v41 = vld [vmem:[%s7197_s4 + $0x368] sm:$0xff]   ;;  %v2096_v45 = vpack.c.bf16 %v1945_v9, %v1942_v11  ;;  %v5806_v11 = vld [vmem:[%s7197_s4 + $0x3f8] sm:$0xff]  }
 0x3c6   : > { %v1947_v20 = vpop.f32.mrf.mxu1 }
 0x3c7   : > { %5374 = vmatpush3.bf16.msra.mxu0 %v5793_v13 }
 0x3c8   : > { %v1950_v23 = vpop.f32.mrf.mxu1  ;;  %5375 = vmatprep.subr.bf16.mxu0 %v5794_v58 }
 0x3ca   : > { %v1952_v27 = vpop.f32.mrf.mxu1 }
 0x3cb   : > { %5376 = vmatpush3.bf16.msra.mxu0 %v5794_v58 }
 0x3cc   : > { %v1953_v29 = vpop.f32.mrf.mxu1  ;;  %5377 = vmatprep.subr.bf16.mxu0 %v5795_v25 }
 0x3cd   : > { %v2097_v51 = vpack.c.bf16 %v1953_v29, %v1950_v23 }
 0x3ce   : > { %v1955_v31 = vpop.f32.mrf.mxu1 }
 0x3cf   : > { %5378 = vmatpush3.bf16.msra.mxu0 %v5795_v25  ;;  %v5808_v25 = vld [vmem:[%s7197_s4 + $0x3e8] sm:$0xff]  }
 0x3d0   : > { %v7047_v33 = vpop.f32.mrf.mxu1  ;;  %5379 = vmatprep.subr.bf16.mxu0 %v5796_v30 }
 0x3d2   : > { %v1960_v26 = vpop.f32.mrf.mxu1 }
 0x3d3   : > { %5380 = vmatpush3.bf16.msra.mxu0 %v5796_v30 }
 0x3d4   : > { %v7054_v17 = vpop.f32.mrf.mxu1  ;;  %5389 = vmatprep.subr.bf16.mxu0 %v5797_v36 }
 0x3d5   : > { %v2098_v13 = vpack.c.bf16 %v7054_v17, %v7047_v33  ;;  %v5809_v17 = vld [vmem:[%s7197_s4 + $0x3e0] sm:$0xff]  }
 0x3d6   : > { %v1963_v37 = vpop.f32.mrf.mxu1  ;;  %v5239_v38 = vpop.f32.mrf.mxu0  ;;  %5382 = vmatmul.mubr.bf16.vlgmr.msra.gmra.mxu0 %v2094_v28 }
 0x3d7   : > { %v7060_v39 = vadd.f32 %v5239_v38, %v7006_v60  ;;  %5385 = vmatprep.mubr.bf16.mxu0 %v2095_v21  ;;  %5390 = vmatpush3.bf16.msra.mxu0 %v5797_v36 }
 0x3d8   : > { %v7062_v32 = vpop.f32.mrf.mxu1  ;;  %v3013_v40 = vpop.f32.mrf.mxu0  ;;  %5391 = vmatprep.subr.bf16.mxu0 %v5798_v19 }
 0x3d9   : > { %v7068_v44 = vadd.f32 %v3013_v40, %v7012_v63  ;;  %v5810_v40 = vld [vmem:[%s7197_s4 + $0x3d8] sm:$0xff]  }
 0x3da   : > { %v1968_v46 = vpop.f32.mrf.mxu1  ;;  %v5240_v47 = vpop.f32.mrf.mxu0 }
 0x3db   : > { %v7071_v48 = vadd.f32 %v5240_v47, %v7015_v35  ;;  %5392 = vmatpush3.bf16.msra.mxu0 %v5798_v19 }
 0x3dc   : > { %v1969_v49 = vpop.f32.mrf.mxu1  ;;  %v3016_v50 = vpop.f32.mrf.mxu0  ;;  %5393 = vmatprep.subr.bf16.mxu0 %v5800_v41 }
 0x3dd   : > { %v7077_v52 = vadd.f32 %v3016_v50, %v7021_v6  ;;  %v5805_v6 = vld [vmem:[%s7197_s4 + $0x340] sm:$0xff]   ;;  %v2099_v14 = vpack.c.bf16 %v1969_v49, %v7062_v32  ;;  %v5811_v50 = vld [vmem:[%s7197_s4 + $0x3d0] sm:$0xff]  }
 0x3de   : > { %v1971_v53 = vpop.f32.mrf.mxu1  ;;  %v5243_v54 = vpop.f32.mrf.mxu0  ;;  %5386 = vmatmul.mubr.bf16.gmra.mxu0 %v2096_v45 }
 0x3df   : > { %v7080_v56 = vadd.f32 %v5243_v54, %v7024_v10  ;;  %5394 = vmatpush3.bf16.msra.mxu0 %v5800_v41  ;;  %5405 = vmatprep.mubr.bf16.mxu0 %v2097_v51 }
 0x3e0   : > { %v7082_v57 = vpop.f32.mrf.mxu1  ;;  %v3029_v59 = vpop.f32.mrf.mxu0  ;;  %5395 = vmatprep.subr.bf16.mxu0 %v5801_v42 }
 0x3e1   : > { %v7088_v60 = vadd.f32 %v3029_v59, %v7030_v15 }
 0x3e2   : > { %v1976_v55 = vpop.f32.mrf.mxu1  ;;  %v5244_v61 = vpop.f32.mrf.mxu0 }
 0x3e3   : > { %v7091_v62 = vadd.f32 %v5244_v61, %v7033_v24  ;;  %5396 = vmatpush3.bf16.msra.mxu0 %v5801_v42  ;;  %v5807_v24 = vld [vmem:[%s7197_s4 + $0x3f0] sm:$0xff]  }
 0x3e4   : > { %v1977_v63 = vpop.f32.mrf.mxu1  ;;  %v3032_v34 = vpop.f32.mrf.mxu0  ;;  %5397 = vmatprep.subr.bf16.mxu0 %v5802_v43 }
 0x3e5   : > { %v7097_v35 = vadd.f32 %v3032_v34, %v7039_v18  ;;  %v2100_v31 = vpack.c.bf16 %v1977_v63, %v7082_v57  ;;  %v5813_v57 = vld [vmem:[%s7197_s4 + $0x3c0] sm:$0xff]  }
 0x3e6   : > { %v1979_v1 = vpop.f32.mrf.mxu1 }
 0x3e7   : > { %5398 = vmatpush3.bf16.msra.mxu0 %v5802_v43 }
 0x3e8   : > { %v1982_v2 = vpop.f32.mrf.mxu1  ;;  %5399 = vmatprep.subr.bf16.mxu0 %v5803_v0 }
 0x3ea   : > { %v1984_v4 = vpop.f32.mrf.mxu1 }
 0x3eb   : > { %5400 = vmatpush3.bf16.msra.mxu0 %v5803_v0 }
 0x3ec   : > { %v1985_v5 = vpop.f32.mrf.mxu1  ;;  %5401 = vmatprep.subr.bf16.mxu0 %v5804_v3 }
 0x3ed   : > { %v2101_v7 = vpack.c.bf16 %v1985_v5, %v1982_v2 }
 0x3ee   : > { %v1987_v8 = vpop.f32.mrf.mxu1 }
 0x3ef   : > { %5402 = vmatpush3.bf16.msra.mxu0 %v5804_v3  ;;  %5429 = vmatprep.mubr.bf16.mxu1 %v2101_v7 }
 0x3f0   : > { %v1990_v10 = vpop.f32.mrf.mxu1  ;;  %5403 = vmatprep.subr.bf16.mxu0 %v5805_v6 }
 0x3f2   : > { %v1992_v12 = vpop.f32.mrf.mxu1 }
 0x3f3   : > { %5404 = vmatpush3.bf16.msra.mxu0 %v5805_v6 }
 0x3f4   : > { %v1993_v15 = vpop.f32.mrf.mxu1  ;;  %5437 = vmatprep.subr.bf16.mxu0 %v5806_v11 }
 0x3f5   : > { %v2102_v16 = vpack.c.bf16 %v1993_v15, %v1990_v10 }
 0x3f6   : > { %v1995_v9 = vpop.f32.mrf.mxu1  ;;  %v5263_v22 = vpop.f32.mrf.mxu0  ;;  %5406 = vmatmul.mubr.bf16.vlgmr.msra.gmra.mxu0 %v2098_v13 }
 0x3f7   : > { %v7115_v58 = vadd.f32 %v5263_v22, %v7060_v39  ;;  %5409 = vmatprep.mubr.bf16.mxu0 %v2099_v14  ;;  %5430 = vmatmul.mubr.bf16.vlgmr.msra.gmra.mxu1 %v2102_v16 }
 0x3f8   : > { %v1998_v18 = vpop.f32.mrf.mxu1  ;;  %v3150_v20 = vpop.f32.mrf.mxu0  ;;  %5438 = vmatpush3.bf16.msra.mxu0 %v5806_v11 }
 0x3f9   : > { %v3181_v23 = vadd.f32 %v3150_v20, %v7068_v44  ;;  %5439 = vmatprep.subr.bf16.mxu0 %v5807_v24 }
 0x3fa   : > { %v2000_v27 = vpop.f32.mrf.mxu1  ;;  %v5264_v29 = vpop.f32.mrf.mxu0 }
 0x3fb   : > { %v3184_v30 = vadd.f32 %v5264_v29, %v7071_v48 }
 0x3fc   : > { %v2001_v33 = vpop.f32.mrf.mxu1  ;;  %v3153_v36 = vpop.f32.mrf.mxu0  ;;  %5440 = vmatpush3.bf16.msra.mxu0 %v5807_v24 }
 0x3fd   : > { %v2103_v26 = vpack.c.bf16 %v2001_v33, %v1998_v18  ;;  %v3182_v28 = vadd.f32 %v3153_v36, %v7077_v52  ;;  %5441 = vmatprep.subr.bf16.mxu0 %v5808_v25  ;;  %v5812_v52 = vld [vmem:[%s7197_s4 + $0x3c8] sm:$0xff]  }
 0x3fe   : > { %v2003_v19 = vpop.f32.mrf.mxu1  ;;  %v5267_v21 = vpop.f32.mrf.mxu0  ;;  %5410 = vmatmul.mubr.bf16.gmra.mxu0 %v2100_v31 }
 0x3ff   : > { %v3187_v37 = vadd.f32 %v5267_v21, %v7080_v56  ;;  %5433 = vmatprep.mubr.bf16.mxu1 %v2103_v26 }
 0x400   : > { %v2006_v38 = vpop.f32.mrf.mxu1  ;;  %v3166_v39 = vpop.f32.mrf.mxu0  ;;  %5442 = vmatpush3.bf16.msra.mxu0 %v5808_v25 }
 0x401   : > { %v3185_v32 = vadd.f32 %v3166_v39, %v7088_v60  ;;  %5443 = vmatprep.subr.bf16.mxu0 %v5809_v17 }
 0x402   : > { %v2008_v41 = vpop.f32.mrf.mxu1  ;;  %v5268_v44 = vpop.f32.mrf.mxu0 }
 0x403   : > { %v3188_v46 = vadd.f32 %v5268_v44, %v7091_v62 }
 0x404   : > { %v2009_v47 = vpop.f32.mrf.mxu1  ;;  %v3169_v48 = vpop.f32.mrf.mxu0  ;;  %5444 = vmatpush3.bf16.msra.mxu0 %v5809_v17 }
 0x405   : > { %v2104_v45 = vpack.c.bf16 %v2009_v47, %v2006_v38  ;;  %v3186_v49 = vadd.f32 %v3169_v48, %v7097_v35  ;;  %5445 = vmatprep.subr.bf16.mxu0 %v5810_v40 }
 0x406   : > { %v2011_v42 = vpop.f32.mrf.mxu1 }
 0x407   : > { %5434 = vmatmul.mubr.bf16.gmra.mxu1 %v2104_v45 }
 0x408   : > { %v2014_v51 = vpop.f32.mrf.mxu1  ;;  %5446 = vmatpush3.bf16.msra.mxu0 %v5810_v40 }
 0x409   : > { %5447 = vmatprep.subr.bf16.mxu0 %v5811_v50 }
 0x40a   : > { %v2016_v53 = vpop.f32.mrf.mxu1 }
 0x40c   : > { %v2017_v54 = vpop.f32.mrf.mxu1  ;;  %5448 = vmatpush3.bf16.msra.mxu0 %v5811_v50 }
 0x40d   : > { %v2105_v56 = vpack.c.bf16 %v2017_v54, %v2014_v51  ;;  %5449 = vmatprep.subr.bf16.mxu0 %v5812_v52 }
 0x40e   : > { %v2019_v59 = vpop.f32.mrf.mxu1 }
 0x40f   : > { %5453 = vmatprep.mubr.bf16.mxu0 %v2105_v56 }
 0x410   : > { %v2022_v43 = vpop.f32.mrf.mxu1  ;;  %5450 = vmatpush3.bf16.msra.mxu0 %v5812_v52 }
 0x411   : > { %5451 = vmatprep.subr.bf16.mxu0 %v5813_v57 }
 0x412   : > { %v2024_v60 = vpop.f32.mrf.mxu1 }
 0x414   : > { %v2025_v55 = vpop.f32.mrf.mxu1  ;;  %5452 = vmatpush3.bf16.msra.mxu0 %v5813_v57 }
 0x415   : > { %v2106_v61 = vpack.c.bf16 %v2025_v55, %v2022_v43 }
 0x416   : > { %v2027_v62 = vpop.f32.mrf.mxu1  ;;  %v5287_v63 = vpop.f32.mrf.mxu0 }
 0x417   : > { %v3320_v34 = vadd.f32 %v5287_v63, %v7115_v58  ;;  %5454 = vmatmul.mubr.bf16.vlgmr.msra.gmra.mxu0 %v2106_v61 }
 0x418   : > { %v2030_v0 = vpop.f32.mrf.mxu1  ;;  %v3287_v35 = vpop.f32.mrf.mxu0 }
 0x419   : > { %v3318_v1 = vadd.f32 %v3287_v35, %v3181_v23 }
 0x41a   : > { %v2032_v2 = vpop.f32.mrf.mxu1  ;;  %v5288_v3 = vpop.f32.mrf.mxu0 }
 0x41b   : > { %v3321_v4 = vadd.f32 %v5288_v3, %v3184_v30 }
 0x41c   : > { %v2033_v5 = vpop.f32.mrf.mxu1  ;;  %v3290_v6 = vpop.f32.mrf.mxu0 }
 0x41d   : > { %v2107_v7 = vpack.c.bf16 %v2033_v5, %v2030_v0  ;;  %v3319_v8 = vadd.f32 %v3290_v6, %v3182_v28 }
 0x41e   : > { %v2035_v10 = vpop.f32.mrf.mxu1  ;;  %v5291_v11 = vpop.f32.mrf.mxu0 }
 0x41f   : > { %v3324_v12 = vadd.f32 %v5291_v11, %v3187_v37  ;;  %5457 = vmatprep.mubr.bf16.mxu0 %v2107_v7 }
 0x420   : > { %v2038_v13 = vpop.f32.mrf.mxu1  ;;  %v3303_v15 = vpop.f32.mrf.mxu0 }
 0x421   : > { %v3322_v14 = vadd.f32 %v3303_v15, %v3185_v32 }
 0x422   : > { %v2040_v16 = vpop.f32.mrf.mxu1  ;;  %v5292_v24 = vpop.f32.mrf.mxu0 }
 0x423   : > { %v3325_v9 = vadd.f32 %v5292_v24, %v3188_v46 }
 0x424   : > { %v2041_v22 = vpop.f32.mrf.mxu1  ;;  %v3306_v58 = vpop.f32.mrf.mxu0 }
 0x425   : > { %v2108_v18 = vpack.c.bf16 %v2041_v22, %v2038_v13  ;;  %v3323_v20 = vadd.f32 %v3306_v58, %v3186_v49 }
 0x426   : > { %v2043_v23 = vpop.f32.mrf.mxu1 }
 0x427   : > { %5458 = vmatmul.mubr.bf16.gmra.mxu0 %v2108_v18 }
 0x436   : > { %v5311_v25 = vpop.f32.mrf.mxu0 }
 0x437   : > { %v3457_v27 = vadd.f32 %v5311_v25, %v3320_v34 }
 0x438   : > { %v3424_v29 = vpop.f32.mrf.mxu0 }
 0x439   : > { %v3455_v30 = vadd.f32 %v3424_v29, %v3318_v1 }
 0x43a   : > { %v5312_v31 = vpop.f32.mrf.mxu0 }
 0x43b   : > { %v3458_v33 = vadd.f32 %v5312_v31, %v3321_v4 }
 0x43c   : > { %v3427_v36 = vpop.f32.mrf.mxu0 }
 0x43d   : > { %v3456_v26 = vadd.f32 %v3427_v36, %v3319_v8 }
 0x43e   : > { %v5315_v28 = vpop.f32.mrf.mxu0 }
 0x43f   : > { %v3461_v17 = vadd.f32 %v5315_v28, %v3324_v12 }
 0x440   : > { %v3440_v19 = vpop.f32.mrf.mxu0 }
 0x441   : > { %v3459_v21 = vadd.f32 %v3440_v19, %v3322_v14 }
 0x442   : > { %v5316_v37 = vpop.f32.mrf.mxu0 }
 0x443   : > { %v7144_v38 = vadd.f32 %v5316_v37, %v3325_v9 }
 0x444   : > { %v3443_v39 = vpop.f32.mrf.mxu0 }
 0x445   : > { %v7146_v32 = vadd.f32 %v3443_v39, %v3323_v20 }
 0x456   : > { %v5335_v40 = vpop.f32.mrf.mxu0 }
 0x457   : > { %v3594_v6 = vadd.f32 %v5335_v40, %v3457_v27 }
 0x458   : > { %v3561_v41 = vpop.f32.mrf.mxu0 }
 0x459   : > { %v3592_v10 = vadd.f32 %v3561_v41, %v3455_v30 }
 0x45a   : > { %v5336_v44 = vpop.f32.mrf.mxu0 }
 0x45b   : > { %v3595_v12 = vadd.f32 %v5336_v44, %v3458_v33 }
 0x45c   : > { %v3564_v46 = vpop.f32.mrf.mxu0 }
 0x45d   : > { %v3593_v24 = vadd.f32 %v3564_v46, %v3456_v26  ;;  %v4753_v26 = vld [vmem:[%s7198_s5] ss:$0 sm:$0xff] }
 0x45e   : > { %v5339_v47 = vpop.f32.mrf.mxu0 }
 0x45f   : > { %v7148_v48 = vadd.f32 %v5339_v47, %v3461_v17 }
 0x460   : > { %v3577_v45 = vpop.f32.mrf.mxu0 }
 0x461   : > { %v7150_v49 = vadd.f32 %v3577_v45, %v3459_v21 }
 0x462   : > { %v7152_v50 = vpop.f32.mrf.mxu0 }
 0x464   : > { %v7154_v42 = vpop.f32.mrf.mxu0 }
 0x476   : > { %v5359_v51 = vpop.f32.mrf.mxu0 }
 0x477   : > { %v3731_v11 = vadd.f32 %v5359_v51, %v3594_v6 }
 0x478   : > { %v3698_v52 = vpop.f32.mrf.mxu0 }
 0x479   : > { %v3729_v13 = vadd.f32 %v3698_v52, %v3592_v10 }
 0x47a   : > { %v5360_v53 = vpop.f32.mrf.mxu0 }
 0x47b   : > { %v3732_v9 = vadd.f32 %v5360_v53, %v3595_v12 }
 0x47c   : > { %v3701_v54 = vpop.f32.mrf.mxu0 }
 0x47d   : > { %v3730_v18 = vadd.f32 %v3701_v54, %v3593_v24 }
 0x47e   : > { %v5363_v56 = vpop.f32.mrf.mxu0 }
 0x47f   : > { %v3735_v54 = vadd.f32 %v5363_v56, %v7148_v48  ;;  %v3597_v56 = vadd.f32 %v7154_v42, %v7146_v32 }
 0x480   : > { %v3714_v57 = vpop.f32.mrf.mxu0 }
 0x482   : > { %v7156_v59 = vpop.f32.mrf.mxu0 }
 0x484   : > { %v7158_v43 = vpop.f32.mrf.mxu0 }
 0x485   : > { %v3734_v10 = vadd.f32 %v7158_v43, %v3597_v56 }
 0x496   : > { %v5383_v60 = vpop.f32.mrf.mxu0 }
 0x497   : > { %v3868_v15 = vadd.f32 %v5383_v60, %v3731_v11 }
 0x498   : > { %v3835_v55 = vpop.f32.mrf.mxu0 }
 0x499   : > { %v3866_v22 = vadd.f32 %v3835_v55, %v3729_v13 }
 0x49a   : > { %v5384_v61 = vpop.f32.mrf.mxu0 }
 0x49b   : > { %v3869_v20 = vadd.f32 %v5384_v61, %v3732_v9 }
 0x49c   : > { %v3838_v62 = vpop.f32.mrf.mxu0 }
 0x49d   : > { %v3867_v31 = vadd.f32 %v3838_v62, %v3730_v18  ;;  %v3599_v62 = vadd.f32 %v7152_v50, %v7144_v38 }
 0x49e   : > { %v5387_v63 = vpop.f32.mrf.mxu0 }
 0x4a0   : > { %v7160_v34 = vpop.f32.mrf.mxu0 }
 0x4a2   : > { %v7162_v0 = vpop.f32.mrf.mxu0 }
 0x4a4   : > { %v7164_v35 = vpop.f32.mrf.mxu0 }
 0x4b6   : > { %v5407_v1 = vpop.f32.mrf.mxu0 }
 0x4b7   : > { %v5431_v7 = vpop.f32.mrf.mxu1  ;;  %v4005_v58 = vadd.f32 %v5407_v1, %v3868_v15  ;;  %v3733_v1 = vadd.f32 %v3714_v57, %v7150_v49  ;;  %v3871_v15 = vadd.f32 %v7164_v35, %v3734_v10 }
 0x4b8   : > { %v3972_v2 = vpop.f32.mrf.mxu0 }
 0x4b9   : > { %v4109_v14 = vpop.f32.mrf.mxu1  ;;  %v4003_v23 = vadd.f32 %v3972_v2, %v3866_v22  ;;  %v4142_v27 = vadd.f32 %v5431_v7, %v4005_v58  ;;  %v3736_v7 = vadd.f32 %v7156_v59, %v3599_v62  ;;  %v3870_v38 = vadd.f32 %v7160_v34, %v3733_v1 }
 0x4ba   : > { %v5408_v3 = vpop.f32.mrf.mxu0 }
 0x4bb   : > { %v5432_v25 = vpop.f32.mrf.mxu1  ;;  %v4006_v36 = vadd.f32 %v5408_v3, %v3869_v20  ;;  %v4140_v30 = vadd.f32 %v4109_v14, %v4003_v23  ;;  %v3872_v3 = vadd.f32 %v5387_v63, %v3735_v54  ;;  %v3873_v11 = vadd.f32 %v7162_v0, %v3736_v7 }
 0x4bc   : > { %v3975_v4 = vpop.f32.mrf.mxu0 }
 0x4bd   : > { %v4004_v33 = vadd.f32 %v3975_v4, %v3867_v31  ;;  %v4112_v19 = vpop.f32.mrf.mxu1  ;;  %v4143_v37 = vadd.f32 %v5432_v25, %v4006_v36 }
 0x4be   : > { %v5411_v5 = vpop.f32.mrf.mxu0 }
 0x4bf   : > { %v4141_v41 = vadd.f32 %v4112_v19, %v4004_v33  ;;  %v4009_v49 = vadd.f32 %v5411_v5, %v3872_v3 }
 0x4c0   : > { %v3988_v8 = vpop.f32.mrf.mxu0 }
 0x4c1   : > { %v4007_v12 = vadd.f32 %v3988_v8, %v3870_v38 }
 0x4c2   : > { %v5412_v16 = vpop.f32.mrf.mxu0 }
 0x4c3   : > { %v4010_v14 = vadd.f32 %v5412_v16, %v3873_v11 }
 0x4c4   : > { %v3991_v29 = vpop.f32.mrf.mxu0 }
 0x4c5   : > { %v4008_v34 = vadd.f32 %v3991_v29, %v3871_v15 }
 0x4c7   : > { %v5435_v47 = vpop.f32.mrf.mxu1 }
 0x4c8   : > { %v4146_v63 = vadd.f32 %v5435_v47, %v4009_v49 }
 0x4c9   : > { %v4125_v2 = vpop.f32.mrf.mxu1 }
 0x4ca   : > { %v4144_v32 = vadd.f32 %v4125_v2, %v4007_v12 }
 0x4cb   : > { %v5436_v57 = vpop.f32.mrf.mxu1 }
 0x4cc   : > { %v4147_v5 = vadd.f32 %v5436_v57, %v4010_v14 }
 0x4cd   : > { %v4128_v59 = vpop.f32.mrf.mxu1 }
 0x4ce   : > { %v4145_v43 = vadd.f32 %v4128_v59, %v4008_v34 }
 0x4d7   : > { %v5455_v28 = vpop.f32.mrf.mxu0 }
 0x4d8   : > { %v4279_v17 = vadd.f32 %v5455_v28, %v4142_v27 }
 0x4d9   : > { %v4246_v21 = vpop.f32.mrf.mxu0 }
 0x4da   : > { %v4277_v39 = vadd.f32 %v4246_v21, %v4140_v30  ;;  %v4294_v44 = vadd.f32 %v4753_v26, %v4279_v17 }
 0x4db   : > { %v5456_v40 = vpop.f32.mrf.mxu0 }
 0x4dc   : > { %v4280_v46 = vadd.f32 %v5456_v40, %v4143_v37  ;;  %v4292_v51 = vadd.f32 %v4753_v26, %v4277_v39  ;;  %v4302_v60 = vmax.f32 %v4294_v44, 0.0 }
 0x4dd   : > { %v4249_v45 = vpop.f32.mrf.mxu0 }
 0x4de   : > { %v4295_v52 = vadd.f32 %v4753_v26, %v4280_v46  ;;  %v4278_v53 = vadd.f32 %v4249_v45, %v4141_v41  ;;  %v4300_v4 = vmax.f32 %v4292_v51, 0.0 }
 0x4e0   : > { %v4303_v55 = vmax.f32 %v4295_v52, 0.0  ;;  %v4293_v61 = vadd.f32 %v4753_v26, %v4278_v53 }
 0x4e2   : > { %v4781_v6 = vpack.c.bf16 %v4303_v55, %v4302_v60  ;;  %v4301_v48 = vmax.f32 %v4293_v61, 0.0 }
 0x4e4   : > { %4793 = vst [vmem:[%s7177_s10 + $0x8] sm:$0xff] %v4781_v6   ;;  %v4776_v50 = vpack.c.bf16 %v4301_v48, %v4300_v4 }
 0x4e6   : > { %4777 = vst [vmem:[%s7177_s10] sm:$0xff] %v4776_v50  }
 0x4e7   : > { %v5459_v13 = vpop.f32.mrf.mxu0 }
 0x4e8   : > { %v4283_v42 = vadd.f32 %v5459_v13, %v4146_v63 }
 0x4e9   : > { %v4262_v24 = vpop.f32.mrf.mxu0 }
 0x4ea   : > { %v4281_v9 = vadd.f32 %v4262_v24, %v4144_v32  ;;  %v4298_v58 = vadd.f32 %v4753_v26, %v4283_v42 }
 0x4eb   : > { %v5460_v22 = vpop.f32.mrf.mxu0 }
 0x4ec   : > { %v4284_v0 = vadd.f32 %v5460_v22, %v4147_v5  ;;  %v4296_v18 = vadd.f32 %v4753_v26, %v4281_v9  ;;  %v4306_v25 = vmax.f32 %v4298_v58, 0.0 }
 0x4ed   : > { %v4265_v8 = vpop.f32.mrf.mxu0 }
 0x4ee   : > { %v4299_v20 = vadd.f32 %v4753_v26, %v4284_v0  ;;  %v4282_v23 = vadd.f32 %v4265_v8, %v4145_v43  ;;  %v4304_v31 = vmax.f32 %v4296_v18, 0.0 }
 0x4f0   : > { %v4307_v35 = vmax.f32 %v4299_v20, 0.0  ;;  %v4297_v16 = vadd.f32 %v4753_v26, %v4282_v23 }
 0x4f2   : > { %v4791_v27 = vpack.c.bf16 %v4307_v35, %v4306_v25  ;;  %v4305_v36 = vmax.f32 %v4297_v16, 0.0 }
 0x4f4   : > { %4795 = vst [vmem:[%s7177_s10 + $0x18] sm:$0xff] %v4791_v27   ;;  %v4786_v29 = vpack.c.bf16 %v4305_v36, %v4304_v31 }
 0x4f6   : > { %4794 = vst [vmem:[%s7177_s10 + $0x10] sm:$0xff] %v4786_v29  }
 0x4f7 PF: > { %s16_s21 = sadd.s32 1, %s5820_s21  }
 0x4f8   : > { %p13_p4 = scmp.ge.s32.totalorder %s16_s21, 4  }
 0x4fa   :  { %15 = sbr.rel (!%p13_p4) target bundleno = 1 (0x1), region = 74 }

// kernel: clf_img_forward.3
= control target key start
LH: loop header
LB: loop body
LE: loop exit
PB: predicated region body
PF: predicated region fallthrough
CT: control target
= control target key end

     0   :  { %vm7698_vm0 = vmmov 0   ;;  %s9421_s1 = inlined_call_operand.vmem [shape: bf16[8192,128], index: 1, kind: input, shape index: {}]   ;;  %s9422_s0 = inlined_call_operand.vmem [shape: bf16[8,8192], index: 0, kind: input, shape index: {}]   ;;  %s9423_s2 = inlined_call_operand.vmem [shape: f32[1,128], index: 2, kind: input, shape index: {}]   ;;  %s9424_s3 = inlined_call_operand.vmem [shape: bf16[128,128], index: 3, kind: input, shape index: {}]   ;;  %s9425_s4 = inlined_call_operand.vmem [shape: f32[1,128], index: 4, kind: input, shape index: {}]   ;;  %s9426_s5 = inlined_call_operand.vmem [shape: f32[8,128], index: 5, kind: output, shape index: {}]  }
   0x1   :  { %v7109_v0 = vld [vmem:[%s9421_s1 + $0x78] sm:$0xff]   ;;  %v7113_v4 = vld [vmem:[%s9421_s1 + $0x70] sm:$0xff]   ;;  %v7117_v8 = vld [vmem:[%s9421_s1 + $0x68] sm:$0xff]  }
   0x2   :  { %v7110_v1 = vld [vmem:[%s9421_s1 + $0xf8] sm:$0xff]   ;;  %6374 = vmatprep.subr.bf16.mxu0 %v7109_v0  ;;  %v7114_v5 = vld [vmem:[%s9421_s1 + $0xf0] sm:$0xff]   ;;  %v7118_v9 = vld [vmem:[%s9421_s1 + $0xe8] sm:$0xff]  }
   0x3   :  { %v7111_v2 = vld [vmem:[%s9421_s1 + $0x38] sm:$0xff]   ;;  %6396 = vmatprep.subr.bf16.mxu1 %v7110_v1  ;;  %v7115_v6 = vld [vmem:[%s9421_s1 + $0x30] sm:$0xff]   ;;  %v7119_v10 = vld [vmem:[%s9421_s1 + $0x28] sm:$0xff]  }
   0x4   :  { %v7112_v3 = vld [vmem:[%s9421_s1 + $0xb8] sm:$0xff]   ;;  %6375 = vmatpush3.bf16.msra.mxu0 %v7111_v2  ;;  %v7116_v7 = vld [vmem:[%s9421_s1 + $0xb0] sm:$0xff]   ;;  %v7120_v11 = vld [vmem:[%s9421_s1 + $0xa8] sm:$0xff]  }
   0x5   :  { %6397 = vmatpush3.bf16.msra.mxu1 %v7112_v3  ;;  %6376 = vmatprep.subr.bf16.mxu0 %v7113_v4  ;;  %v7121_v12 = vld [vmem:[%s9421_s1 + $0x60] sm:$0xff]   ;;  %v7125_v16 = vld [vmem:[%s9421_s1 + $0x58] sm:$0xff]   ;;  %v7129_v20 = vld [vmem:[%s9421_s1 + $0x50] sm:$0xff]  }
   0x6   :  { %6398 = vmatprep.subr.bf16.mxu1 %v7114_v5  ;;  %v7122_v13 = vld [vmem:[%s9421_s1 + $0xe0] sm:$0xff]   ;;  %v7126_v17 = vld [vmem:[%s9421_s1 + $0xd8] sm:$0xff]   ;;  %v7130_v21 = vld [vmem:[%s9421_s1 + $0xd0] sm:$0xff]  }
   0x7   :  { %v7123_v14 = vld [vmem:[%s9421_s1 + $0x20] sm:$0xff]   ;;  %v7127_v18 = vld [vmem:[%s9421_s1 + $0x18] sm:$0xff]   ;;  %v7131_v22 = vld [vmem:[%s9421_s1 + $0x10] sm:$0xff]  }
   0x8   :  { %6377 = vmatpush3.bf16.msra.mxu0 %v7115_v6  ;;  %v7124_v15 = vld [vmem:[%s9421_s1 + $0xa0] sm:$0xff]   ;;  %v7128_v19 = vld [vmem:[%s9421_s1 + $0x98] sm:$0xff]   ;;  %v7132_v23 = vld [vmem:[%s9421_s1 + $0x90] sm:$0xff]  }
   0x9   :  { %6399 = vmatpush3.bf16.msra.mxu1 %v7116_v7  ;;  %6378 = vmatprep.subr.bf16.mxu0 %v7117_v8  ;;  %v7133_v24 = vld [vmem:[%s9421_s1 + $0x48] sm:$0xff]   ;;  %v7137_v28 = vld [vmem:[%s9421_s1 + $0x40] sm:$0xff]   ;;  %v7145_v38 = vld [vmem:[%s9421_s1 + $0x178] sm:$0xff]  }
   0xa   :  { %6400 = vmatprep.subr.bf16.mxu1 %v7118_v9  ;;  %v7134_v25 = vld [vmem:[%s9421_s1 + $0xc8] sm:$0xff]   ;;  %v7138_v29 = vld [vmem:[%s9421_s1 + $0xc0] sm:$0xff]   ;;  %v7146_v39 = vld [vmem:[%s9421_s1 + $0x1f8] sm:$0xff]  }
   0xb   :  { %v7135_v26 = vld [vmem:[%s9421_s1 + $0x8] sm:$0xff]   ;;  %v7139_v30 = vld [vmem:[%s9421_s1] sm:$0xff]   ;;  %v7147_v40 = vld [vmem:[%s9421_s1 + $0x138] sm:$0xff]  }
   0xc   :  { %6379 = vmatpush3.bf16.msra.mxu0 %v7119_v10  ;;  %v7136_v27 = vld [vmem:[%s9421_s1 + $0x88] sm:$0xff]   ;;  %v7140_v31 = vld [vmem:[%s9421_s1 + $0x80] sm:$0xff]   ;;  %v7148_v41 = vld [vmem:[%s9421_s1 + $0x1b8] sm:$0xff]  }
   0xd   :  { %6401 = vmatpush3.bf16.msra.mxu1 %v7120_v11  ;;  %6380 = vmatprep.subr.bf16.mxu0 %v7121_v12  ;;  %v21_v32 = vld [vmem:[%s9422_s0] sm:$0xff]  ;;  %v22_v33 = vld [vmem:[%s9422_s0 + $0x8] sm:$0xff]  ;;  %v7149_v42 = vld [vmem:[%s9421_s1 + $0x170] sm:$0xff]  }
   0xe   :  { %6402 = vmatprep.subr.bf16.mxu1 %v7122_v13  ;;  %v5789_v34 = vcombine.low %v21_v32, %v21_v32  ;;  %v5790_v35 = vcombine.high %v21_v32, %v21_v32  ;;  %v5791_v36 = vcombine.low %v22_v33, %v22_v33  ;;  %v5792_v37 = vcombine.high %v22_v33, %v22_v33  ;;  %v7150_v43 = vld [vmem:[%s9421_s1 + $0x1f0] sm:$0xff]   ;;  %v7153_v46 = vld [vmem:[%s9421_s1 + $0x168] sm:$0xff]   ;;  %v7157_v50 = vld [vmem:[%s9421_s1 + $0x160] sm:$0xff]  }
   0xf   :  { %v7151_v44 = vld [vmem:[%s9421_s1 + $0x130] sm:$0xff]   ;;  %v7154_v47 = vld [vmem:[%s9421_s1 + $0x1e8] sm:$0xff]   ;;  %v7158_v51 = vld [vmem:[%s9421_s1 + $0x1e0] sm:$0xff]  }
  0x10   :  { %6381 = vmatpush3.bf16.msra.mxu0 %v7123_v14  ;;  %4412 = vmatprep.mubr.bf16.mxu0 %v5790_v35  ;;  %v7152_v45 = vld [vmem:[%s9421_s1 + $0x1b0] sm:$0xff]   ;;  %v7155_v48 = vld [vmem:[%s9421_s1 + $0x128] sm:$0xff]   ;;  %v7159_v52 = vld [vmem:[%s9421_s1 + $0x120] sm:$0xff]  }
  0x11   :  { %6403 = vmatpush3.bf16.msra.mxu1 %v7124_v15  ;;  %6382 = vmatprep.subr.bf16.mxu0 %v7125_v16  ;;  %v7156_v49 = vld [vmem:[%s9421_s1 + $0x1a8] sm:$0xff]   ;;  %v7160_v53 = vld [vmem:[%s9421_s1 + $0x1a0] sm:$0xff]   ;;  %v7161_v54 = vld [vmem:[%s9421_s1 + $0x158] sm:$0xff]  }
  0x12   :  { %6404 = vmatprep.subr.bf16.mxu1 %v7126_v17  ;;  %4452 = vmatprep.mubr.bf16.mxu1 %v5792_v37  ;;  %v7162_v55 = vld [vmem:[%s9421_s1 + $0x1d8] sm:$0xff]   ;;  %v7165_v58 = vld [vmem:[%s9421_s1 + $0x150] sm:$0xff]   ;;  %v7169_v62 = vld [vmem:[%s9421_s1 + $0x148] sm:$0xff]  }
  0x13   :  { %v7163_v56 = vld [vmem:[%s9421_s1 + $0x118] sm:$0xff]   ;;  %v7166_v59 = vld [vmem:[%s9421_s1 + $0x1d0] sm:$0xff]   ;;  %v7170_v63 = vld [vmem:[%s9421_s1 + $0x1c8] sm:$0xff]  }
  0x14   :  { %6383 = vmatpush3.bf16.msra.mxu0 %v7127_v18  ;;  %v7164_v57 = vld [vmem:[%s9421_s1 + $0x198] sm:$0xff]   ;;  %v7167_v60 = vld [vmem:[%s9421_s1 + $0x110] sm:$0xff]   ;;  %v7171_v0 = vld [vmem:[%s9421_s1 + $0x108] sm:$0xff]  }
  0x15   :  { %6405 = vmatpush3.bf16.msra.mxu1 %v7128_v19  ;;  %6384 = vmatprep.subr.bf16.mxu0 %v7129_v20  ;;  %v7168_v61 = vld [vmem:[%s9421_s1 + $0x190] sm:$0xff]   ;;  %v7172_v1 = vld [vmem:[%s9421_s1 + $0x188] sm:$0xff]   ;;  %v7173_v2 = vld [vmem:[%s9421_s1 + $0x140] sm:$0xff]  }
  0x16   :  { %6406 = vmatprep.subr.bf16.mxu1 %v7130_v21  ;;  %v7174_v3 = vld [vmem:[%s9421_s1 + $0x1c0] sm:$0xff]   ;;  %v23_v6 = vld [vmem:[%s9422_s0 + $0x10] sm:$0xff]  ;;  %v24_v9 = vld [vmem:[%s9422_s0 + $0x18] sm:$0xff] }
  0x17   :  { %v7175_v4 = vld [vmem:[%s9421_s1 + $0x100] sm:$0xff]   ;;  %v5793_v7 = vcombine.low %v23_v6, %v23_v6  ;;  %v5794_v8 = vcombine.high %v23_v6, %v23_v6  ;;  %v5795_v10 = vcombine.low %v24_v9, %v24_v9  ;;  %v5796_v11 = vcombine.high %v24_v9, %v24_v9  ;;  %v7181_v12 = vld [vmem:[%s9421_s1 + $0x278] sm:$0xff]   ;;  %v7185_v16 = vld [vmem:[%s9421_s1 + $0x270] sm:$0xff]  }
  0x18   :  { %6385 = vmatpush3.bf16.msra.mxu0 %v7131_v22  ;;  %v7176_v5 = vld [vmem:[%s9421_s1 + $0x180] sm:$0xff]   ;;  %v7182_v13 = vld [vmem:[%s9421_s1 + $0x2f8] sm:$0xff]   ;;  %v7186_v17 = vld [vmem:[%s9421_s1 + $0x2f0] sm:$0xff]  }
  0x19   :  { %6407 = vmatpush3.bf16.msra.mxu1 %v7132_v23  ;;  %6386 = vmatprep.subr.bf16.mxu0 %v7133_v24  ;;  %v7183_v14 = vld [vmem:[%s9421_s1 + $0x238] sm:$0xff]   ;;  %v7187_v18 = vld [vmem:[%s9421_s1 + $0x230] sm:$0xff]   ;;  %v7189_v20 = vld [vmem:[%s9421_s1 + $0x268] sm:$0xff]  }
  0x1a   :  { %6408 = vmatprep.subr.bf16.mxu1 %v7134_v25  ;;  %v7184_v15 = vld [vmem:[%s9421_s1 + $0x2b8] sm:$0xff]   ;;  %v7188_v19 = vld [vmem:[%s9421_s1 + $0x2b0] sm:$0xff]   ;;  %v7190_v21 = vld [vmem:[%s9421_s1 + $0x2e8] sm:$0xff]  }
  0x1b   :  { %v7191_v22 = vld [vmem:[%s9421_s1 + $0x228] sm:$0xff]   ;;  %v7193_v24 = vld [vmem:[%s9421_s1 + $0x260] sm:$0xff]   ;;  %v7201_v32 = vld [vmem:[%s9421_s1 + $0x250] sm:$0xff]  }
  0x1c   :  { %6387 = vmatpush3.bf16.msra.mxu0 %v7135_v26  ;;  %v7192_v23 = vld [vmem:[%s9421_s1 + $0x2a8] sm:$0xff]   ;;  %v7194_v25 = vld [vmem:[%s9421_s1 + $0x2e0] sm:$0xff]   ;;  %v7202_v33 = vld [vmem:[%s9421_s1 + $0x2d0] sm:$0xff]  }
  0x1d   :  { %6409 = vmatpush3.bf16.msra.mxu1 %v7136_v27  ;;  %6388 = vmatprep.subr.bf16.mxu0 %v7137_v28  ;;  %v7195_v26 = vld [vmem:[%s9421_s1 + $0x220] sm:$0xff]   ;;  %v7197_v28 = vld [vmem:[%s9421_s1 + $0x258] sm:$0xff]   ;;  %v7204_v35 = vld [vmem:[%s9421_s1 + $0x290] sm:$0xff]  }
  0x1e   :  { %6410 = vmatprep.subr.bf16.mxu1 %v7138_v29  ;;  %v7196_v27 = vld [vmem:[%s9421_s1 + $0x2a0] sm:$0xff]   ;;  %v7198_v29 = vld [vmem:[%s9421_s1 + $0x2d8] sm:$0xff]   ;;  %v7206_v37 = vld [vmem:[%s9421_s1 + $0x2c8] sm:$0xff]  }
  0x1f   :  { %v7237_v6 = vld [vmem:[%s9421_s1 + $0x350] sm:$0xff]  }
  0x20   :  { %6389 = vmatpush3.bf16.msra.mxu0 %v7139_v30  ;;  %v7199_v30 = vld [vmem:[%s9421_s1 + $0x218] sm:$0xff]   ;;  %v7240_v9 = vld [vmem:[%s9421_s1 + $0x390] sm:$0xff]  }
  0x21   :  { %6411 = vmatpush3.bf16.msra.mxu1 %v7140_v31  ;;  %6418 = vmatprep.subr.bf16.mxu0 %v7145_v38  ;;  %v7200_v31 = vld [vmem:[%s9421_s1 + $0x298] sm:$0xff]   ;;  %v7207_v38 = vld [vmem:[%s9421_s1 + $0x208] sm:$0xff]  }
  0x22   :  { %6440 = vmatprep.subr.bf16.mxu1 %v7146_v39  ;;  %v7208_v39 = vld [vmem:[%s9421_s1 + $0x288] sm:$0xff]  }
  0x23   :  { %4413 = vmatmul.mubr.bf16.vlgmr.msra.gmra.mxu0 %v5789_v34  ;;  %v7203_v34 = vld [vmem:[%s9421_s1 + $0x210] sm:$0xff]  }
  0x24   :  { %4453 = vmatmul.mubr.bf16.vlgmr.msra.gmra.mxu1 %v5791_v36  ;;  %6419 = vmatpush3.bf16.msra.mxu0 %v7147_v40  ;;  %v7205_v36 = vld [vmem:[%s9421_s1 + $0x248] sm:$0xff]   ;;  %v7209_v40 = vld [vmem:[%s9421_s1 + $0x240] sm:$0xff]  }
  0x25   :  { %6441 = vmatpush3.bf16.msra.mxu1 %v7148_v41  ;;  %6420 = vmatprep.subr.bf16.mxu0 %v7149_v42  ;;  %v7210_v41 = vld [vmem:[%s9421_s1 + $0x2c0] sm:$0xff]  }
  0x26   :  { %6442 = vmatprep.subr.bf16.mxu1 %v7150_v43  ;;  %4492 = vmatprep.mubr.bf16.mxu0 %v5794_v8  ;;  %v7211_v42 = vld [vmem:[%s9421_s1 + $0x200] sm:$0xff]   ;;  %v7239_v8 = vld [vmem:[%s9421_s1 + $0x310] sm:$0xff]  }
  0x27   :  { %4532 = vmatprep.mubr.bf16.mxu1 %v5796_v11  ;;  %v7212_v43 = vld [vmem:[%s9421_s1 + $0x280] sm:$0xff]   ;;  %v7242_v11 = vld [vmem:[%s9421_s1 + $0x3c8] sm:$0xff]  }
  0x28   :  { %6421 = vmatpush3.bf16.msra.mxu0 %v7151_v44  ;;  %v25_v44 = vld [vmem:[%s9422_s0 + $0x20] sm:$0xff] }
  0x29   :  { %6443 = vmatpush3.bf16.msra.mxu1 %v7152_v45  ;;  %6422 = vmatprep.subr.bf16.mxu0 %v7153_v46  ;;  %v26_v45 = vld [vmem:[%s9422_s0 + $0x28] sm:$0xff]  ;;  %v5797_v46 = vcombine.low %v25_v44, %v25_v44 }
  0x2a   :  { %6444 = vmatprep.subr.bf16.mxu1 %v7154_v47  ;;  %v5798_v47 = vcombine.high %v25_v44, %v25_v44  ;;  %v7273_v44 = vld [vmem:[%s9421_s1 + $0x450] sm:$0xff]  }
  0x2c   :  { %6423 = vmatpush3.bf16.msra.mxu0 %v7155_v48  ;;  %v5799_v48 = vcombine.low %v26_v45, %v26_v45 }
  0x2d   :  { %6445 = vmatpush3.bf16.msra.mxu1 %v7156_v49  ;;  %6424 = vmatprep.subr.bf16.mxu0 %v7157_v50  ;;  %v5800_v49 = vcombine.high %v26_v45, %v26_v45  ;;  %v7217_v50 = vld [vmem:[%s9421_s1 + $0x378] sm:$0xff]   ;;  %v7274_v45 = vld [vmem:[%s9421_s1 + $0x4d0] sm:$0xff]  }
  0x2e   :  { %6446 = vmatprep.subr.bf16.mxu1 %v7158_v51  ;;  %v7218_v51 = vld [vmem:[%s9421_s1 + $0x3f8] sm:$0xff]  }
  0x30   :  { %6425 = vmatpush3.bf16.msra.mxu0 %v7159_v52  ;;  %v7219_v52 = vld [vmem:[%s9421_s1 + $0x338] sm:$0xff]  }
  0x31   :  { %6447 = vmatpush3.bf16.msra.mxu1 %v7160_v53  ;;  %6426 = vmatprep.subr.bf16.mxu0 %v7161_v54  ;;  %v7220_v53 = vld [vmem:[%s9421_s1 + $0x3b8] sm:$0xff]   ;;  %v7221_v54 = vld [vmem:[%s9421_s1 + $0x370] sm:$0xff]  }
  0x32   :  { %6448 = vmatprep.subr.bf16.mxu1 %v7162_v55  ;;  %v7222_v55 = vld [vmem:[%s9421_s1 + $0x3f0] sm:$0xff]  }
  0x34   :  { %6427 = vmatpush3.bf16.msra.mxu0 %v7163_v56  ;;  %v7223_v56 = vld [vmem:[%s9421_s1 + $0x330] sm:$0xff]  }
  0x35   :  { %6449 = vmatpush3.bf16.msra.mxu1 %v7164_v57  ;;  %6428 = vmatprep.subr.bf16.mxu0 %v7165_v58  ;;  %v7224_v57 = vld [vmem:[%s9421_s1 + $0x3b0] sm:$0xff]   ;;  %v7225_v58 = vld [vmem:[%s9421_s1 + $0x368] sm:$0xff]  }
  0x36   :  { %6450 = vmatprep.subr.bf16.mxu1 %v7166_v59  ;;  %v7226_v59 = vld [vmem:[%s9421_s1 + $0x3e8] sm:$0xff]  }
  0x38   :  { %6429 = vmatpush3.bf16.msra.mxu0 %v7167_v60  ;;  %v7227_v60 = vld [vmem:[%s9421_s1 + $0x328] sm:$0xff]  }
  0x39   :  { %6451 = vmatpush3.bf16.msra.mxu1 %v7168_v61  ;;  %6430 = vmatprep.subr.bf16.mxu0 %v7169_v62  ;;  %v7228_v61 = vld [vmem:[%s9421_s1 + $0x3a8] sm:$0xff]   ;;  %v7229_v62 = vld [vmem:[%s9421_s1 + $0x360] sm:$0xff]  }
  0x3a   :  { %6452 = vmatprep.subr.bf16.mxu1 %v7170_v63  ;;  %v7230_v63 = vld [vmem:[%s9421_s1 + $0x3e0] sm:$0xff]  }
  0x3c   :  { %6431 = vmatpush3.bf16.msra.mxu0 %v7171_v0  ;;  %v7231_v0 = vld [vmem:[%s9421_s1 + $0x320] sm:$0xff]  }
  0x3d   :  { %6453 = vmatpush3.bf16.msra.mxu1 %v7172_v1  ;;  %6432 = vmatprep.subr.bf16.mxu0 %v7173_v2  ;;  %v7232_v1 = vld [vmem:[%s9421_s1 + $0x3a0] sm:$0xff]   ;;  %v7233_v2 = vld [vmem:[%s9421_s1 + $0x358] sm:$0xff]  }
  0x3e   :  { %6454 = vmatprep.subr.bf16.mxu1 %v7174_v3  ;;  %v7234_v3 = vld [vmem:[%s9421_s1 + $0x3d8] sm:$0xff]  }
  0x40   :  { %6433 = vmatpush3.bf16.msra.mxu0 %v7175_v4  ;;  %v7235_v4 = vld [vmem:[%s9421_s1 + $0x318] sm:$0xff]  }
  0x41   :  { %6455 = vmatpush3.bf16.msra.mxu1 %v7176_v5  ;;  %6462 = vmatprep.subr.bf16.mxu0 %v7181_v12  ;;  %v7236_v5 = vld [vmem:[%s9421_s1 + $0x398] sm:$0xff]   ;;  %v7243_v12 = vld [vmem:[%s9421_s1 + $0x308] sm:$0xff]  }
  0x42   :  { %6484 = vmatprep.subr.bf16.mxu1 %v7182_v13  ;;  %v7244_v13 = vld [vmem:[%s9421_s1 + $0x388] sm:$0xff]  }
  0x43   :  { %4493 = vmatmul.mubr.bf16.vlgmr.msra.gmra.mxu0 %v5793_v7  ;;  %v7238_v7 = vld [vmem:[%s9421_s1 + $0x3d0] sm:$0xff]  }
  0x44   :  { %4533 = vmatmul.mubr.bf16.vlgmr.msra.gmra.mxu1 %v5795_v10  ;;  %6463 = vmatpush3.bf16.msra.mxu0 %v7183_v14  ;;  %v7241_v10 = vld [vmem:[%s9421_s1 + $0x348] sm:$0xff]   ;;  %v7245_v14 = vld [vmem:[%s9421_s1 + $0x340] sm:$0xff]  }
  0x45   :  { %6485 = vmatpush3.bf16.msra.mxu1 %v7184_v15  ;;  %6464 = vmatprep.subr.bf16.mxu0 %v7185_v16  ;;  %v7246_v15 = vld [vmem:[%s9421_s1 + $0x3c0] sm:$0xff]  }
  0x46   :  { %6486 = vmatprep.subr.bf16.mxu1 %v7186_v17  ;;  %4572 = vmatprep.mubr.bf16.mxu0 %v5798_v47  ;;  %v7247_v16 = vld [vmem:[%s9421_s1 + $0x300] sm:$0xff]   ;;  %v7276_v47 = vld [vmem:[%s9421_s1 + $0x490] sm:$0xff]  }
  0x47   :  { %4612 = vmatprep.mubr.bf16.mxu1 %v5800_v49  ;;  %v7248_v17 = vld [vmem:[%s9421_s1 + $0x380] sm:$0xff]   ;;  %v7278_v49 = vld [vmem:[%s9421_s1 + $0x4c8] sm:$0xff]  }
  0x48   :  { %6465 = vmatpush3.bf16.msra.mxu0 %v7187_v18  ;;  %v27_v18 = vld [vmem:[%s9422_s0 + $0x30] sm:$0xff] }
  0x49   :  { %6487 = vmatpush3.bf16.msra.mxu1 %v7188_v19  ;;  %6466 = vmatprep.subr.bf16.mxu0 %v7189_v20  ;;  %v28_v19 = vld [vmem:[%s9422_s0 + $0x38] sm:$0xff]  ;;  %v5801_v20 = vcombine.low %v27_v18, %v27_v18 }
  0x4a   :  { %6488 = vmatprep.subr.bf16.mxu1 %v7190_v21  ;;  %v5802_v21 = vcombine.high %v27_v18, %v27_v18  ;;  %v7309_v18 = vld [vmem:[%s9421_s1 + $0x550] sm:$0xff]  }
  0x4c   :  { %6467 = vmatpush3.bf16.msra.mxu0 %v7191_v22  ;;  %v5803_v22 = vcombine.low %v28_v19, %v28_v19 }
  0x4d   :  { %6489 = vmatpush3.bf16.msra.mxu1 %v7192_v23  ;;  %6468 = vmatprep.subr.bf16.mxu0 %v7193_v24  ;;  %v7253_v23 = vld [vmem:[%s9421_s1 + $0x478] sm:$0xff]   ;;  %v5804_v24 = vcombine.high %v28_v19, %v28_v19  ;;  %v7310_v19 = vld [vmem:[%s9421_s1 + $0x5d0] sm:$0xff]  }
  0x4e   :  { %6490 = vmatprep.subr.bf16.mxu1 %v7194_v25  ;;  %v7254_v25 = vld [vmem:[%s9421_s1 + $0x4f8] sm:$0xff]  }
  0x50   :  { %6469 = vmatpush3.bf16.msra.mxu0 %v7195_v26  ;;  %v7255_v26 = vld [vmem:[%s9421_s1 + $0x438] sm:$0xff]  }
  0x51   :  { %6491 = vmatpush3.bf16.msra.mxu1 %v7196_v27  ;;  %6470 = vmatprep.subr.bf16.mxu0 %v7197_v28  ;;  %v7256_v27 = vld [vmem:[%s9421_s1 + $0x4b8] sm:$0xff]   ;;  %v7257_v28 = vld [vmem:[%s9421_s1 + $0x470] sm:$0xff]  }
  0x52   :  { %6492 = vmatprep.subr.bf16.mxu1 %v7198_v29  ;;  %v7258_v29 = vld [vmem:[%s9421_s1 + $0x4f0] sm:$0xff]  }
  0x54   :  { %6471 = vmatpush3.bf16.msra.mxu0 %v7199_v30  ;;  %v7259_v30 = vld [vmem:[%s9421_s1 + $0x430] sm:$0xff]  }
  0x55   :  { %6493 = vmatpush3.bf16.msra.mxu1 %v7200_v31  ;;  %6472 = vmatprep.subr.bf16.mxu0 %v7201_v32  ;;  %v7260_v31 = vld [vmem:[%s9421_s1 + $0x4b0] sm:$0xff]   ;;  %v7261_v32 = vld [vmem:[%s9421_s1 + $0x468] sm:$0xff]  }
  0x56   :  { %6494 = vmatprep.subr.bf16.mxu1 %v7202_v33  ;;  %v7262_v33 = vld [vmem:[%s9421_s1 + $0x4e8] sm:$0xff]  }
  0x58   :  { %6473 = vmatpush3.bf16.msra.mxu0 %v7203_v34  ;;  %v7263_v34 = vld [vmem:[%s9421_s1 + $0x428] sm:$0xff]  }
  0x59   :  { %6495 = vmatpush3.bf16.msra.mxu1 %v7204_v35  ;;  %6474 = vmatprep.subr.bf16.mxu0 %v7205_v36  ;;  %v7264_v35 = vld [vmem:[%s9421_s1 + $0x4a8] sm:$0xff]   ;;  %v7265_v36 = vld [vmem:[%s9421_s1 + $0x460] sm:$0xff]  }
  0x5a   :  { %6496 = vmatprep.subr.bf16.mxu1 %v7206_v37  ;;  %v7266_v37 = vld [vmem:[%s9421_s1 + $0x4e0] sm:$0xff]  }
  0x5c   :  { %6475 = vmatpush3.bf16.msra.mxu0 %v7207_v38  ;;  %v7267_v38 = vld [vmem:[%s9421_s1 + $0x420] sm:$0xff]  }
  0x5d   :  { %6497 = vmatpush3.bf16.msra.mxu1 %v7208_v39  ;;  %6476 = vmatprep.subr.bf16.mxu0 %v7209_v40  ;;  %v7268_v39 = vld [vmem:[%s9421_s1 + $0x4a0] sm:$0xff]   ;;  %v7269_v40 = vld [vmem:[%s9421_s1 + $0x458] sm:$0xff]  }
  0x5e   :  { %6498 = vmatprep.subr.bf16.mxu1 %v7210_v41  ;;  %v7270_v41 = vld [vmem:[%s9421_s1 + $0x4d8] sm:$0xff]  }
  0x60   :  { %6477 = vmatpush3.bf16.msra.mxu0 %v7211_v42  ;;  %v7271_v42 = vld [vmem:[%s9421_s1 + $0x418] sm:$0xff]  }
  0x61   :  { %6499 = vmatpush3.bf16.msra.mxu1 %v7212_v43  ;;  %6506 = vmatprep.subr.bf16.mxu0 %v7217_v50  ;;  %v7272_v43 = vld [vmem:[%s9421_s1 + $0x498] sm:$0xff]   ;;  %v7279_v50 = vld [vmem:[%s9421_s1 + $0x408] sm:$0xff]  }
  0x62   :  { %6528 = vmatprep.subr.bf16.mxu1 %v7218_v51  ;;  %v7280_v51 = vld [vmem:[%s9421_s1 + $0x488] sm:$0xff]  }
  0x63   :  { %4573 = vmatmul.mubr.bf16.vlgmr.msra.gmra.mxu0 %v5797_v46  ;;  %v7275_v46 = vld [vmem:[%s9421_s1 + $0x410] sm:$0xff]  }
  0x64   :  { %4613 = vmatmul.mubr.bf16.vlgmr.msra.gmra.mxu1 %v5799_v48  ;;  %6507 = vmatpush3.bf16.msra.mxu0 %v7219_v52  ;;  %v7277_v48 = vld [vmem:[%s9421_s1 + $0x448] sm:$0xff]   ;;  %v7281_v52 = vld [vmem:[%s9421_s1 + $0x440] sm:$0xff]  }
  0x65   :  { %6529 = vmatpush3.bf16.msra.mxu1 %v7220_v53  ;;  %6508 = vmatprep.subr.bf16.mxu0 %v7221_v54  ;;  %v7282_v53 = vld [vmem:[%s9421_s1 + $0x4c0] sm:$0xff]  }
  0x66   :  { %6530 = vmatprep.subr.bf16.mxu1 %v7222_v55  ;;  %4652 = vmatprep.mubr.bf16.mxu0 %v5802_v21  ;;  %v7283_v54 = vld [vmem:[%s9421_s1 + $0x400] sm:$0xff]   ;;  %v7312_v21 = vld [vmem:[%s9421_s1 + $0x590] sm:$0xff]  }
  0x67   :  { %4692 = vmatprep.mubr.bf16.mxu1 %v5804_v24  ;;  %v7284_v55 = vld [vmem:[%s9421_s1 + $0x480] sm:$0xff]   ;;  %v7315_v24 = vld [vmem:[%s9421_s1 + $0x508] sm:$0xff]  }
  0x68   :  { %6509 = vmatpush3.bf16.msra.mxu0 %v7223_v56  ;;  %v29_v56 = vld [vmem:[%s9422_s0 + $0x40] sm:$0xff] }
  0x69   :  { %6531 = vmatpush3.bf16.msra.mxu1 %v7224_v57  ;;  %6510 = vmatprep.subr.bf16.mxu0 %v7225_v58  ;;  %v5805_v57 = vcombine.low %v29_v56, %v29_v56  ;;  %v5806_v58 = vcombine.high %v29_v56, %v29_v56  ;;  %v7345_v56 = vld [vmem:[%s9421_s1 + $0x650] sm:$0xff]  }
  0x6a   :  { %6532 = vmatprep.subr.bf16.mxu1 %v7226_v59  ;;  %v30_v59 = vld [vmem:[%s9422_s0 + $0x48] sm:$0xff] }
  0x6c   :  { %6511 = vmatpush3.bf16.msra.mxu0 %v7227_v60  ;;  %v5807_v60 = vcombine.low %v30_v59, %v30_v59 }
  0x6d   :  { %6533 = vmatpush3.bf16.msra.mxu1 %v7228_v61  ;;  %6512 = vmatprep.subr.bf16.mxu0 %v7229_v62  ;;  %v5808_v61 = vcombine.high %v30_v59, %v30_v59  ;;  %v7289_v62 = vld [vmem:[%s9421_s1 + $0x578] sm:$0xff]   ;;  %v7348_v59 = vld [vmem:[%s9421_s1 + $0x690] sm:$0xff]  }
  0x6e   :  { %6534 = vmatprep.subr.bf16.mxu1 %v7230_v63  ;;  %v7290_v63 = vld [vmem:[%s9421_s1 + $0x5f8] sm:$0xff]  }
  0x70   :  { %6513 = vmatpush3.bf16.msra.mxu0 %v7231_v0  ;;  %v7291_v0 = vld [vmem:[%s9421_s1 + $0x538] sm:$0xff]  }
  0x71   :  { %6535 = vmatpush3.bf16.msra.mxu1 %v7232_v1  ;;  %6514 = vmatprep.subr.bf16.mxu0 %v7233_v2  ;;  %v7292_v1 = vld [vmem:[%s9421_s1 + $0x5b8] sm:$0xff]   ;;  %v7293_v2 = vld [vmem:[%s9421_s1 + $0x570] sm:$0xff]  }
  0x72   :  { %6536 = vmatprep.subr.bf16.mxu1 %v7234_v3  ;;  %v7294_v3 = vld [vmem:[%s9421_s1 + $0x5f0] sm:$0xff]  }
  0x74   :  { %6515 = vmatpush3.bf16.msra.mxu0 %v7235_v4  ;;  %v7295_v4 = vld [vmem:[%s9421_s1 + $0x530] sm:$0xff]  }
  0x75   :  { %6537 = vmatpush3.bf16.msra.mxu1 %v7236_v5  ;;  %6516 = vmatprep.subr.bf16.mxu0 %v7237_v6  ;;  %v7296_v5 = vld [vmem:[%s9421_s1 + $0x5b0] sm:$0xff]   ;;  %v7297_v6 = vld [vmem:[%s9421_s1 + $0x568] sm:$0xff]  }
  0x76   :  { %6538 = vmatprep.subr.bf16.mxu1 %v7238_v7  ;;  %v7298_v7 = vld [vmem:[%s9421_s1 + $0x5e8] sm:$0xff]  }
  0x78   :  { %6517 = vmatpush3.bf16.msra.mxu0 %v7239_v8  ;;  %v7299_v8 = vld [vmem:[%s9421_s1 + $0x528] sm:$0xff]  }
  0x79   :  { %6539 = vmatpush3.bf16.msra.mxu1 %v7240_v9  ;;  %6518 = vmatprep.subr.bf16.mxu0 %v7241_v10  ;;  %v7300_v9 = vld [vmem:[%s9421_s1 + $0x5a8] sm:$0xff]   ;;  %v7301_v10 = vld [vmem:[%s9421_s1 + $0x560] sm:$0xff]  }
  0x7a   :  { %6540 = vmatprep.subr.bf16.mxu1 %v7242_v11  ;;  %v7302_v11 = vld [vmem:[%s9421_s1 + $0x5e0] sm:$0xff]  }
  0x7c   :  { %6519 = vmatpush3.bf16.msra.mxu0 %v7243_v12  ;;  %v7303_v12 = vld [vmem:[%s9421_s1 + $0x520] sm:$0xff]  }
  0x7d   :  { %6541 = vmatpush3.bf16.msra.mxu1 %v7244_v13  ;;  %6520 = vmatprep.subr.bf16.mxu0 %v7245_v14  ;;  %v7304_v13 = vld [vmem:[%s9421_s1 + $0x5a0] sm:$0xff]   ;;  %v7305_v14 = vld [vmem:[%s9421_s1 + $0x558] sm:$0xff]  }
  0x7e   :  { %6542 = vmatprep.subr.bf16.mxu1 %v7246_v15  ;;  %v7306_v15 = vld [vmem:[%s9421_s1 + $0x5d8] sm:$0xff]  }
  0x80   :  { %6521 = vmatpush3.bf16.msra.mxu0 %v7247_v16  ;;  %v7307_v16 = vld [vmem:[%s9421_s1 + $0x518] sm:$0xff]  }
  0x81   :  { %6543 = vmatpush3.bf16.msra.mxu1 %v7248_v17  ;;  %6550 = vmatprep.subr.bf16.mxu0 %v7253_v23  ;;  %v7308_v17 = vld [vmem:[%s9421_s1 + $0x598] sm:$0xff]   ;;  %v7314_v23 = vld [vmem:[%s9421_s1 + $0x5c8] sm:$0xff]  }
  0x82   :  { %6572 = vmatprep.subr.bf16.mxu1 %v7254_v25  ;;  %v7316_v25 = vld [vmem:[%s9421_s1 + $0x588] sm:$0xff]  }
  0x83   :  { %4653 = vmatmul.mubr.bf16.vlgmr.msra.gmra.mxu0 %v5801_v20  ;;  %v7311_v20 = vld [vmem:[%s9421_s1 + $0x510] sm:$0xff]  }
  0x84   :  { %4693 = vmatmul.mubr.bf16.vlgmr.msra.gmra.mxu1 %v5803_v22  ;;  %6551 = vmatpush3.bf16.msra.mxu0 %v7255_v26  ;;  %v7313_v22 = vld [vmem:[%s9421_s1 + $0x548] sm:$0xff]   ;;  %v7317_v26 = vld [vmem:[%s9421_s1 + $0x540] sm:$0xff]  }
  0x85   :  { %6573 = vmatpush3.bf16.msra.mxu1 %v7256_v27  ;;  %6552 = vmatprep.subr.bf16.mxu0 %v7257_v28  ;;  %v7318_v27 = vld [vmem:[%s9421_s1 + $0x5c0] sm:$0xff]  }
  0x86   :  { %6574 = vmatprep.subr.bf16.mxu1 %v7258_v29  ;;  %4732 = vmatprep.mubr.bf16.mxu0 %v5806_v58  ;;  %v7319_v28 = vld [vmem:[%s9421_s1 + $0x500] sm:$0xff]   ;;  %v7347_v58 = vld [vmem:[%s9421_s1 + $0x610] sm:$0xff]  }
  0x87   :  { %4772 = vmatprep.mubr.bf16.mxu1 %v5808_v61  ;;  %v7320_v29 = vld [vmem:[%s9421_s1 + $0x580] sm:$0xff]   ;;  %v7350_v61 = vld [vmem:[%s9421_s1 + $0x6c8] sm:$0xff]  }
  0x88   :  { %6553 = vmatpush3.bf16.msra.mxu0 %v7259_v30  ;;  %v31_v30 = vld [vmem:[%s9422_s0 + $0x50] sm:$0xff] }
  0x89   :  { %6575 = vmatpush3.bf16.msra.mxu1 %v7260_v31  ;;  %6554 = vmatprep.subr.bf16.mxu0 %v7261_v32  ;;  %v32_v31 = vld [vmem:[%s9422_s0 + $0x58] sm:$0xff]  ;;  %v5809_v32 = vcombine.low %v31_v30, %v31_v30 }
  0x8a   :  { %6576 = vmatprep.subr.bf16.mxu1 %v7262_v33  ;;  %v5810_v33 = vcombine.high %v31_v30, %v31_v30  ;;  %v7368_v30 = vld [vmem:[%s9421_s1 + $0x7b0] sm:$0xff]  }
  0x8c   :  { %6555 = vmatpush3.bf16.msra.mxu0 %v7263_v34  ;;  %v5811_v34 = vcombine.low %v32_v31, %v32_v31 }
  0x8d   :  { %6577 = vmatpush3.bf16.msra.mxu1 %v7264_v35  ;;  %6556 = vmatprep.subr.bf16.mxu0 %v7265_v36  ;;  %v5812_v35 = vcombine.high %v32_v31, %v32_v31  ;;  %v7325_v36 = vld [vmem:[%s9421_s1 + $0x678] sm:$0xff]   ;;  %v7369_v31 = vld [vmem:[%s9421_s1 + $0x768] sm:$0xff]  }
  0x8e   :  { %6578 = vmatprep.subr.bf16.mxu1 %v7266_v37  ;;  %v7326_v37 = vld [vmem:[%s9421_s1 + $0x6f8] sm:$0xff]  }
  0x90   :  { %6557 = vmatpush3.bf16.msra.mxu0 %v7267_v38  ;;  %v7327_v38 = vld [vmem:[%s9421_s1 + $0x638] sm:$0xff]  }
  0x91   :  { %6579 = vmatpush3.bf16.msra.mxu1 %v7268_v39  ;;  %6558 = vmatprep.subr.bf16.mxu0 %v7269_v40  ;;  %v7328_v39 = vld [vmem:[%s9421_s1 + $0x6b8] sm:$0xff]   ;;  %v7329_v40 = vld [vmem:[%s9421_s1 + $0x670] sm:$0xff]  }
  0x92   :  { %6580 = vmatprep.subr.bf16.mxu1 %v7270_v41  ;;  %v7330_v41 = vld [vmem:[%s9421_s1 + $0x6f0] sm:$0xff]  }
  0x94   :  { %6559 = vmatpush3.bf16.msra.mxu0 %v7271_v42  ;;  %v7331_v42 = vld [vmem:[%s9421_s1 + $0x630] sm:$0xff]  }
  0x95   :  { %6581 = vmatpush3.bf16.msra.mxu1 %v7272_v43  ;;  %6560 = vmatprep.subr.bf16.mxu0 %v7273_v44  ;;  %v7332_v43 = vld [vmem:[%s9421_s1 + $0x6b0] sm:$0xff]   ;;  %v7333_v44 = vld [vmem:[%s9421_s1 + $0x668] sm:$0xff]  }
  0x96   :  { %6582 = vmatprep.subr.bf16.mxu1 %v7274_v45  ;;  %v7334_v45 = vld [vmem:[%s9421_s1 + $0x6e8] sm:$0xff]  }
  0x98   :  { %6561 = vmatpush3.bf16.msra.mxu0 %v7275_v46  ;;  %v7335_v46 = vld [vmem:[%s9421_s1 + $0x628] sm:$0xff]  }
  0x99   :  { %6583 = vmatpush3.bf16.msra.mxu1 %v7276_v47  ;;  %6562 = vmatprep.subr.bf16.mxu0 %v7277_v48  ;;  %v7336_v47 = vld [vmem:[%s9421_s1 + $0x6a8] sm:$0xff]   ;;  %v7337_v48 = vld [vmem:[%s9421_s1 + $0x660] sm:$0xff]  }
  0x9a   :  { %6584 = vmatprep.subr.bf16.mxu1 %v7278_v49  ;;  %v7338_v49 = vld [vmem:[%s9421_s1 + $0x6e0] sm:$0xff]  }
  0x9c   :  { %6563 = vmatpush3.bf16.msra.mxu0 %v7279_v50  ;;  %v7339_v50 = vld [vmem:[%s9421_s1 + $0x620] sm:$0xff]  }
  0x9d   :  { %6585 = vmatpush3.bf16.msra.mxu1 %v7280_v51  ;;  %6564 = vmatprep.subr.bf16.mxu0 %v7281_v52  ;;  %v7340_v51 = vld [vmem:[%s9421_s1 + $0x6a0] sm:$0xff]   ;;  %v7341_v52 = vld [vmem:[%s9421_s1 + $0x658] sm:$0xff]  }
  0x9e   :  { %6586 = vmatprep.subr.bf16.mxu1 %v7282_v53  ;;  %v7342_v53 = vld [vmem:[%s9421_s1 + $0x6d8] sm:$0xff]  }
  0xa0   :  { %6565 = vmatpush3.bf16.msra.mxu0 %v7283_v54  ;;  %v7343_v54 = vld [vmem:[%s9421_s1 + $0x618] sm:$0xff]  }
  0xa1   :  { %6587 = vmatpush3.bf16.msra.mxu1 %v7284_v55  ;;  %6594 = vmatprep.subr.bf16.mxu0 %v7289_v62  ;;  %v7344_v55 = vld [vmem:[%s9421_s1 + $0x698] sm:$0xff]   ;;  %v7351_v62 = vld [vmem:[%s9421_s1 + $0x608] sm:$0xff]  }
  0xa2   :  { %6616 = vmatprep.subr.bf16.mxu1 %v7290_v63  ;;  %v7352_v63 = vld [vmem:[%s9421_s1 + $0x688] sm:$0xff]  }
  0xa3   :  { %4733 = vmatmul.mubr.bf16.vlgmr.msra.gmra.mxu0 %v5805_v57  ;;  %v7346_v57 = vld [vmem:[%s9421_s1 + $0x6d0] sm:$0xff]  }
  0xa4   :  { %4773 = vmatmul.mubr.bf16.vlgmr.msra.gmra.mxu1 %v5807_v60  ;;  %6595 = vmatpush3.bf16.msra.mxu0 %v7291_v0  ;;  %v7349_v60 = vld [vmem:[%s9421_s1 + $0x648] sm:$0xff]   ;;  %v7353_v0 = vld [vmem:[%s9421_s1 + $0x640] sm:$0xff]  }
  0xa5   :  { %6617 = vmatpush3.bf16.msra.mxu1 %v7292_v1  ;;  %6596 = vmatprep.subr.bf16.mxu0 %v7293_v2  ;;  %v7354_v1 = vld [vmem:[%s9421_s1 + $0x6c0] sm:$0xff]  }
  0xa6   :  { %6618 = vmatprep.subr.bf16.mxu1 %v7294_v3  ;;  %4812 = vmatprep.mubr.bf16.mxu0 %v5810_v33  ;;  %v7355_v2 = vld [vmem:[%s9421_s1 + $0x600] sm:$0xff]   ;;  %v7371_v33 = vld [vmem:[%s9421_s1 + $0x728] sm:$0xff]  }
  0xa7   :  { %4852 = vmatprep.mubr.bf16.mxu1 %v5812_v35  ;;  %v7356_v3 = vld [vmem:[%s9421_s1 + $0x680] sm:$0xff]  }
  0xa8   :  { %6597 = vmatpush3.bf16.msra.mxu0 %v7295_v4  ;;  %v33_v4 = vld [vmem:[%s9422_s0 + $0x60] sm:$0xff] }
  0xa9   :  { %6619 = vmatpush3.bf16.msra.mxu1 %v7296_v5  ;;  %6598 = vmatprep.subr.bf16.mxu0 %v7297_v6  ;;  %v34_v5 = vld [vmem:[%s9422_s0 + $0x68] sm:$0xff]  ;;  %v7373_v35 = vld [vmem:[%s9421_s1 + $0x760] sm:$0xff]  }
  0xaa   :  { %6620 = vmatprep.subr.bf16.mxu1 %v7298_v7 }
  0xac   :  { %6599 = vmatpush3.bf16.msra.mxu0 %v7299_v8  ;;  %v5813_v8 = vcombine.low %v33_v4, %v33_v4 }
  0xad   :  { %6621 = vmatpush3.bf16.msra.mxu1 %v7300_v9  ;;  %6600 = vmatprep.subr.bf16.mxu0 %v7301_v10  ;;  %v5814_v9 = vcombine.high %v33_v4, %v33_v4  ;;  %v5815_v10 = vcombine.low %v34_v5, %v34_v5 }
  0xae   :  { %6622 = vmatprep.subr.bf16.mxu1 %v7302_v11  ;;  %v7361_v11 = vld [vmem:[%s9421_s1 + $0x778] sm:$0xff]  }
  0xb0   :  { %6601 = vmatpush3.bf16.msra.mxu0 %v7303_v12  ;;  %v5816_v12 = vcombine.high %v34_v5, %v34_v5 }
  0xb1   :  { %6623 = vmatpush3.bf16.msra.mxu1 %v7304_v13  ;;  %6602 = vmatprep.subr.bf16.mxu0 %v7305_v14  ;;  %v7362_v13 = vld [vmem:[%s9421_s1 + $0x7f8] sm:$0xff]  }
  0xb2   :  { %6624 = vmatprep.subr.bf16.mxu1 %v7306_v15 }
  0xb4   :  { %6603 = vmatpush3.bf16.msra.mxu0 %v7307_v16  ;;  %v7363_v16 = vld [vmem:[%s9421_s1 + $0x738] sm:$0xff]  }
  0xb5   :  { %6625 = vmatpush3.bf16.msra.mxu1 %v7308_v17  ;;  %6604 = vmatprep.subr.bf16.mxu0 %v7309_v18 }
  0xb6   :  { %6626 = vmatprep.subr.bf16.mxu1 %v7310_v19  ;;  %v7364_v19 = vld [vmem:[%s9421_s1 + $0x7b8] sm:$0xff]  }
  0xb8   :  { %6605 = vmatpush3.bf16.msra.mxu0 %v7311_v20  ;;  %v5788_v20 = vld [vmem:[%s9423_s2] ss:$0 sm:$0xff] }
  0xb9   :  { %6627 = vmatpush3.bf16.msra.mxu1 %v7312_v21  ;;  %6606 = vmatprep.subr.bf16.mxu0 %v7313_v22 }
  0xba   :  { %6628 = vmatprep.subr.bf16.mxu1 %v7314_v23 }
  0xbc   :  { %6607 = vmatpush3.bf16.msra.mxu0 %v7315_v24  ;;  %v7365_v24 = vld [vmem:[%s9421_s1 + $0x770] sm:$0xff]  }
  0xbd   :  { %6629 = vmatpush3.bf16.msra.mxu1 %v7316_v25  ;;  %6608 = vmatprep.subr.bf16.mxu0 %v7317_v26  ;;  %v7366_v25 = vld [vmem:[%s9421_s1 + $0x7f0] sm:$0xff]  }
  0xbe   :  { %6630 = vmatprep.subr.bf16.mxu1 %v7318_v27 }
  0xc0   :  { %6609 = vmatpush3.bf16.msra.mxu0 %v7319_v28 }
  0xc1   :  { %6631 = vmatpush3.bf16.msra.mxu1 %v7320_v29  ;;  %6638 = vmatprep.subr.bf16.mxu0 %v7325_v36  ;;  %v7367_v29 = vld [vmem:[%s9421_s1 + $0x730] sm:$0xff]   ;;  %v7374_v36 = vld [vmem:[%s9421_s1 + $0x7e0] sm:$0xff]  }
  0xc2   :  { %6660 = vmatprep.subr.bf16.mxu1 %v7326_v37  ;;  %v7375_v37 = vld [vmem:[%s9421_s1 + $0x720] sm:$0xff]  }
  0xc3   :  { %4813 = vmatmul.mubr.bf16.vlgmr.msra.gmra.mxu0 %v5809_v32  ;;  %v7370_v32 = vld [vmem:[%s9421_s1 + $0x7e8] sm:$0xff]  }
  0xc4   :  { %4853 = vmatmul.mubr.bf16.vlgmr.msra.gmra.mxu1 %v5811_v34  ;;  %6639 = vmatpush3.bf16.msra.mxu0 %v7327_v38  ;;  %v7372_v34 = vld [vmem:[%s9421_s1 + $0x7a8] sm:$0xff]   ;;  %v7376_v38 = vld [vmem:[%s9421_s1 + $0x7a0] sm:$0xff]  }
  0xc5   :  { %6661 = vmatpush3.bf16.msra.mxu1 %v7328_v39  ;;  %6640 = vmatprep.subr.bf16.mxu0 %v7329_v40  ;;  %v7377_v39 = vld [vmem:[%s9421_s1 + $0x758] sm:$0xff]  }
  0xc6   :  { %6662 = vmatprep.subr.bf16.mxu1 %v7330_v41  ;;  %4892 = vmatprep.mubr.bf16.mxu0 %v5814_v9  ;;  %v7378_v40 = vld [vmem:[%s9421_s1 + $0x7d8] sm:$0xff]  }
  0xc7   :  { %4932 = vmatprep.mubr.bf16.mxu1 %v5816_v12  ;;  %v7379_v41 = vld [vmem:[%s9421_s1 + $0x718] sm:$0xff]  }
  0xc8   :  { %6641 = vmatpush3.bf16.msra.mxu0 %v7331_v42  ;;  %v7380_v42 = vld [vmem:[%s9421_s1 + $0x798] sm:$0xff]  }
  0xc9   :  { %6663 = vmatpush3.bf16.msra.mxu1 %v7332_v43  ;;  %6642 = vmatprep.subr.bf16.mxu0 %v7333_v44  ;;  %v7381_v43 = vld [vmem:[%s9421_s1 + $0x750] sm:$0xff]  }
  0xca   :  { %6664 = vmatprep.subr.bf16.mxu1 %v7334_v45  ;;  %v7382_v44 = vld [vmem:[%s9421_s1 + $0x7d0] sm:$0xff]  }
  0xcb   :  { %v7383_v45 = vld [vmem:[%s9421_s1 + $0x710] sm:$0xff]  }
  0xcc   :  { %6643 = vmatpush3.bf16.msra.mxu0 %v7335_v46  ;;  %v7384_v46 = vld [vmem:[%s9421_s1 + $0x790] sm:$0xff]  }
  0xcd   :  { %6665 = vmatpush3.bf16.msra.mxu1 %v7336_v47  ;;  %6644 = vmatprep.subr.bf16.mxu0 %v7337_v48  ;;  %v7385_v47 = vld [vmem:[%s9421_s1 + $0x748] sm:$0xff]  }
  0xce   :  { %6666 = vmatprep.subr.bf16.mxu1 %v7338_v49  ;;  %v7386_v48 = vld [vmem:[%s9421_s1 + $0x7c8] sm:$0xff]  }
  0xcf   :  { %v7387_v49 = vld [vmem:[%s9421_s1 + $0x708] sm:$0xff]  }
  0xd0   :  { %6645 = vmatpush3.bf16.msra.mxu0 %v7339_v50  ;;  %v7388_v50 = vld [vmem:[%s9421_s1 + $0x788] sm:$0xff]  }
  0xd1   :  { %6667 = vmatpush3.bf16.msra.mxu1 %v7340_v51  ;;  %6646 = vmatprep.subr.bf16.mxu0 %v7341_v52  ;;  %v7389_v51 = vld [vmem:[%s9421_s1 + $0x740] sm:$0xff]  }
  0xd2   :  { %6668 = vmatprep.subr.bf16.mxu1 %v7342_v53  ;;  %v7390_v52 = vld [vmem:[%s9421_s1 + $0x7c0] sm:$0xff]  }
  0xd3   :  { %v7391_v53 = vld [vmem:[%s9421_s1 + $0x700] sm:$0xff]  }
  0xd4   :  { %6647 = vmatpush3.bf16.msra.mxu0 %v7343_v54  ;;  %v7392_v54 = vld [vmem:[%s9421_s1 + $0x780] sm:$0xff]  }
  0xd5   :  { %6669 = vmatpush3.bf16.msra.mxu1 %v7344_v55  ;;  %6648 = vmatprep.subr.bf16.mxu0 %v7345_v56  ;;  %v35_v55 = vld [vmem:[%s9422_s0 + $0x70] sm:$0xff]  ;;  %v36_v56 = vld [vmem:[%s9422_s0 + $0x78] sm:$0xff] }
  0xd6   :  { %6670 = vmatprep.subr.bf16.mxu1 %v7346_v57 }
  0xd8   :  { %6649 = vmatpush3.bf16.msra.mxu0 %v7347_v58 }
  0xd9   :  { %6671 = vmatpush3.bf16.msra.mxu1 %v7348_v59  ;;  %6650 = vmatprep.subr.bf16.mxu0 %v7349_v60  ;;  %v5817_v59 = vcombine.low %v35_v55, %v35_v55  ;;  %v5818_v60 = vcombine.high %v35_v55, %v35_v55 }
  0xda   :  { %6672 = vmatprep.subr.bf16.mxu1 %v7350_v61  ;;  %v5819_v61 = vcombine.low %v36_v56, %v36_v56 }
  0xdc   :  { %6651 = vmatpush3.bf16.msra.mxu0 %v7351_v62  ;;  %v7397_v62 = vld [vmem:[%s9421_s1 + $0x878] sm:$0xff]  }
  0xdd   :  { %6673 = vmatpush3.bf16.msra.mxu1 %v7352_v63  ;;  %6652 = vmatprep.subr.bf16.mxu0 %v7353_v0  ;;  %v5820_v63 = vcombine.high %v36_v56, %v36_v56  ;;  %v7398_v0 = vld [vmem:[%s9421_s1 + $0x8f8] sm:$0xff]  }
  0xde   :  { %6674 = vmatprep.subr.bf16.mxu1 %v7354_v1 }
  0xe0   :  { %6653 = vmatpush3.bf16.msra.mxu0 %v7355_v2 }
  0xe1   :  { %6675 = vmatpush3.bf16.msra.mxu1 %v7356_v3  ;;  %6682 = vmatprep.subr.bf16.mxu0 %v7361_v11  ;;  %v7399_v3 = vld [vmem:[%s9421_s1 + $0x838] sm:$0xff]   ;;  %v7402_v11 = vld [vmem:[%s9421_s1 + $0x8f0] sm:$0xff]  }
  0xe2   :  { %6704 = vmatprep.subr.bf16.mxu1 %v7362_v13 }
  0xe3   :  { %v6390_v6 = vpop.f32.mrf.mxu0  ;;  %4893 = vmatmul.mubr.bf16.vlgmr.msra.gmra.mxu0 %v5813_v8 }
  0xe4   :  { %v6412_v7 = vpop.f32.mrf.mxu1  ;;  %4933 = vmatmul.mubr.bf16.vlgmr.msra.gmra.mxu1 %v5815_v10  ;;  %6683 = vmatpush3.bf16.msra.mxu0 %v7363_v16  ;;  %v7401_v10 = vld [vmem:[%s9421_s1 + $0x870] sm:$0xff]  }
  0xe5   :  { %v6391_v14 = vpop.f32.mrf.mxu0  ;;  %6705 = vmatpush3.bf16.msra.mxu1 %v7364_v19  ;;  %6684 = vmatprep.subr.bf16.mxu0 %v7365_v24  ;;  %v7404_v16 = vld [vmem:[%s9421_s1 + $0x8b0] sm:$0xff]   ;;  %v7407_v19 = vld [vmem:[%s9421_s1 + $0x828] sm:$0xff]   ;;  %v7412_v24 = vld [vmem:[%s9421_s1 + $0x8a0] sm:$0xff]  }
  0xe6   :  { %v6413_v15 = vpop.f32.mrf.mxu1  ;;  %v6392_v17 = vadd.f32 %v6391_v14, %v6390_v6  ;;  %6706 = vmatprep.subr.bf16.mxu1 %v7366_v25  ;;  %4972 = vmatprep.mubr.bf16.mxu0 %v5818_v60  ;;  %v7400_v6 = vld [vmem:[%s9421_s1 + $0x8b8] sm:$0xff]   ;;  %v7437_v60 = vld [vmem:[%s9421_s1 + $0x970] sm:$0xff]  }
  0xe7   :  { %v6414_v18 = vadd.f32 %v6413_v15, %v6412_v7  ;;  %v6393_v21 = vpop.f32.mrf.mxu0  ;;  %5012 = vmatprep.mubr.bf16.mxu1 %v5820_v63  ;;  %v7403_v15 = vld [vmem:[%s9421_s1 + $0x830] sm:$0xff]   ;;  %v7413_v25 = vld [vmem:[%s9421_s1 + $0x858] sm:$0xff]  }
  0xe8   :  { %v6415_v22 = vpop.f32.mrf.mxu1  ;;  %v4415_v23 = vadd.f32 %v6392_v17, %v5788_v20  ;;  %6685 = vmatpush3.bf16.msra.mxu0 %v7367_v29  ;;  %v7405_v17 = vld [vmem:[%s9421_s1 + $0x868] sm:$0xff]   ;;  %v7409_v21 = vld [vmem:[%s9421_s1 + $0x860] sm:$0xff]   ;;  %v7417_v29 = vld [vmem:[%s9421_s1 + $0x850] sm:$0xff]  }
  0xe9   :  { %v6394_v26 = vpop.f32.mrf.mxu0  ;;  %6707 = vmatpush3.bf16.msra.mxu1 %v7368_v30  ;;  %6686 = vmatprep.subr.bf16.mxu0 %v7369_v31  ;;  %v7408_v20 = vld [vmem:[%s9421_s1 + $0x8a8] sm:$0xff]   ;;  %v7410_v22 = vld [vmem:[%s9421_s1 + $0x8e0] sm:$0xff]   ;;  %v7418_v30 = vld [vmem:[%s9421_s1 + $0x8d0] sm:$0xff]  }
  0xea   :  { %v6416_v27 = vpop.f32.mrf.mxu1  ;;  %v8464_v28 = vadd.f32 %v6414_v18, %v4415_v23  ;;  %6708 = vmatprep.subr.bf16.mxu1 %v7370_v32  ;;  %v7406_v18 = vld [vmem:[%s9421_s1 + $0x8e8] sm:$0xff]   ;;  %v7411_v23 = vld [vmem:[%s9421_s1 + $0x820] sm:$0xff]   ;;  %v7414_v26 = vld [vmem:[%s9421_s1 + $0x8d8] sm:$0xff]  }
  0xeb   :  { %v7415_v27 = vld [vmem:[%s9421_s1 + $0x818] sm:$0xff]   ;;  %v7419_v31 = vld [vmem:[%s9421_s1 + $0x810] sm:$0xff]  }
  0xec   :  { %6687 = vmatpush3.bf16.msra.mxu0 %v7371_v33  ;;  %v7420_v32 = vld [vmem:[%s9421_s1 + $0x890] sm:$0xff]   ;;  %v7421_v33 = vld [vmem:[%s9421_s1 + $0x848] sm:$0xff]  }
  0xed   :  { %6709 = vmatpush3.bf16.msra.mxu1 %v7372_v34  ;;  %6688 = vmatprep.subr.bf16.mxu0 %v7373_v35  ;;  %v7422_v34 = vld [vmem:[%s9421_s1 + $0x8c8] sm:$0xff]   ;;  %v7438_v63 = vld [vmem:[%s9421_s1 + $0x9f0] sm:$0xff]  }
  0xee   :  { %6710 = vmatprep.subr.bf16.mxu1 %v7374_v36  ;;  %v7423_v35 = vld [vmem:[%s9421_s1 + $0x808] sm:$0xff]  }
  0xef   :  { %v7424_v36 = vld [vmem:[%s9421_s1 + $0x888] sm:$0xff]  }
  0xf0   :  { %6689 = vmatpush3.bf16.msra.mxu0 %v7375_v37  ;;  %v7425_v37 = vld [vmem:[%s9421_s1 + $0x840] sm:$0xff]  }
  0xf1   :  { %6711 = vmatpush3.bf16.msra.mxu1 %v7376_v38  ;;  %6690 = vmatprep.subr.bf16.mxu0 %v7377_v39  ;;  %v7426_v38 = vld [vmem:[%s9421_s1 + $0x8c0] sm:$0xff]  }
  0xf2   :  { %6712 = vmatprep.subr.bf16.mxu1 %v7378_v40  ;;  %v7427_v39 = vld [vmem:[%s9421_s1 + $0x800] sm:$0xff]  }
  0xf3   :  { %v7428_v40 = vld [vmem:[%s9421_s1 + $0x880] sm:$0xff]  }
  0xf4   :  { %6691 = vmatpush3.bf16.msra.mxu0 %v7379_v41  ;;  %v37_v41 = vld [vmem:[%s9422_s0 + $0x80] sm:$0xff] }
  0xf5   :  { %6713 = vmatpush3.bf16.msra.mxu1 %v7380_v42  ;;  %6692 = vmatprep.subr.bf16.mxu0 %v7381_v43  ;;  %v5821_v43 = vcombine.low %v37_v41, %v37_v41 }
  0xf6   :  { %6714 = vmatprep.subr.bf16.mxu1 %v7382_v44  ;;  %v5822_v44 = vcombine.high %v37_v41, %v37_v41  ;;  %v7472_v41 = vld [vmem:[%s9421_s1 + $0xab8] sm:$0xff]  }
  0xf8   :  { %6693 = vmatpush3.bf16.msra.mxu0 %v7383_v45  ;;  %v38_v45 = vld [vmem:[%s9422_s0 + $0x88] sm:$0xff] }
  0xf9   :  { %6715 = vmatpush3.bf16.msra.mxu1 %v7384_v46  ;;  %6694 = vmatprep.subr.bf16.mxu0 %v7385_v47  ;;  %v5823_v47 = vcombine.low %v38_v45, %v38_v45 }
  0xfa   :  { %6716 = vmatprep.subr.bf16.mxu1 %v7386_v48  ;;  %v5824_v48 = vcombine.high %v38_v45, %v38_v45 }
  0xfc   :  { %6695 = vmatpush3.bf16.msra.mxu0 %v7387_v49  ;;  %v7433_v49 = vld [vmem:[%s9421_s1 + $0x978] sm:$0xff]  }
  0xfd   :  { %6717 = vmatpush3.bf16.msra.mxu1 %v7388_v50  ;;  %6696 = vmatprep.subr.bf16.mxu0 %v7389_v51  ;;  %v7434_v51 = vld [vmem:[%s9421_s1 + $0x9f8] sm:$0xff]  }
  0xfe   :  { %6718 = vmatprep.subr.bf16.mxu1 %v7390_v52 }
 0x100   :  { %6697 = vmatpush3.bf16.msra.mxu0 %v7391_v53 }
 0x101   :  { %6719 = vmatpush3.bf16.msra.mxu1 %v7392_v54  ;;  %6726 = vmatprep.subr.bf16.mxu0 %v7397_v62  ;;  %v7435_v54 = vld [vmem:[%s9421_s1 + $0x938] sm:$0xff]  }
 0x102   :  { %6748 = vmatprep.subr.bf16.mxu1 %v7398_v0 }
 0x103   :  { %v6434_v57 = vpop.f32.mrf.mxu0  ;;  %4973 = vmatmul.mubr.bf16.vlgmr.msra.gmra.mxu0 %v5817_v59 }
 0x104   :  { %v6456_v58 = vpop.f32.mrf.mxu1  ;;  %5013 = vmatmul.mubr.bf16.vlgmr.msra.gmra.mxu1 %v5819_v61  ;;  %6727 = vmatpush3.bf16.msra.mxu0 %v7399_v3  ;;  %v7441_v3 = vld [vmem:[%s9421_s1 + $0x968] sm:$0xff]  }
 0x105   :  { %v6435_v1 = vpop.f32.mrf.mxu0  ;;  %6749 = vmatpush3.bf16.msra.mxu1 %v7400_v6  ;;  %6728 = vmatprep.subr.bf16.mxu0 %v7401_v10  ;;  %v7444_v6 = vld [vmem:[%s9421_s1 + $0x9a8] sm:$0xff]   ;;  %v7448_v10 = vld [vmem:[%s9421_s1 + $0x9a0] sm:$0xff]  }
 0x106   :  { %v6457_v2 = vpop.f32.mrf.mxu1  ;;  %v6436_v4 = vadd.f32 %v6435_v1, %v6434_v57  ;;  %6750 = vmatprep.subr.bf16.mxu1 %v7402_v11  ;;  %5052 = vmatprep.mubr.bf16.mxu0 %v5822_v44  ;;  %v7436_v57 = vld [vmem:[%s9421_s1 + $0x9b8] sm:$0xff]   ;;  %v7439_v1 = vld [vmem:[%s9421_s1 + $0x930] sm:$0xff]  }
 0x107   :  { %v6458_v5 = vadd.f32 %v6457_v2, %v6456_v58  ;;  %v6437_v7 = vpop.f32.mrf.mxu0  ;;  %5092 = vmatprep.mubr.bf16.mxu1 %v5824_v48  ;;  %v7440_v2 = vld [vmem:[%s9421_s1 + $0x9b0] sm:$0xff]   ;;  %v7449_v11 = vld [vmem:[%s9421_s1 + $0x958] sm:$0xff]  }
 0x108   :  { %v6459_v8 = vpop.f32.mrf.mxu1  ;;  %v4495_v9 = vadd.f32 %v6436_v4, %v8464_v28  ;;  %6729 = vmatpush3.bf16.msra.mxu0 %v7403_v15  ;;  %v7416_v28 = vld [vmem:[%s9421_s1 + $0x898] sm:$0xff]   ;;  %v7442_v4 = vld [vmem:[%s9421_s1 + $0x9e8] sm:$0xff]   ;;  %v7445_v7 = vld [vmem:[%s9421_s1 + $0x960] sm:$0xff]  }
 0x109   :  { %v6438_v12 = vpop.f32.mrf.mxu0  ;;  %6751 = vmatpush3.bf16.msra.mxu1 %v7404_v16  ;;  %6730 = vmatprep.subr.bf16.mxu0 %v7405_v17  ;;  %v7446_v8 = vld [vmem:[%s9421_s1 + $0x9e0] sm:$0xff]   ;;  %v7453_v15 = vld [vmem:[%s9421_s1 + $0x950] sm:$0xff]  }
 0x10a   :  { %v6460_v13 = vpop.f32.mrf.mxu1  ;;  %v8569_v14 = vadd.f32 %v6458_v5, %v4495_v9  ;;  %6752 = vmatprep.subr.bf16.mxu1 %v7406_v18  ;;  %v7443_v5 = vld [vmem:[%s9421_s1 + $0x928] sm:$0xff]   ;;  %v7447_v9 = vld [vmem:[%s9421_s1 + $0x920] sm:$0xff]   ;;  %v7450_v12 = vld [vmem:[%s9421_s1 + $0x9d8] sm:$0xff]  }
 0x10b   :  { %v7451_v13 = vld [vmem:[%s9421_s1 + $0x918] sm:$0xff]   ;;  %v7454_v16 = vld [vmem:[%s9421_s1 + $0x9d0] sm:$0xff]  }
 0x10c   :  { %6731 = vmatpush3.bf16.msra.mxu0 %v7407_v19  ;;  %v7455_v17 = vld [vmem:[%s9421_s1 + $0x910] sm:$0xff]   ;;  %v7457_v19 = vld [vmem:[%s9421_s1 + $0x948] sm:$0xff]  }
 0x10d   :  { %6753 = vmatpush3.bf16.msra.mxu1 %v7408_v20  ;;  %6732 = vmatprep.subr.bf16.mxu0 %v7409_v21  ;;  %v7456_v18 = vld [vmem:[%s9421_s1 + $0x990] sm:$0xff]   ;;  %v7458_v20 = vld [vmem:[%s9421_s1 + $0x9c8] sm:$0xff]  }
 0x10e   :  { %6754 = vmatprep.subr.bf16.mxu1 %v7410_v22  ;;  %v7459_v21 = vld [vmem:[%s9421_s1 + $0x908] sm:$0xff]  }
 0x10f   :  { %v7460_v22 = vld [vmem:[%s9421_s1 + $0x988] sm:$0xff]  }
 0x110   :  { %6733 = vmatpush3.bf16.msra.mxu0 %v7411_v23  ;;  %v7461_v23 = vld [vmem:[%s9421_s1 + $0x940] sm:$0xff]  }
 0x111   :  { %6755 = vmatpush3.bf16.msra.mxu1 %v7412_v24  ;;  %6734 = vmatprep.subr.bf16.mxu0 %v7413_v25  ;;  %v7462_v24 = vld [vmem:[%s9421_s1 + $0x9c0] sm:$0xff]  }
 0x112   :  { %6756 = vmatprep.subr.bf16.mxu1 %v7414_v26  ;;  %v7463_v25 = vld [vmem:[%s9421_s1 + $0x900] sm:$0xff]  }
 0x113   :  { %v7464_v26 = vld [vmem:[%s9421_s1 + $0x980] sm:$0xff]  }
 0x114   :  { %6735 = vmatpush3.bf16.msra.mxu0 %v7415_v27  ;;  %v39_v27 = vld [vmem:[%s9422_s0 + $0x90] sm:$0xff] }
 0x115   :  { %6757 = vmatpush3.bf16.msra.mxu1 %v7416_v28  ;;  %6736 = vmatprep.subr.bf16.mxu0 %v7417_v29  ;;  %v40_v28 = vld [vmem:[%s9422_s0 + $0x98] sm:$0xff] }
 0x116   :  { %6758 = vmatprep.subr.bf16.mxu1 %v7418_v30  ;;  %v5825_v30 = vcombine.low %v39_v27, %v39_v27 }
 0x118   :  { %6737 = vmatpush3.bf16.msra.mxu0 %v7419_v31  ;;  %v5826_v31 = vcombine.high %v39_v27, %v39_v27 }
 0x119   :  { %6759 = vmatpush3.bf16.msra.mxu1 %v7420_v32  ;;  %6738 = vmatprep.subr.bf16.mxu0 %v7421_v33  ;;  %v5827_v32 = vcombine.low %v40_v28, %v40_v28  ;;  %v5828_v33 = vcombine.high %v40_v28, %v40_v28  ;;  %v7508_v28 = vld [vmem:[%s9421_s1 + $0xbb8] sm:$0xff]  }
 0x11a   :  { %6760 = vmatprep.subr.bf16.mxu1 %v7422_v34 }
 0x11c   :  { %6739 = vmatpush3.bf16.msra.mxu0 %v7423_v35  ;;  %v7469_v35 = vld [vmem:[%s9421_s1 + $0xa78] sm:$0xff]  }
 0x11d   :  { %6761 = vmatpush3.bf16.msra.mxu1 %v7424_v36  ;;  %6740 = vmatprep.subr.bf16.mxu0 %v7425_v37  ;;  %v7470_v36 = vld [vmem:[%s9421_s1 + $0xaf8] sm:$0xff]  }
 0x11e   :  { %6762 = vmatprep.subr.bf16.mxu1 %v7426_v38  ;;  %v7471_v38 = vld [vmem:[%s9421_s1 + $0xa38] sm:$0xff]  }
 0x120   :  { %6741 = vmatpush3.bf16.msra.mxu0 %v7427_v39 }
 0x121   :  { %6763 = vmatpush3.bf16.msra.mxu1 %v7428_v40  ;;  %6770 = vmatprep.subr.bf16.mxu0 %v7433_v49 }
 0x122   :  { %6792 = vmatprep.subr.bf16.mxu1 %v7434_v51 }
 0x123   :  { %v6478_v42 = vpop.f32.mrf.mxu0  ;;  %5053 = vmatmul.mubr.bf16.vlgmr.msra.gmra.mxu0 %v5821_v43 }
 0x124   :  { %v6500_v46 = vpop.f32.mrf.mxu1  ;;  %5093 = vmatmul.mubr.bf16.vlgmr.msra.gmra.mxu1 %v5823_v47  ;;  %6771 = vmatpush3.bf16.msra.mxu0 %v7435_v54  ;;  %v7474_v47 = vld [vmem:[%s9421_s1 + $0xaf0] sm:$0xff]   ;;  %v7478_v54 = vld [vmem:[%s9421_s1 + $0xae8] sm:$0xff]  }
 0x125   :  { %v6479_v50 = vpop.f32.mrf.mxu0  ;;  %6793 = vmatpush3.bf16.msra.mxu1 %v7436_v57  ;;  %6772 = vmatprep.subr.bf16.mxu0 %v7437_v60  ;;  %v7481_v57 = vld [vmem:[%s9421_s1 + $0xa60] sm:$0xff]  }
 0x126   :  { %v6480_v52 = vadd.f32 %v6479_v50, %v6478_v42  ;;  %v6501_v53 = vpop.f32.mrf.mxu1  ;;  %6794 = vmatprep.subr.bf16.mxu1 %v7438_v63  ;;  %5132 = vmatprep.mubr.bf16.mxu0 %v5826_v31  ;;  %v7475_v50 = vld [vmem:[%s9421_s1 + $0xa30] sm:$0xff]   ;;  %v7484_v60 = vld [vmem:[%s9421_s1 + $0xaa0] sm:$0xff]   ;;  %v7487_v63 = vld [vmem:[%s9421_s1 + $0xa18] sm:$0xff]  }
 0x127   :  { %v6502_v55 = vadd.f32 %v6501_v53, %v6500_v46  ;;  %v6481_v56 = vpop.f32.mrf.mxu0  ;;  %5172 = vmatprep.mubr.bf16.mxu1 %v5828_v33  ;;  %v7473_v46 = vld [vmem:[%s9421_s1 + $0xa70] sm:$0xff]   ;;  %v7477_v53 = vld [vmem:[%s9421_s1 + $0xa68] sm:$0xff]  }
 0x128   :  { %v4575_v58 = vadd.f32 %v6480_v52, %v8569_v14  ;;  %v6503_v59 = vpop.f32.mrf.mxu1  ;;  %6773 = vmatpush3.bf16.msra.mxu0 %v7439_v1  ;;  %v7452_v14 = vld [vmem:[%s9421_s1 + $0x998] sm:$0xff]   ;;  %v7476_v52 = vld [vmem:[%s9421_s1 + $0xab0] sm:$0xff]   ;;  %v7480_v56 = vld [vmem:[%s9421_s1 + $0xaa8] sm:$0xff]  }
 0x129   :  { %v6482_v61 = vpop.f32.mrf.mxu0  ;;  %6795 = vmatpush3.bf16.msra.mxu1 %v7440_v2  ;;  %6774 = vmatprep.subr.bf16.mxu0 %v7441_v3  ;;  %v7483_v59 = vld [vmem:[%s9421_s1 + $0xa20] sm:$0xff]   ;;  %v7489_v1 = vld [vmem:[%s9421_s1 + $0xa50] sm:$0xff]  }
 0x12a   :  { %v8671_v62 = vadd.f32 %v6502_v55, %v4575_v58  ;;  %v6504_v0 = vpop.f32.mrf.mxu1  ;;  %6796 = vmatprep.subr.bf16.mxu1 %v7442_v4  ;;  %v7479_v55 = vld [vmem:[%s9421_s1 + $0xa28] sm:$0xff]   ;;  %v7482_v58 = vld [vmem:[%s9421_s1 + $0xae0] sm:$0xff]   ;;  %v7485_v61 = vld [vmem:[%s9421_s1 + $0xa58] sm:$0xff]  }
 0x12b   :  { %v7488_v0 = vld [vmem:[%s9421_s1 + $0xa98] sm:$0xff]   ;;  %v7490_v2 = vld [vmem:[%s9421_s1 + $0xad0] sm:$0xff]  }
 0x12c   :  { %6775 = vmatpush3.bf16.msra.mxu0 %v7443_v5  ;;  %v7491_v3 = vld [vmem:[%s9421_s1 + $0xa10] sm:$0xff]   ;;  %v7493_v5 = vld [vmem:[%s9421_s1 + $0xa48] sm:$0xff]  }
 0x12d   :  { %6797 = vmatpush3.bf16.msra.mxu1 %v7444_v6  ;;  %6776 = vmatprep.subr.bf16.mxu0 %v7445_v7  ;;  %v7492_v4 = vld [vmem:[%s9421_s1 + $0xa90] sm:$0xff]   ;;  %v7494_v6 = vld [vmem:[%s9421_s1 + $0xac8] sm:$0xff]  }
 0x12e   :  { %6798 = vmatprep.subr.bf16.mxu1 %v7446_v8  ;;  %v7495_v7 = vld [vmem:[%s9421_s1 + $0xa08] sm:$0xff]   ;;  %v7510_v33 = vld [vmem:[%s9421_s1 + $0xbf0] sm:$0xff]  }
 0x12f   :  { %v7496_v8 = vld [vmem:[%s9421_s1 + $0xa88] sm:$0xff]  }
 0x130   :  { %6777 = vmatpush3.bf16.msra.mxu0 %v7447_v9  ;;  %v7497_v9 = vld [vmem:[%s9421_s1 + $0xa40] sm:$0xff]  }
 0x131   :  { %6799 = vmatpush3.bf16.msra.mxu1 %v7448_v10  ;;  %6778 = vmatprep.subr.bf16.mxu0 %v7449_v11  ;;  %v7498_v10 = vld [vmem:[%s9421_s1 + $0xac0] sm:$0xff]  }
 0x132   :  { %6800 = vmatprep.subr.bf16.mxu1 %v7450_v12  ;;  %v7499_v11 = vld [vmem:[%s9421_s1 + $0xa00] sm:$0xff]  }
 0x133   :  { %v7500_v12 = vld [vmem:[%s9421_s1 + $0xa80] sm:$0xff]  }
 0x134   :  { %6779 = vmatpush3.bf16.msra.mxu0 %v7451_v13  ;;  %v41_v13 = vld [vmem:[%s9422_s0 + $0xa0] sm:$0xff] }
 0x135   :  { %6801 = vmatpush3.bf16.msra.mxu1 %v7452_v14  ;;  %6780 = vmatprep.subr.bf16.mxu0 %v7453_v15  ;;  %v42_v14 = vld [vmem:[%s9422_s0 + $0xa8] sm:$0xff] }
 0x136   :  { %6802 = vmatprep.subr.bf16.mxu1 %v7454_v16 }
 0x138   :  { %6781 = vmatpush3.bf16.msra.mxu0 %v7455_v17  ;;  %v5829_v17 = vcombine.low %v41_v13, %v41_v13 }
 0x139   :  { %6803 = vmatpush3.bf16.msra.mxu1 %v7456_v18  ;;  %6782 = vmatprep.subr.bf16.mxu0 %v7457_v19  ;;  %v5830_v18 = vcombine.high %v41_v13, %v41_v13  ;;  %v5831_v19 = vcombine.low %v42_v14, %v42_v14 }
 0x13a   :  { %6804 = vmatprep.subr.bf16.mxu1 %v7458_v20  ;;  %v7505_v20 = vld [vmem:[%s9421_s1 + $0xb78] sm:$0xff]  }
 0x13c   :  { %6783 = vmatpush3.bf16.msra.mxu0 %v7459_v21  ;;  %v5832_v21 = vcombine.high %v42_v14, %v42_v14 }
 0x13d   :  { %6805 = vmatpush3.bf16.msra.mxu1 %v7460_v22  ;;  %6784 = vmatprep.subr.bf16.mxu0 %v7461_v23  ;;  %v7506_v22 = vld [vmem:[%s9421_s1 + $0xbf8] sm:$0xff]  }
 0x13e   :  { %6806 = vmatprep.subr.bf16.mxu1 %v7462_v24 }
 0x140   :  { %6785 = vmatpush3.bf16.msra.mxu0 %v7463_v25  ;;  %v7507_v25 = vld [vmem:[%s9421_s1 + $0xb38] sm:$0xff]  }
 0x141   :  { %6807 = vmatpush3.bf16.msra.mxu1 %v7464_v26  ;;  %6814 = vmatprep.subr.bf16.mxu0 %v7469_v35 }
 0x142   :  { %6836 = vmatprep.subr.bf16.mxu1 %v7470_v36 }
 0x143   :  { %v6522_v29 = vpop.f32.mrf.mxu0  ;;  %5133 = vmatmul.mubr.bf16.vlgmr.msra.gmra.mxu0 %v5825_v30 }
 0x144   :  { %v6544_v34 = vpop.f32.mrf.mxu1  ;;  %5173 = vmatmul.mubr.bf16.vlgmr.msra.gmra.mxu1 %v5827_v32  ;;  %6815 = vmatpush3.bf16.msra.mxu0 %v7471_v38  ;;  %v7509_v32 = vld [vmem:[%s9421_s1 + $0xb70] sm:$0xff]  }
 0x145   :  { %v6523_v37 = vpop.f32.mrf.mxu0  ;;  %6837 = vmatpush3.bf16.msra.mxu1 %v7472_v41  ;;  %6816 = vmatprep.subr.bf16.mxu0 %v7473_v46  ;;  %v7512_v38 = vld [vmem:[%s9421_s1 + $0xbb0] sm:$0xff]   ;;  %v7515_v41 = vld [vmem:[%s9421_s1 + $0xb28] sm:$0xff]   ;;  %v7520_v46 = vld [vmem:[%s9421_s1 + $0xba0] sm:$0xff]  }
 0x146   :  { %v6524_v39 = vadd.f32 %v6523_v37, %v6522_v29  ;;  %v6545_v40 = vpop.f32.mrf.mxu1  ;;  %6838 = vmatprep.subr.bf16.mxu1 %v7474_v47  ;;  %5212 = vmatprep.mubr.bf16.mxu0 %v5830_v18  ;;  %v7511_v37 = vld [vmem:[%s9421_s1 + $0xb30] sm:$0xff]   ;;  %v7521_v47 = vld [vmem:[%s9421_s1 + $0xb58] sm:$0xff]  }
 0x147   :  { %v6546_v42 = vadd.f32 %v6545_v40, %v6544_v34  ;;  %v6525_v43 = vpop.f32.mrf.mxu0  ;;  %5252 = vmatprep.mubr.bf16.mxu1 %v5832_v21  ;;  %v7514_v40 = vld [vmem:[%s9421_s1 + $0xbe8] sm:$0xff]   ;;  %v7545_v18 = vld [vmem:[%s9421_s1 + $0xc70] sm:$0xff]  }
 0x148   :  { %v4655_v44 = vadd.f32 %v6524_v39, %v8671_v62  ;;  %v6547_v45 = vpop.f32.mrf.mxu1  ;;  %6817 = vmatpush3.bf16.msra.mxu0 %v7475_v50  ;;  %v7486_v62 = vld [vmem:[%s9421_s1 + $0xad8] sm:$0xff]   ;;  %v7513_v39 = vld [vmem:[%s9421_s1 + $0xb68] sm:$0xff]   ;;  %v7517_v43 = vld [vmem:[%s9421_s1 + $0xb60] sm:$0xff]  }
 0x149   :  { %v6526_v48 = vpop.f32.mrf.mxu0  ;;  %6839 = vmatpush3.bf16.msra.mxu1 %v7476_v52  ;;  %6818 = vmatprep.subr.bf16.mxu0 %v7477_v53  ;;  %v7519_v45 = vld [vmem:[%s9421_s1 + $0xb20] sm:$0xff]   ;;  %v7524_v50 = vld [vmem:[%s9421_s1 + $0xb98] sm:$0xff]   ;;  %v7526_v52 = vld [vmem:[%s9421_s1 + $0xbd0] sm:$0xff]  }
 0x14a   :  { %v8779_v49 = vadd.f32 %v6546_v42, %v4655_v44  ;;  %v6548_v51 = vpop.f32.mrf.mxu1  ;;  %6840 = vmatprep.subr.bf16.mxu1 %v7478_v54  ;;  %v7516_v42 = vld [vmem:[%s9421_s1 + $0xba8] sm:$0xff]   ;;  %v7518_v44 = vld [vmem:[%s9421_s1 + $0xbe0] sm:$0xff]   ;;  %v7522_v48 = vld [vmem:[%s9421_s1 + $0xbd8] sm:$0xff]  }
 0x14b   :  { %v7525_v51 = vld [vmem:[%s9421_s1 + $0xb50] sm:$0xff]  }
 0x14c   :  { %6819 = vmatpush3.bf16.msra.mxu0 %v7479_v55  ;;  %v7527_v53 = vld [vmem:[%s9421_s1 + $0xb10] sm:$0xff]   ;;  %v7529_v55 = vld [vmem:[%s9421_s1 + $0xb48] sm:$0xff]  }
 0x14d   :  { %6841 = vmatpush3.bf16.msra.mxu1 %v7480_v56  ;;  %6820 = vmatprep.subr.bf16.mxu0 %v7481_v57  ;;  %v7528_v54 = vld [vmem:[%s9421_s1 + $0xb90] sm:$0xff]   ;;  %v7530_v56 = vld [vmem:[%s9421_s1 + $0xbc8] sm:$0xff]  }
 0x14e   :  { %6842 = vmatprep.subr.bf16.mxu1 %v7482_v58  ;;  %v7531_v57 = vld [vmem:[%s9421_s1 + $0xb08] sm:$0xff]   ;;  %v7546_v21 = vld [vmem:[%s9421_s1 + $0xcf0] sm:$0xff]  }
 0x14f   :  { %v7532_v58 = vld [vmem:[%s9421_s1 + $0xb88] sm:$0xff]  }
 0x150   :  { %6821 = vmatpush3.bf16.msra.mxu0 %v7483_v59  ;;  %v7533_v59 = vld [vmem:[%s9421_s1 + $0xb40] sm:$0xff]  }
 0x151   :  { %6843 = vmatpush3.bf16.msra.mxu1 %v7484_v60  ;;  %6822 = vmatprep.subr.bf16.mxu0 %v7485_v61  ;;  %v7534_v60 = vld [vmem:[%s9421_s1 + $0xbc0] sm:$0xff]  }
 0x152   :  { %6844 = vmatprep.subr.bf16.mxu1 %v7486_v62  ;;  %v7535_v61 = vld [vmem:[%s9421_s1 + $0xb00] sm:$0xff]  }
 0x153   :  { %v7536_v62 = vld [vmem:[%s9421_s1 + $0xb80] sm:$0xff]  }
 0x154   :  { %6823 = vmatpush3.bf16.msra.mxu0 %v7487_v63  ;;  %v43_v63 = vld [vmem:[%s9422_s0 + $0xb0] sm:$0xff] }
 0x155   :  { %6845 = vmatpush3.bf16.msra.mxu1 %v7488_v0  ;;  %6824 = vmatprep.subr.bf16.mxu0 %v7489_v1  ;;  %v5833_v1 = vcombine.low %v43_v63, %v43_v63 }
 0x156   :  { %6846 = vmatprep.subr.bf16.mxu1 %v7490_v2  ;;  %v5834_v2 = vcombine.high %v43_v63, %v43_v63  ;;  %v7580_v63 = vld [vmem:[%s9421_s1 + $0xdb8] sm:$0xff]  }
 0x158   :  { %6825 = vmatpush3.bf16.msra.mxu0 %v7491_v3  ;;  %v44_v3 = vld [vmem:[%s9422_s0 + $0xb8] sm:$0xff] }
 0x159   :  { %6847 = vmatpush3.bf16.msra.mxu1 %v7492_v4  ;;  %6826 = vmatprep.subr.bf16.mxu0 %v7493_v5  ;;  %v5835_v5 = vcombine.low %v44_v3, %v44_v3 }
 0x15a   :  { %6848 = vmatprep.subr.bf16.mxu1 %v7494_v6  ;;  %v5836_v6 = vcombine.high %v44_v3, %v44_v3 }
 0x15c   :  { %6827 = vmatpush3.bf16.msra.mxu0 %v7495_v7  ;;  %v7541_v7 = vld [vmem:[%s9421_s1 + $0xc78] sm:$0xff]  }
 0x15d   :  { %6849 = vmatpush3.bf16.msra.mxu1 %v7496_v8  ;;  %6828 = vmatprep.subr.bf16.mxu0 %v7497_v9  ;;  %v7542_v9 = vld [vmem:[%s9421_s1 + $0xcf8] sm:$0xff]  }
 0x15e   :  { %6850 = vmatprep.subr.bf16.mxu1 %v7498_v10 }
 0x160   :  { %6829 = vmatpush3.bf16.msra.mxu0 %v7499_v11 }
 0x161   :  { %6851 = vmatpush3.bf16.msra.mxu1 %v7500_v12  ;;  %6858 = vmatprep.subr.bf16.mxu0 %v7505_v20  ;;  %v7543_v12 = vld [vmem:[%s9421_s1 + $0xc38] sm:$0xff]  }
 0x162   :  { %6880 = vmatprep.subr.bf16.mxu1 %v7506_v22 }
 0x163   :  { %v6566_v15 = vpop.f32.mrf.mxu0  ;;  %5213 = vmatmul.mubr.bf16.vlgmr.msra.gmra.mxu0 %v5829_v17 }
 0x164   :  { %v6588_v16 = vpop.f32.mrf.mxu1  ;;  %5253 = vmatmul.mubr.bf16.vlgmr.msra.gmra.mxu1 %v5831_v19  ;;  %6859 = vmatpush3.bf16.msra.mxu0 %v7507_v25  ;;  %v7549_v25 = vld [vmem:[%s9421_s1 + $0xc68] sm:$0xff]  }
 0x165   :  { %v6567_v23 = vpop.f32.mrf.mxu0  ;;  %6881 = vmatpush3.bf16.msra.mxu1 %v7508_v28  ;;  %6860 = vmatprep.subr.bf16.mxu0 %v7509_v32  ;;  %v7552_v28 = vld [vmem:[%s9421_s1 + $0xca8] sm:$0xff]   ;;  %v7556_v32 = vld [vmem:[%s9421_s1 + $0xca0] sm:$0xff]  }
 0x166   :  { %v6589_v24 = vpop.f32.mrf.mxu1  ;;  %v6568_v26 = vadd.f32 %v6567_v23, %v6566_v15  ;;  %6882 = vmatprep.subr.bf16.mxu1 %v7510_v33  ;;  %5292 = vmatprep.mubr.bf16.mxu0 %v5834_v2  ;;  %v7544_v15 = vld [vmem:[%s9421_s1 + $0xcb8] sm:$0xff]   ;;  %v7547_v23 = vld [vmem:[%s9421_s1 + $0xc30] sm:$0xff]  }
 0x167   :  { %v6590_v27 = vadd.f32 %v6589_v24, %v6588_v16  ;;  %v6569_v29 = vpop.f32.mrf.mxu0  ;;  %5332 = vmatprep.mubr.bf16.mxu1 %v5836_v6  ;;  %v7548_v24 = vld [vmem:[%s9421_s1 + $0xcb0] sm:$0xff]   ;;  %v7557_v33 = vld [vmem:[%s9421_s1 + $0xc58] sm:$0xff]  }
 0x168   :  { %v6591_v30 = vpop.f32.mrf.mxu1  ;;  %v4735_v31 = vadd.f32 %v6568_v26, %v8779_v49  ;;  %6861 = vmatpush3.bf16.msra.mxu0 %v7511_v37  ;;  %v7523_v49 = vld [vmem:[%s9421_s1 + $0xb18] sm:$0xff]   ;;  %v7550_v26 = vld [vmem:[%s9421_s1 + $0xce8] sm:$0xff]   ;;  %v7553_v29 = vld [vmem:[%s9421_s1 + $0xc60] sm:$0xff]  }
 0x169   :  { %v6570_v34 = vpop.f32.mrf.mxu0  ;;  %6883 = vmatpush3.bf16.msra.mxu1 %v7512_v38  ;;  %6862 = vmatprep.subr.bf16.mxu0 %v7513_v39  ;;  %v7554_v30 = vld [vmem:[%s9421_s1 + $0xce0] sm:$0xff]   ;;  %v7561_v37 = vld [vmem:[%s9421_s1 + $0xc50] sm:$0xff]  }
 0x16a   :  { %v6592_v35 = vpop.f32.mrf.mxu1  ;;  %v8884_v36 = vadd.f32 %v6590_v27, %v4735_v31  ;;  %6884 = vmatprep.subr.bf16.mxu1 %v7514_v40  ;;  %v7551_v27 = vld [vmem:[%s9421_s1 + $0xc28] sm:$0xff]   ;;  %v7555_v31 = vld [vmem:[%s9421_s1 + $0xc20] sm:$0xff]   ;;  %v7558_v34 = vld [vmem:[%s9421_s1 + $0xcd8] sm:$0xff]  }
 0x16b   :  { %v7559_v35 = vld [vmem:[%s9421_s1 + $0xc18] sm:$0xff]   ;;  %v7562_v38 = vld [vmem:[%s9421_s1 + $0xcd0] sm:$0xff]  }
 0x16c   :  { %6863 = vmatpush3.bf16.msra.mxu0 %v7515_v41  ;;  %v7563_v39 = vld [vmem:[%s9421_s1 + $0xc10] sm:$0xff]   ;;  %v7565_v41 = vld [vmem:[%s9421_s1 + $0xc48] sm:$0xff]  }
 0x16d   :  { %6885 = vmatpush3.bf16.msra.mxu1 %v7516_v42  ;;  %6864 = vmatprep.subr.bf16.mxu0 %v7517_v43  ;;  %v7564_v40 = vld [vmem:[%s9421_s1 + $0xc90] sm:$0xff]   ;;  %v7566_v42 = vld [vmem:[%s9421_s1 + $0xcc8] sm:$0xff]  }
 0x16e   :  { %6886 = vmatprep.subr.bf16.mxu1 %v7518_v44  ;;  %v7567_v43 = vld [vmem:[%s9421_s1 + $0xc08] sm:$0xff]  }
 0x16f   :  { %v7568_v44 = vld [vmem:[%s9421_s1 + $0xc88] sm:$0xff]  }
 0x170   :  { %6865 = vmatpush3.bf16.msra.mxu0 %v7519_v45  ;;  %v7569_v45 = vld [vmem:[%s9421_s1 + $0xc40] sm:$0xff]  }
 0x171   :  { %6887 = vmatpush3.bf16.msra.mxu1 %v7520_v46  ;;  %6866 = vmatprep.subr.bf16.mxu0 %v7521_v47  ;;  %v7570_v46 = vld [vmem:[%s9421_s1 + $0xcc0] sm:$0xff]  }
 0x172   :  { %6888 = vmatprep.subr.bf16.mxu1 %v7522_v48  ;;  %v7571_v47 = vld [vmem:[%s9421_s1 + $0xc00] sm:$0xff]  }
 0x173   :  { %v7572_v48 = vld [vmem:[%s9421_s1 + $0xc80] sm:$0xff]  }
 0x174   :  { %6867 = vmatpush3.bf16.msra.mxu0 %v7523_v49  ;;  %v45_v49 = vld [vmem:[%s9422_s0 + $0xc0] sm:$0xff] }
 0x175   :  { %6889 = vmatpush3.bf16.msra.mxu1 %v7524_v50  ;;  %6868 = vmatprep.subr.bf16.mxu0 %v7525_v51  ;;  %v46_v50 = vld [vmem:[%s9422_s0 + $0xc8] sm:$0xff] }
 0x176   :  { %6890 = vmatprep.subr.bf16.mxu1 %v7526_v52  ;;  %v5837_v52 = vcombine.low %v45_v49, %v45_v49 }
 0x178   :  { %6869 = vmatpush3.bf16.msra.mxu0 %v7527_v53  ;;  %v5838_v53 = vcombine.high %v45_v49, %v45_v49  ;;  %v7616_v49 = vld [vmem:[%s9421_s1 + $0xeb8] sm:$0xff]  }
 0x179   :  { %6891 = vmatpush3.bf16.msra.mxu1 %v7528_v54  ;;  %6870 = vmatprep.subr.bf16.mxu0 %v7529_v55  ;;  %v5839_v54 = vcombine.low %v46_v50, %v46_v50  ;;  %v5840_v55 = vcombine.high %v46_v50, %v46_v50 }
 0x17a   :  { %6892 = vmatprep.subr.bf16.mxu1 %v7530_v56 }
 0x17c   :  { %6871 = vmatpush3.bf16.msra.mxu0 %v7531_v57  ;;  %v7577_v57 = vld [vmem:[%s9421_s1 + $0xd78] sm:$0xff]  }
 0x17d   :  { %6893 = vmatpush3.bf16.msra.mxu1 %v7532_v58  ;;  %6872 = vmatprep.subr.bf16.mxu0 %v7533_v59  ;;  %v7578_v58 = vld [vmem:[%s9421_s1 + $0xdf8] sm:$0xff]  }
 0x17e   :  { %6894 = vmatprep.subr.bf16.mxu1 %v7534_v60  ;;  %v7579_v60 = vld [vmem:[%s9421_s1 + $0xd38] sm:$0xff]  }
 0x180   :  { %6873 = vmatpush3.bf16.msra.mxu0 %v7535_v61 }
 0x181   :  { %6895 = vmatpush3.bf16.msra.mxu1 %v7536_v62  ;;  %6902 = vmatprep.subr.bf16.mxu0 %v7541_v7 }
 0x182   :  { %6924 = vmatprep.subr.bf16.mxu1 %v7542_v9 }
 0x183   :  { %v6610_v0 = vpop.f32.mrf.mxu0  ;;  %5293 = vmatmul.mubr.bf16.vlgmr.msra.gmra.mxu0 %v5833_v1 }
 0x184   :  { %v6632_v4 = vpop.f32.mrf.mxu1  ;;  %5333 = vmatmul.mubr.bf16.vlgmr.msra.gmra.mxu1 %v5835_v5  ;;  %6903 = vmatpush3.bf16.msra.mxu0 %v7543_v12  ;;  %v7582_v5 = vld [vmem:[%s9421_s1 + $0xdf0] sm:$0xff]   ;;  %v7586_v12 = vld [vmem:[%s9421_s1 + $0xde8] sm:$0xff]  }
 0x185   :  { %v6611_v8 = vpop.f32.mrf.mxu0  ;;  %6925 = vmatpush3.bf16.msra.mxu1 %v7544_v15  ;;  %6904 = vmatprep.subr.bf16.mxu0 %v7545_v18  ;;  %v7589_v15 = vld [vmem:[%s9421_s1 + $0xd60] sm:$0xff]  }
 0x186   :  { %v6612_v10 = vadd.f32 %v6611_v8, %v6610_v0  ;;  %v6633_v11 = vpop.f32.mrf.mxu1  ;;  %6926 = vmatprep.subr.bf16.mxu1 %v7546_v21  ;;  %5372 = vmatprep.mubr.bf16.mxu0 %v5838_v53  ;;  %v7583_v8 = vld [vmem:[%s9421_s1 + $0xd30] sm:$0xff]   ;;  %v7592_v18 = vld [vmem:[%s9421_s1 + $0xda0] sm:$0xff]   ;;  %v7595_v21 = vld [vmem:[%s9421_s1 + $0xd18] sm:$0xff]  }
 0x187   :  { %v6634_v13 = vadd.f32 %v6633_v11, %v6632_v4  ;;  %v6613_v14 = vpop.f32.mrf.mxu0  ;;  %5412 = vmatprep.mubr.bf16.mxu1 %v5840_v55  ;;  %v7581_v4 = vld [vmem:[%s9421_s1 + $0xd70] sm:$0xff]   ;;  %v7585_v11 = vld [vmem:[%s9421_s1 + $0xd68] sm:$0xff]  }
 0x188   :  { %v4815_v16 = vadd.f32 %v6612_v10, %v8884_v36  ;;  %v6635_v17 = vpop.f32.mrf.mxu1  ;;  %6905 = vmatpush3.bf16.msra.mxu0 %v7547_v23  ;;  %v7560_v36 = vld [vmem:[%s9421_s1 + $0xc98] sm:$0xff]   ;;  %v7584_v10 = vld [vmem:[%s9421_s1 + $0xdb0] sm:$0xff]   ;;  %v7588_v14 = vld [vmem:[%s9421_s1 + $0xda8] sm:$0xff]  }
 0x189   :  { %v6614_v19 = vpop.f32.mrf.mxu0  ;;  %6927 = vmatpush3.bf16.msra.mxu1 %v7548_v24  ;;  %6906 = vmatprep.subr.bf16.mxu0 %v7549_v25  ;;  %v7591_v17 = vld [vmem:[%s9421_s1 + $0xd20] sm:$0xff]   ;;  %v7597_v23 = vld [vmem:[%s9421_s1 + $0xd50] sm:$0xff]  }
 0x18a   :  { %v8986_v20 = vadd.f32 %v6634_v13, %v4815_v16  ;;  %v6636_v22 = vpop.f32.mrf.mxu1  ;;  %6928 = vmatprep.subr.bf16.mxu1 %v7550_v26  ;;  %v7587_v13 = vld [vmem:[%s9421_s1 + $0xd28] sm:$0xff]   ;;  %v7590_v16 = vld [vmem:[%s9421_s1 + $0xde0] sm:$0xff]   ;;  %v7593_v19 = vld [vmem:[%s9421_s1 + $0xd58] sm:$0xff]  }
 0x18b   :  { %v7596_v22 = vld [vmem:[%s9421_s1 + $0xd98] sm:$0xff]   ;;  %v7598_v24 = vld [vmem:[%s9421_s1 + $0xdd0] sm:$0xff]  }
 0x18c   :  { %6907 = vmatpush3.bf16.msra.mxu0 %v7551_v27  ;;  %v7599_v25 = vld [vmem:[%s9421_s1 + $0xd10] sm:$0xff]   ;;  %v7601_v27 = vld [vmem:[%s9421_s1 + $0xd48] sm:$0xff]  }
 0x18d   :  { %6929 = vmatpush3.bf16.msra.mxu1 %v7552_v28  ;;  %6908 = vmatprep.subr.bf16.mxu0 %v7553_v29  ;;  %v7600_v26 = vld [vmem:[%s9421_s1 + $0xd90] sm:$0xff]   ;;  %v7602_v28 = vld [vmem:[%s9421_s1 + $0xdc8] sm:$0xff]  }
 0x18e   :  { %6930 = vmatprep.subr.bf16.mxu1 %v7554_v30  ;;  %v7603_v29 = vld [vmem:[%s9421_s1 + $0xd08] sm:$0xff]   ;;  %v7618_v55 = vld [vmem:[%s9421_s1 + $0xef0] sm:$0xff]  }
 0x18f   :  { %v7604_v30 = vld [vmem:[%s9421_s1 + $0xd88] sm:$0xff]  }
 0x190   :  { %6909 = vmatpush3.bf16.msra.mxu0 %v7555_v31  ;;  %v7605_v31 = vld [vmem:[%s9421_s1 + $0xd40] sm:$0xff]  }
 0x191   :  { %6931 = vmatpush3.bf16.msra.mxu1 %v7556_v32  ;;  %6910 = vmatprep.subr.bf16.mxu0 %v7557_v33  ;;  %v7606_v32 = vld [vmem:[%s9421_s1 + $0xdc0] sm:$0xff]  }
 0x192   :  { %6932 = vmatprep.subr.bf16.mxu1 %v7558_v34  ;;  %v7607_v33 = vld [vmem:[%s9421_s1 + $0xd00] sm:$0xff]  }
 0x193   :  { %v7608_v34 = vld [vmem:[%s9421_s1 + $0xd80] sm:$0xff]  }
 0x194   :  { %6911 = vmatpush3.bf16.msra.mxu0 %v7559_v35  ;;  %v47_v35 = vld [vmem:[%s9422_s0 + $0xd0] sm:$0xff] }
 0x195   :  { %6933 = vmatpush3.bf16.msra.mxu1 %v7560_v36  ;;  %6912 = vmatprep.subr.bf16.mxu0 %v7561_v37  ;;  %v48_v36 = vld [vmem:[%s9422_s0 + $0xd8] sm:$0xff] }
 0x196   :  { %6934 = vmatprep.subr.bf16.mxu1 %v7562_v38  ;;  %v5841_v38 = vcombine.low %v47_v35, %v47_v35 }
 0x198   :  { %6913 = vmatpush3.bf16.msra.mxu0 %v7563_v39  ;;  %v5842_v39 = vcombine.high %v47_v35, %v47_v35 }
 0x199   :  { %6935 = vmatpush3.bf16.msra.mxu1 %v7564_v40  ;;  %6914 = vmatprep.subr.bf16.mxu0 %v7565_v41  ;;  %v5843_v40 = vcombine.low %v48_v36, %v48_v36 }
 0x19a   :  { %6936 = vmatprep.subr.bf16.mxu1 %v7566_v42  ;;  %v7613_v42 = vld [vmem:[%s9421_s1 + $0xe78] sm:$0xff]  }
 0x19c   :  { %6915 = vmatpush3.bf16.msra.mxu0 %v7567_v43  ;;  %v5844_v43 = vcombine.high %v48_v36, %v48_v36  ;;  %v7652_v36 = vld [vmem:[%s9421_s1 + $0xfb8] sm:$0xff]  }
 0x19d   :  { %6937 = vmatpush3.bf16.msra.mxu1 %v7568_v44  ;;  %6916 = vmatprep.subr.bf16.mxu0 %v7569_v45  ;;  %v7614_v44 = vld [vmem:[%s9421_s1 + $0xef8] sm:$0xff]  }
 0x19e   :  { %6938 = vmatprep.subr.bf16.mxu1 %v7570_v46  ;;  %v7615_v46 = vld [vmem:[%s9421_s1 + $0xe38] sm:$0xff]  }
 0x1a0   :  { %6917 = vmatpush3.bf16.msra.mxu0 %v7571_v47 }
 0x1a1   :  { %6939 = vmatpush3.bf16.msra.mxu1 %v7572_v48  ;;  %6946 = vmatprep.subr.bf16.mxu0 %v7577_v57 }
 0x1a2   :  { %6968 = vmatprep.subr.bf16.mxu1 %v7578_v58  ;;  %v7619_v58 = vld [vmem:[%s9421_s1 + $0xe30] sm:$0xff]  }
 0x1a3   :  { %v6654_v51 = vpop.f32.mrf.mxu0  ;;  %5373 = vmatmul.mubr.bf16.vlgmr.msra.gmra.mxu0 %v5837_v52 }
 0x1a4   :  { %v6676_v56 = vpop.f32.mrf.mxu1  ;;  %5413 = vmatmul.mubr.bf16.vlgmr.msra.gmra.mxu1 %v5839_v54  ;;  %6947 = vmatpush3.bf16.msra.mxu0 %v7579_v60  ;;  %v7617_v54 = vld [vmem:[%s9421_s1 + $0xe70] sm:$0xff]  }
 0x1a5   :  { %v6655_v59 = vpop.f32.mrf.mxu0  ;;  %6969 = vmatpush3.bf16.msra.mxu1 %v7580_v63  ;;  %6948 = vmatprep.subr.bf16.mxu0 %v7581_v4  ;;  %v7620_v60 = vld [vmem:[%s9421_s1 + $0xeb0] sm:$0xff]   ;;  %v7623_v63 = vld [vmem:[%s9421_s1 + $0xe28] sm:$0xff]   ;;  %v7628_v4 = vld [vmem:[%s9421_s1 + $0xea0] sm:$0xff]  }
 0x1a6   :  { %v6656_v61 = vadd.f32 %v6655_v59, %v6654_v51  ;;  %v6677_v62 = vpop.f32.mrf.mxu1  ;;  %6970 = vmatprep.subr.bf16.mxu1 %v7582_v5  ;;  %5452 = vmatprep.mubr.bf16.mxu0 %v5842_v39  ;;  %v7629_v5 = vld [vmem:[%s9421_s1 + $0xe58] sm:$0xff]  }
 0x1a7   :  { %v6678_v0 = vadd.f32 %v6677_v62, %v6676_v56  ;;  %v6657_v1 = vpop.f32.mrf.mxu0  ;;  %5492 = vmatprep.mubr.bf16.mxu1 %v5844_v43  ;;  %v7622_v62 = vld [vmem:[%s9421_s1 + $0xee8] sm:$0xff]  }
 0x1a8   :  { %v4895_v2 = vadd.f32 %v6656_v61, %v8986_v20  ;;  %v6679_v3 = vpop.f32.mrf.mxu1  ;;  %6949 = vmatpush3.bf16.msra.mxu0 %v7583_v8  ;;  %v7594_v20 = vld [vmem:[%s9421_s1 + $0xdd8] sm:$0xff]   ;;  %v7621_v61 = vld [vmem:[%s9421_s1 + $0xe68] sm:$0xff]   ;;  %v7625_v1 = vld [vmem:[%s9421_s1 + $0xe60] sm:$0xff]  }
 0x1a9   :  { %v6658_v6 = vpop.f32.mrf.mxu0  ;;  %6971 = vmatpush3.bf16.msra.mxu1 %v7584_v10  ;;  %6950 = vmatprep.subr.bf16.mxu0 %v7585_v11  ;;  %v7627_v3 = vld [vmem:[%s9421_s1 + $0xe20] sm:$0xff]   ;;  %v7632_v8 = vld [vmem:[%s9421_s1 + $0xe98] sm:$0xff]   ;;  %v7634_v10 = vld [vmem:[%s9421_s1 + $0xed0] sm:$0xff]  }
 0x1aa   :  { %v9094_v7 = vadd.f32 %v6678_v0, %v4895_v2  ;;  %v6680_v9 = vpop.f32.mrf.mxu1  ;;  %6972 = vmatprep.subr.bf16.mxu1 %v7586_v12  ;;  %v7624_v0 = vld [vmem:[%s9421_s1 + $0xea8] sm:$0xff]   ;;  %v7626_v2 = vld [vmem:[%s9421_s1 + $0xee0] sm:$0xff]   ;;  %v7630_v6 = vld [vmem:[%s9421_s1 + $0xed8] sm:$0xff]  }
 0x1ab   :  { %v7633_v9 = vld [vmem:[%s9421_s1 + $0xe50] sm:$0xff]  }
 0x1ac   :  { %6951 = vmatpush3.bf16.msra.mxu0 %v7587_v13  ;;  %v7635_v11 = vld [vmem:[%s9421_s1 + $0xe10] sm:$0xff]   ;;  %v7637_v13 = vld [vmem:[%s9421_s1 + $0xe48] sm:$0xff]  }
 0x1ad   :  { %6973 = vmatpush3.bf16.msra.mxu1 %v7588_v14  ;;  %6952 = vmatprep.subr.bf16.mxu0 %v7589_v15  ;;  %v7636_v12 = vld [vmem:[%s9421_s1 + $0xe90] sm:$0xff]   ;;  %v7638_v14 = vld [vmem:[%s9421_s1 + $0xec8] sm:$0xff]  }
 0x1ae   :  { %6974 = vmatprep.subr.bf16.mxu1 %v7590_v16  ;;  %v7639_v15 = vld [vmem:[%s9421_s1 + $0xe08] sm:$0xff]  }
 0x1af   :  { %v7640_v16 = vld [vmem:[%s9421_s1 + $0xe88] sm:$0xff]  }
 0x1b0   :  { %6953 = vmatpush3.bf16.msra.mxu0 %v7591_v17  ;;  %v7641_v17 = vld [vmem:[%s9421_s1 + $0xe40] sm:$0xff]  }
 0x1b1   :  { %6975 = vmatpush3.bf16.msra.mxu1 %v7592_v18  ;;  %6954 = vmatprep.subr.bf16.mxu0 %v7593_v19  ;;  %v7642_v18 = vld [vmem:[%s9421_s1 + $0xec0] sm:$0xff]  }
 0x1b2   :  { %6976 = vmatprep.subr.bf16.mxu1 %v7594_v20  ;;  %v7643_v19 = vld [vmem:[%s9421_s1 + $0xe00] sm:$0xff]  }
 0x1b3   :  { %v7644_v20 = vld [vmem:[%s9421_s1 + $0xe80] sm:$0xff]  }
 0x1b4   :  { %6955 = vmatpush3.bf16.msra.mxu0 %v7595_v21  ;;  %v49_v21 = vld [vmem:[%s9422_s0 + $0xe0] sm:$0xff] }
 0x1b5   :  { %6977 = vmatpush3.bf16.msra.mxu1 %v7596_v22  ;;  %6956 = vmatprep.subr.bf16.mxu0 %v7597_v23  ;;  %v5845_v22 = vcombine.low %v49_v21, %v49_v21  ;;  %v5846_v23 = vcombine.high %v49_v21, %v49_v21 }
 0x1b6   :  { %6978 = vmatprep.subr.bf16.mxu1 %v7598_v24  ;;  %v50_v24 = vld [vmem:[%s9422_s0 + $0xe8] sm:$0xff] }
 0x1b8   :  { %6957 = vmatpush3.bf16.msra.mxu0 %v7599_v25 }
 0x1b9   :  { %6979 = vmatpush3.bf16.msra.mxu1 %v7600_v26  ;;  %6958 = vmatprep.subr.bf16.mxu0 %v7601_v27  ;;  %v5847_v27 = vcombine.low %v50_v24, %v50_v24 }
 0x1ba   :  { %6980 = vmatprep.subr.bf16.mxu1 %v7602_v28  ;;  %v5848_v28 = vcombine.high %v50_v24, %v50_v24 }
 0x1bc   :  { %6959 = vmatpush3.bf16.msra.mxu0 %v7603_v29  ;;  %v7649_v29 = vld [vmem:[%s9421_s1 + $0xf78] sm:$0xff]  }
 0x1bd   :  { %6981 = vmatpush3.bf16.msra.mxu1 %v7604_v30  ;;  %6960 = vmatprep.subr.bf16.mxu0 %v7605_v31  ;;  %v7650_v30 = vld [vmem:[%s9421_s1 + $0xff8] sm:$0xff]  }
 0x1be   :  { %6982 = vmatprep.subr.bf16.mxu1 %v7606_v32 }
 0x1c0   :  { %6961 = vmatpush3.bf16.msra.mxu0 %v7607_v33  ;;  %v7651_v33 = vld [vmem:[%s9421_s1 + $0xf38] sm:$0xff]  }
 0x1c1   :  { %6983 = vmatpush3.bf16.msra.mxu1 %v7608_v34  ;;  %6990 = vmatprep.subr.bf16.mxu0 %v7613_v42 }
 0x1c2   :  { %7012 = vmatprep.subr.bf16.mxu1 %v7614_v44 }
 0x1c3   :  { %v6698_v37 = vpop.f32.mrf.mxu0  ;;  %5453 = vmatmul.mubr.bf16.vlgmr.msra.gmra.mxu0 %v5841_v38 }
 0x1c4   :  { %v6720_v41 = vpop.f32.mrf.mxu1  ;;  %5493 = vmatmul.mubr.bf16.vlgmr.msra.gmra.mxu1 %v5843_v40  ;;  %6991 = vmatpush3.bf16.msra.mxu0 %v7615_v46  ;;  %v7653_v40 = vld [vmem:[%s9421_s1 + $0xf70] sm:$0xff]  }
 0x1c5   :  { %v6699_v45 = vpop.f32.mrf.mxu0  ;;  %7013 = vmatpush3.bf16.msra.mxu1 %v7616_v49  ;;  %6992 = vmatprep.subr.bf16.mxu0 %v7617_v54  ;;  %v7656_v46 = vld [vmem:[%s9421_s1 + $0xfb0] sm:$0xff]   ;;  %v7659_v49 = vld [vmem:[%s9421_s1 + $0xf28] sm:$0xff]   ;;  %v7664_v54 = vld [vmem:[%s9421_s1 + $0xfa0] sm:$0xff]  }
 0x1c6   :  { %v6700_v47 = vadd.f32 %v6699_v45, %v6698_v37  ;;  %v6721_v48 = vpop.f32.mrf.mxu1  ;;  %7014 = vmatprep.subr.bf16.mxu1 %v7618_v55  ;;  %5532 = vmatprep.mubr.bf16.mxu0 %v5846_v23  ;;  %v7655_v45 = vld [vmem:[%s9421_s1 + $0xf30] sm:$0xff]   ;;  %v7665_v55 = vld [vmem:[%s9421_s1 + $0xf58] sm:$0xff]  }
 0x1c7   :  { %v6722_v50 = vadd.f32 %v6721_v48, %v6720_v41  ;;  %v6701_v51 = vpop.f32.mrf.mxu0  ;;  %5572 = vmatprep.mubr.bf16.mxu1 %v5848_v28  ;;  %v7654_v41 = vld [vmem:[%s9421_s1 + $0xff0] sm:$0xff]   ;;  %v7658_v48 = vld [vmem:[%s9421_s1 + $0xfe8] sm:$0xff]  }
 0x1c8   :  { %v4975_v52 = vadd.f32 %v6700_v47, %v9094_v7  ;;  %v6723_v53 = vpop.f32.mrf.mxu1  ;;  %6993 = vmatpush3.bf16.msra.mxu0 %v7619_v58  ;;  %v7631_v7 = vld [vmem:[%s9421_s1 + $0xe18] sm:$0xff]   ;;  %v7657_v47 = vld [vmem:[%s9421_s1 + $0xf68] sm:$0xff]   ;;  %v7661_v51 = vld [vmem:[%s9421_s1 + $0xf60] sm:$0xff]  }
 0x1c9   :  { %v6702_v56 = vpop.f32.mrf.mxu0  ;;  %7015 = vmatpush3.bf16.msra.mxu1 %v7620_v60  ;;  %6994 = vmatprep.subr.bf16.mxu0 %v7621_v61  ;;  %v7663_v53 = vld [vmem:[%s9421_s1 + $0xf20] sm:$0xff]   ;;  %v7668_v58 = vld [vmem:[%s9421_s1 + $0xf98] sm:$0xff]   ;;  %v7670_v60 = vld [vmem:[%s9421_s1 + $0xfd0] sm:$0xff]  }
 0x1ca   :  { %v9199_v57 = vadd.f32 %v6722_v50, %v4975_v52  ;;  %v6724_v59 = vpop.f32.mrf.mxu1  ;;  %7016 = vmatprep.subr.bf16.mxu1 %v7622_v62  ;;  %v7660_v50 = vld [vmem:[%s9421_s1 + $0xfa8] sm:$0xff]   ;;  %v7662_v52 = vld [vmem:[%s9421_s1 + $0xfe0] sm:$0xff]   ;;  %v7666_v56 = vld [vmem:[%s9421_s1 + $0xfd8] sm:$0xff]  }
 0x1cb   :  { %v7669_v59 = vld [vmem:[%s9421_s1 + $0xf50] sm:$0xff]  }
 0x1cc   :  { %6995 = vmatpush3.bf16.msra.mxu0 %v7623_v63  ;;  %v7671_v61 = vld [vmem:[%s9421_s1 + $0xf10] sm:$0xff]   ;;  %v7673_v63 = vld [vmem:[%s9421_s1 + $0xf48] sm:$0xff]  }
 0x1cd   :  { %7017 = vmatpush3.bf16.msra.mxu1 %v7624_v0  ;;  %6996 = vmatprep.subr.bf16.mxu0 %v7625_v1  ;;  %v7672_v62 = vld [vmem:[%s9421_s1 + $0xf90] sm:$0xff]   ;;  %v7674_v0 = vld [vmem:[%s9421_s1 + $0xfc8] sm:$0xff]  }
 0x1ce   :  { %7018 = vmatprep.subr.bf16.mxu1 %v7626_v2  ;;  %v7675_v1 = vld [vmem:[%s9421_s1 + $0xf08] sm:$0xff]  }
 0x1cf   :  { %v7676_v2 = vld [vmem:[%s9421_s1 + $0xf88] sm:$0xff]  }
 0x1d0   :  { %6997 = vmatpush3.bf16.msra.mxu0 %v7627_v3  ;;  %v7677_v3 = vld [vmem:[%s9421_s1 + $0xf40] sm:$0xff]  }
 0x1d1   :  { %7019 = vmatpush3.bf16.msra.mxu1 %v7628_v4  ;;  %6998 = vmatprep.subr.bf16.mxu0 %v7629_v5  ;;  %v7678_v4 = vld [vmem:[%s9421_s1 + $0xfc0] sm:$0xff]  }
 0x1d2   :  { %7020 = vmatprep.subr.bf16.mxu1 %v7630_v6  ;;  %v7679_v5 = vld [vmem:[%s9421_s1 + $0xf00] sm:$0xff]  }
 0x1d3   :  { %v7680_v6 = vld [vmem:[%s9421_s1 + $0xf80] sm:$0xff]  }
 0x1d4   :  { %6999 = vmatpush3.bf16.msra.mxu0 %v7631_v7  ;;  %v51_v7 = vld [vmem:[%s9422_s0 + $0xf0] sm:$0xff] }
 0x1d5   :  { %7021 = vmatpush3.bf16.msra.mxu1 %v7632_v8  ;;  %7000 = vmatprep.subr.bf16.mxu0 %v7633_v9  ;;  %v52_v8 = vld [vmem:[%s9422_s0 + $0xf8] sm:$0xff] }
 0x1d6   :  { %7022 = vmatprep.subr.bf16.mxu1 %v7634_v10  ;;  %v5849_v10 = vcombine.low %v51_v7, %v51_v7 }
 0x1d8   :  { %7001 = vmatpush3.bf16.msra.mxu0 %v7635_v11  ;;  %v5850_v11 = vcombine.high %v51_v7, %v51_v7 }
 0x1d9   :  { %7023 = vmatpush3.bf16.msra.mxu1 %v7636_v12  ;;  %7002 = vmatprep.subr.bf16.mxu0 %v7637_v13  ;;  %v5851_v12 = vcombine.low %v52_v8, %v52_v8  ;;  %v5852_v13 = vcombine.high %v52_v8, %v52_v8 }
 0x1da   :  { %7024 = vmatprep.subr.bf16.mxu1 %v7638_v14 }
 0x1dc   :  { %7003 = vmatpush3.bf16.msra.mxu0 %v7639_v15 }
 0x1dd   :  { %7025 = vmatpush3.bf16.msra.mxu1 %v7640_v16  ;;  %7004 = vmatprep.subr.bf16.mxu0 %v7641_v17 }
 0x1de   :  { %7026 = vmatprep.subr.bf16.mxu1 %v7642_v18 }
 0x1e0   :  { %7005 = vmatpush3.bf16.msra.mxu0 %v7643_v19 }
 0x1e1   :  { %7027 = vmatpush3.bf16.msra.mxu1 %v7644_v20  ;;  %7034 = vmatprep.subr.bf16.mxu0 %v7649_v29 }
 0x1e2   :  { %7056 = vmatprep.subr.bf16.mxu1 %v7650_v30 }
 0x1e3   :  { %v6742_v25 = vpop.f32.mrf.mxu0  ;;  %5533 = vmatmul.mubr.bf16.vlgmr.msra.gmra.mxu0 %v5845_v22 }
 0x1e4   :  { %v6764_v26 = vpop.f32.mrf.mxu1  ;;  %5573 = vmatmul.mubr.bf16.vlgmr.msra.gmra.mxu1 %v5847_v27  ;;  %7035 = vmatpush3.bf16.msra.mxu0 %v7651_v33 }
 0x1e5   :  { %v6743_v31 = vpop.f32.mrf.mxu0  ;;  %7057 = vmatpush3.bf16.msra.mxu1 %v7652_v36  ;;  %7036 = vmatprep.subr.bf16.mxu0 %v7653_v40  ;;  %v7687_v40 = vld [vmem:[%s9424_s3 + $0x28] sm:$0xff]  }
 0x1e6   :  { %v6765_v32 = vpop.f32.mrf.mxu1  ;;  %v6744_v34 = vadd.f32 %v6743_v31, %v6742_v25  ;;  %7058 = vmatprep.subr.bf16.mxu1 %v7654_v41  ;;  %5612 = vmatprep.mubr.bf16.mxu0 %v5850_v11  ;;  %v7688_v41 = vld [vmem:[%s9424_s3 + $0x20] sm:$0xff]  }
 0x1e7   :  { %v6766_v35 = vadd.f32 %v6765_v32, %v6764_v26  ;;  %v6745_v37 = vpop.f32.mrf.mxu0  ;;  %5652 = vmatprep.mubr.bf16.mxu1 %v5852_v13 }
 0x1e8   :  { %v6767_v38 = vpop.f32.mrf.mxu1  ;;  %v5055_v39 = vadd.f32 %v6744_v34, %v9199_v57  ;;  %7037 = vmatpush3.bf16.msra.mxu0 %v7655_v45  ;;  %v7667_v57 = vld [vmem:[%s9421_s1 + $0xf18] sm:$0xff]   ;;  %v7697_v37 = vmov 0.0  }
 0x1e9   :  { %v6746_v42 = vpop.f32.mrf.mxu0  ;;  %7059 = vmatpush3.bf16.msra.mxu1 %v7656_v46  ;;  %7038 = vmatprep.subr.bf16.mxu0 %v7657_v47  ;;  %v7685_v38 = vld [vmem:[%s9424_s3 + $0x38] sm:$0xff]  }
 0x1ea   :  { %v6768_v43 = vpop.f32.mrf.mxu1  ;;  %v9304_v44 = vadd.f32 %v6766_v35, %v5055_v39  ;;  %7060 = vmatprep.subr.bf16.mxu1 %v7658_v48  ;;  %v7686_v39 = vld [vmem:[%s9424_s3 + $0x30] sm:$0xff]   ;;  %v7689_v42 = vld [vmem:[%s9424_s3 + $0x18] sm:$0xff]  }
 0x1ec   :  { %7039 = vmatpush3.bf16.msra.mxu0 %v7659_v49  ;;  %v7690_v49 = vld [vmem:[%s9424_s3 + $0x10] sm:$0xff]  }
 0x1ed   :  { %7061 = vmatpush3.bf16.msra.mxu1 %v7660_v50  ;;  %7040 = vmatprep.subr.bf16.mxu0 %v7661_v51 }
 0x1ee   :  { %7062 = vmatprep.subr.bf16.mxu1 %v7662_v52 }
 0x1f0   :  { %7041 = vmatpush3.bf16.msra.mxu0 %v7663_v53 }
 0x1f1   :  { %7063 = vmatpush3.bf16.msra.mxu1 %v7664_v54  ;;  %7042 = vmatprep.subr.bf16.mxu0 %v7665_v55 }
 0x1f2   :  { %7064 = vmatprep.subr.bf16.mxu1 %v7666_v56  ;;  %v7691_v56 = vld [vmem:[%s9424_s3 + $0x8] sm:$0xff]  }
 0x1f4   :  { %7043 = vmatpush3.bf16.msra.mxu0 %v7667_v57  ;;  %v7692_v57 = vld [vmem:[%s9424_s3] sm:$0xff]  }
 0x1f5   :  { %7065 = vmatpush3.bf16.msra.mxu1 %v7668_v58  ;;  %7044 = vmatprep.subr.bf16.mxu0 %v7669_v59 }
 0x1f6   :  { %7066 = vmatprep.subr.bf16.mxu1 %v7670_v60 }
 0x1f8   :  { %7045 = vmatpush3.bf16.msra.mxu0 %v7671_v61 }
 0x1f9   :  { %7067 = vmatpush3.bf16.msra.mxu1 %v7672_v62  ;;  %7046 = vmatprep.subr.bf16.mxu0 %v7673_v63 }
 0x1fa   :  { %7068 = vmatprep.subr.bf16.mxu1 %v7674_v0 }
 0x1fc   :  { %7047 = vmatpush3.bf16.msra.mxu0 %v7675_v1 }
 0x1fd   :  { %7069 = vmatpush3.bf16.msra.mxu1 %v7676_v2  ;;  %7048 = vmatprep.subr.bf16.mxu0 %v7677_v3 }
 0x1fe   :  { %7070 = vmatprep.subr.bf16.mxu1 %v7678_v4 }
 0x200   :  { %7049 = vmatpush3.bf16.msra.mxu0 %v7679_v5 }
 0x201   :  { %7071 = vmatpush3.bf16.msra.mxu1 %v7680_v6  ;;  %7087 = vmatprep.subr.bf16.mxu0 %v7697_v37 }
 0x203   :  { %v6786_v9 = vpop.f32.mrf.mxu0  ;;  %5613 = vmatmul.mubr.bf16.vlgmr.msra.gmra.mxu0 %v5849_v10 }
 0x204   :  { %v6808_v14 = vpop.f32.mrf.mxu1  ;;  %5653 = vmatmul.mubr.bf16.vlgmr.msra.gmra.mxu1 %v5851_v12  ;;  %7088 = vmatpush3.bf16.msra.mxu0 %v7685_v38 }
 0x205   :  { %v6787_v15 = vpop.f32.mrf.mxu0  ;;  %7089 = vmatprep.subr.bf16.mxu0 %v7697_v37  ;;  %7103 = vmatprep.mubr.msk.bf16.mxu0 %vm7698_vm0, %v7697_v37 }
 0x206   :  { %v6788_v16 = vadd.f32 %v6787_v15, %v6786_v9  ;;  %v6809_v17 = vpop.f32.mrf.mxu1 }
 0x207   :  { %v6810_v18 = vadd.f32 %v6809_v17, %v6808_v14  ;;  %v6789_v19 = vpop.f32.mrf.mxu0 }
 0x208   :  { %v5135_v20 = vadd.f32 %v6788_v16, %v9304_v44  ;;  %v6811_v21 = vpop.f32.mrf.mxu1  ;;  %7090 = vmatpush3.bf16.msra.mxu0 %v7686_v39 }
 0x209   :  { %v6790_v22 = vpop.f32.mrf.mxu0  ;;  %7091 = vmatprep.subr.bf16.mxu0 %v7697_v37 }
 0x20a   :  { %v5175_v23 = vadd.f32 %v6810_v18, %v5135_v20  ;;  %v6812_v24 = vpop.f32.mrf.mxu1 }
 0x20c   :  { %7092 = vmatpush3.bf16.msra.mxu0 %v7687_v40 }
 0x20d   :  { %7093 = vmatprep.subr.bf16.mxu0 %v7697_v37 }
 0x210   :  { %7094 = vmatpush3.bf16.msra.mxu0 %v7688_v41 }
 0x211   :  { %7095 = vmatprep.subr.bf16.mxu0 %v7697_v37 }
 0x214   :  { %7096 = vmatpush3.bf16.msra.mxu0 %v7689_v42 }
 0x215   :  { %7097 = vmatprep.subr.bf16.mxu0 %v7697_v37 }
 0x218   :  { %7098 = vmatpush3.bf16.msra.mxu0 %v7690_v49 }
 0x219   :  { %7099 = vmatprep.subr.bf16.mxu0 %v7697_v37 }
 0x21c   :  { %7100 = vmatpush3.bf16.msra.mxu0 %v7691_v56 }
 0x21d   :  { %7101 = vmatprep.subr.bf16.mxu0 %v7697_v37 }
 0x220   :  { %7102 = vmatpush3.bf16.msra.mxu0 %v7692_v57 }
 0x223   :  { %v6830_v25 = vpop.f32.mrf.mxu0 }
 0x224   :  { %v6852_v26 = vpop.f32.mrf.mxu1 }
 0x225   :  { %v6831_v27 = vpop.f32.mrf.mxu0 }
 0x226   :  { %v6832_v28 = vadd.f32 %v6831_v27, %v6830_v25  ;;  %v6853_v29 = vpop.f32.mrf.mxu1 }
 0x227   :  { %v6854_v30 = vadd.f32 %v6853_v29, %v6852_v26  ;;  %v6833_v31 = vpop.f32.mrf.mxu0 }
 0x228   :  { %v5215_v32 = vadd.f32 %v6832_v28, %v5175_v23  ;;  %v6855_v33 = vpop.f32.mrf.mxu1 }
 0x229   :  { %v6834_v34 = vpop.f32.mrf.mxu0 }
 0x22a   :  { %v5255_v35 = vadd.f32 %v6854_v30, %v5215_v32  ;;  %v6856_v36 = vpop.f32.mrf.mxu1 }
 0x243   :  { %v6874_v43 = vpop.f32.mrf.mxu0 }
 0x244   :  { %v6896_v44 = vpop.f32.mrf.mxu1 }
 0x245   :  { %v6875_v45 = vpop.f32.mrf.mxu0 }
 0x246   :  { %v6897_v46 = vpop.f32.mrf.mxu1  ;;  %v6876_v47 = vadd.f32 %v6875_v45, %v6874_v43 }
 0x247   :  { %v6898_v48 = vadd.f32 %v6897_v46, %v6896_v44  ;;  %v6877_v50 = vpop.f32.mrf.mxu0  ;;  %v6365_v44 = vld [vmem:[%s9425_s4] ss:$0 sm:$0xff] }
 0x248   :  { %v6899_v51 = vpop.f32.mrf.mxu1  ;;  %v5295_v52 = vadd.f32 %v6876_v47, %v5255_v35 }
 0x249   :  { %v6878_v53 = vpop.f32.mrf.mxu0 }
 0x24a   :  { %v6900_v54 = vpop.f32.mrf.mxu1  ;;  %v5335_v55 = vadd.f32 %v6898_v48, %v5295_v52 }
 0x263   :  { %v6918_v58 = vpop.f32.mrf.mxu0 }
 0x264   :  { %v6940_v59 = vpop.f32.mrf.mxu1 }
 0x265   :  { %v6919_v60 = vpop.f32.mrf.mxu0 }
 0x266   :  { %v6920_v61 = vadd.f32 %v6919_v60, %v6918_v58  ;;  %v6941_v62 = vpop.f32.mrf.mxu1 }
 0x267   :  { %v6942_v63 = vadd.f32 %v6941_v62, %v6940_v59  ;;  %v6921_v0 = vpop.f32.mrf.mxu0 }
 0x268   :  { %v5375_v1 = vadd.f32 %v6920_v61, %v5335_v55  ;;  %v6943_v2 = vpop.f32.mrf.mxu1 }
 0x269   :  { %v6922_v3 = vpop.f32.mrf.mxu0 }
 0x26a   :  { %v5415_v4 = vadd.f32 %v6942_v63, %v5375_v1  ;;  %v6944_v5 = vpop.f32.mrf.mxu1 }
 0x283   :  { %v6962_v6 = vpop.f32.mrf.mxu0 }
 0x284   :  { %v6984_v7 = vpop.f32.mrf.mxu1 }
 0x285   :  { %v6963_v8 = vpop.f32.mrf.mxu0 }
 0x286   :  { %v6985_v9 = vpop.f32.mrf.mxu1  ;;  %v6964_v22 = vadd.f32 %v6963_v8, %v6962_v6 }
 0x287   :  { %v6965_v10 = vpop.f32.mrf.mxu0  ;;  %v6986_v24 = vadd.f32 %v6985_v9, %v6984_v7 }
 0x288   :  { %v6987_v11 = vpop.f32.mrf.mxu1  ;;  %v5455_v23 = vadd.f32 %v6964_v22, %v5415_v4 }
 0x289   :  { %v6966_v12 = vpop.f32.mrf.mxu0 }
 0x28a   :  { %v6988_v13 = vpop.f32.mrf.mxu1  ;;  %v5495_v26 = vadd.f32 %v6986_v24, %v5455_v23 }
 0x2a3   :  { %v7006_v14 = vpop.f32.mrf.mxu0 }
 0x2a4   :  { %v7028_v15 = vpop.f32.mrf.mxu1 }
 0x2a5   :  { %v7007_v16 = vpop.f32.mrf.mxu0 }
 0x2a6   :  { %v7029_v17 = vpop.f32.mrf.mxu1  ;;  %v7008_v25 = vadd.f32 %v7007_v16, %v7006_v14 }
 0x2a7   :  { %v7009_v18 = vpop.f32.mrf.mxu0  ;;  %v7030_v28 = vadd.f32 %v7029_v17, %v7028_v15 }
 0x2a8   :  { %v7031_v19 = vpop.f32.mrf.mxu1  ;;  %v5535_v27 = vadd.f32 %v7008_v25, %v5495_v26 }
 0x2a9   :  { %v7010_v20 = vpop.f32.mrf.mxu0 }
 0x2aa   :  { %v7032_v21 = vpop.f32.mrf.mxu1  ;;  %v5575_v32 = vadd.f32 %v7030_v28, %v5535_v27 }
 0x2c3   :  { %v7050_v29 = vpop.f32.mrf.mxu0 }
 0x2c4   :  { %v7072_v30 = vpop.f32.mrf.mxu1 }
 0x2c5   :  { %v7051_v31 = vpop.f32.mrf.mxu0 }
 0x2c6   :  { %v7052_v33 = vadd.f32 %v7051_v31, %v7050_v29  ;;  %v7073_v34 = vpop.f32.mrf.mxu1 }
 0x2c7   :  { %v7053_v35 = vpop.f32.mrf.mxu0  ;;  %v7074_v37 = vadd.f32 %v7073_v34, %v7072_v30 }
 0x2c8   :  { %v5615_v36 = vadd.f32 %v7052_v33, %v5575_v32  ;;  %v7075_v38 = vpop.f32.mrf.mxu1 }
 0x2c9   :  { %v7054_v39 = vpop.f32.mrf.mxu0 }
 0x2ca   :  { %v5655_v40 = vadd.f32 %v7074_v37, %v5615_v36  ;;  %v7076_v41 = vpop.f32.mrf.mxu1 }
 0x2cc   :  { %v5660_v42 = vmax.f32 %v5655_v40, 0.0 }
 0x2ce   :  { %v5661_v43 = vpack.c.bf16 %v5660_v42, %v5660_v42 }
 0x2d0   :  { %7104 = vmatmul.mubr.bf16.vlgmr.msra.gmra.mxu0 %v5661_v43 }
 0x390   :  { %v5767_v45 = vpop.f32.mrf.mxu0 }
 0x391   :  { %v5768_v46 = vadd.f32 %v6365_v44, %v5767_v45 }
 0x392   :  { %v7105_v47 = vpop.f32.mrf.mxu0 }
 0x393   :  { %5773 = vmax.xlane.f32.xlu0 %v5768_v46 }
 0x394   :  { %v5770_v48 = vpop.f32.mrf.mxu0 }
 0x396   :  { %v7106_v49 = vpop.f32.mrf.mxu0 }
 0x41c   :  { %v5774_v50 = vpop.xlane.xlu0 %5773 }
 0x41d   :  { %v5775_v51 = vsub.f32 %v5768_v46, %v5774_v50 }
 0x41f   :  { %v5776_v52 = vmul.f32 1.442695, %v5775_v51 }
 0x421   :  { %7693 = vpow2.f32 %v5776_v52 }
 0x42e   :  { %v7694_v53 = vpop.eup %7693 }
 0x42f   :  { %5778 = vadd.xlane.f32.xlu0 %v7694_v53 }
 0x4b8   :  { %v5779_v54 = vpop.xlane.xlu0 %5778 }
 0x4b9   :  { %7695 = vlog2.f32 %v5779_v54 }
 0x4c6   :  { %v7696_v55 = vpop.eup %7695 }
 0x4c7   :  { %v5781_v56 = vmul.f32 0.6931472, %v7696_v55 }
 0x4c9   :  { %v5782_v57 = vsub.f32 %v5775_v51, %v5781_v56 }
 0x4cb   :  { %5783 = vst [vmem:[%s9426_s5] sm:$0xff] %v5782_v57 }

</bundles_post_ra>
